<compile_context>
chip_gen: v7x
topology: tpu7x:2x2x1
jax: 0.10.0
libtpu: 0.0.40
codegen_flags: <defaults>
</compile_context>

<pallas_src>
import jax
import jax.numpy as jnp
from jax.experimental import pallas as pl
from jax.experimental.pallas import tpu as pltpu


NEG_SENTINEL = -10000.0   # matches the PyTorch "- 10000.0 * (1 - mask)"
TIME_TILE = 16            # timesteps per grid step (TT*BT = 256 = MXU M on v6e/v7x)
BATCH_TILE = 16           # bf16 sublane packing (16x128 vreg); per-core batch shard


def _round_up(x, m):
    return (x + m - 1) // m * m


# ----------------------------------------------------------------------------
# Pallas kernel: per-time-tile input projection + BiLSTM recurrence
#                + masked running max-pool + (final step) linear head
# ----------------------------------------------------------------------------
def bilstm_maxpool_kernel(
    # inputs
    xf_ref,      # (TT*BT, D)  bf16  forward-time embeddings (time-major rows)
    xb_ref,      # (TT*BT, D)  bf16  reversed-within-length embeddings
    len_ref,     # (BT, 1)     int32 sequence lengths for this batch tile
    wihf_ref,    # (D, 4H)     bf16
    whhf_ref,    # (H, 4H)     bf16
    bf_ref,      # (1, 4H)     f32   (bias_ih + bias_hh), forward dir
    wihb_ref,    # (D, 4H)     bf16
    whhb_ref,    # (H, 4H)     bf16
    bb_ref,      # (1, 4H)     f32
    wpf_ref,     # (H, Cp)     bf16  classifier weight (fwd half), 128-lane padded
    wpb_ref,     # (H, Cp)     bf16  classifier weight (bwd half)
    bp_ref,      # (1, Cp)     f32
    # output
    out_ref,     # (BT, Cp)    f32   written only at the last time tile
    # scratch (persists across the time grid; per-core on megacore)
    gxf_s,       # (TT*BT, 4H) f32   hoisted input projection, fwd
    gxb_s,       # (TT*BT, 4H) f32   hoisted input projection, bwd
    hf_s, cf_s, hb_s, cb_s,          # (BT, H) f32 LSTM state
    mf_s, mb_s,                      # (BT, H) f32 running masked max
):
    bt, hdim = hf_s.shape
    tt = gxf_s.shape[0] // bt
    t_blk = pl.program_id(1)          # time axis ("arbitrary", carries state)

    # ---- init the resident state once per batch tile -----------------------
    @pl.when(t_blk == 0)
    def _init():
        z = jnp.zeros((bt, hdim), jnp.float32)
        neg0 = jnp.full((bt, hdim), NEG_SENTINEL, jnp.float32)
        hf_s[...] = z
        cf_s[...] = z
        hb_s[...] = z
        cb_s[...] = z
        mf_s[...] = neg0
        mb_s[...] = neg0

    # ---- hoisted input projection: one big bf16 MXU matmul per direction ---
    # TODO(synk): software-pipeline this projection against the previous
    # tile's recurrence (2-slot gx scratch, recurrence shifted by one tile) to
    # hide it entirely; kept simple here since correctness risk > benefit at
    # these sizes.
    gxf_s[...] = (
        jnp.dot(xf_ref[...], wihf_ref[...], preferred_element_type=jnp.float32)
        + bf_ref[...]
    )
    gxb_s[...] = (
        jnp.dot(xb_ref[...], wihb_ref[...], preferred_element_type=jnp.float32)
        + bb_ref[...]
    )

    # ---- loop-invariant loads / hoisted broadcasts --------------------------
    whh_f = whhf_ref[...]
    whh_b = whhb_ref[...]
    len_b = jnp.broadcast_to(len_ref[...], (bt, hdim))   # hoisted (BT,1)->(BT,H)
    neg = jnp.full((bt, hdim), NEG_SENTINEL, jnp.float32)
    t_base = t_blk * tt

    h_f = hf_s[...]
    c_f = cf_s[...]
    h_b = hb_s[...]
    c_b = cb_s[...]
    m_f = mf_s[...]
    m_b = mb_s[...]

    def lstm_update(gates, c):
        # PyTorch gate order i, f, g, o; elementwise math kept in f32.
        # TODO(synk): at production sizes use H a multiple of 128 so these gate
        # slices are lane-aligned vreg views instead of sub-128-lane extracts.
        i = jax.nn.sigmoid(gates[:, 0:hdim])
        f = jax.nn.sigmoid(gates[:, hdim:2 * hdim])
        g = jnp.tanh(gates[:, 2 * hdim:3 * hdim])
        o = jax.nn.sigmoid(gates[:, 3 * hdim:4 * hdim])
        c_new = f * c + i * g
        h_new = o * jnp.tanh(c_new)
        return h_new, c_new

    # ---- fully-unrolled recurrence over the time tile -----------------------
    # Only h @ W_hh remains on the serial chain; fwd/bwd cells are adjacent &
    # independent so the LLO scheduler interleaves their MXU/EUP/VPU work.
    # TODO(synk): if TIME_TILE is raised well past ~32, wrap this body in
    # lax.fori_loop(unroll=8) to bound vreg live ranges.
    for j in range(tt):
        r0 = j * bt                                     # static, 16-aligned
        gates_f = gxf_s[r0:r0 + bt, :] + jnp.dot(
            h_f.astype(jnp.bfloat16), whh_f, preferred_element_type=jnp.float32)
        gates_b = gxb_s[r0:r0 + bt, :] + jnp.dot(
            h_b.astype(jnp.bfloat16), whh_b, preferred_element_type=jnp.float32)
        h_f, c_f = lstm_update(gates_f, c_f)
        h_b, c_b = lstm_update(gates_b, c_b)
        valid = (t_base + j) < len_b                    # (BT, H) bool, no new bcast
        # masked running max == max over torch's (enc*mask - 10000*(1-mask))
        m_f = jnp.maximum(m_f, jnp.where(valid, h_f, neg))
        m_b = jnp.maximum(m_b, jnp.where(valid, h_b, neg))

    hf_s[...] = h_f
    cf_s[...] = c_f
    hb_s[...] = h_b
    cb_s[...] = c_b
    mf_s[...] = m_f
    mb_s[...] = m_b

    # ---- masked max-pool -> linear head (lane-dense Cp-wide output) ---------
    @pl.when(t_blk == pl.num_programs(1) - 1)
    def _finish():
        logits = (
            jnp.dot(m_f.astype(jnp.bfloat16), wpf_ref[...],
                    preferred_element_type=jnp.float32)
            + jnp.dot(m_b.astype(jnp.bfloat16), wpb_ref[...],
                      preferred_element_type=jnp.float32)
            + bp_ref[...]
        )
        out_ref[...] = logits.astype(out_ref.dtype)


# ----------------------------------------------------------------------------
# Wrapper: embedding gather, reversed stream, padding/layout, pallas_call
# ----------------------------------------------------------------------------
@jax.jit
def text_single_model_forward(tokens, lengths, params):
    """tokens: (B, T) int32; lengths: (B,) int32 -> logits (B, C) float32."""
    B, T = tokens.shape
    D = params["emb"].shape[1]
    H = params["whh_f"].shape[0]
    C = params["wp"].shape[1]
    bf16 = jnp.bfloat16

    b_pad = _round_up(max(B, BATCH_TILE), BATCH_TILE)
    t_pad = _round_up(T, TIME_TILE)
    c_pad = _round_up(max(C, 128), 128)          # lane-dense output store
    n_batch_tiles = b_pad // BATCH_TILE
    n_time_tiles = t_pad // TIME_TILE
    tile_rows = TIME_TILE * BATCH_TILE

    lengths = lengths.astype(jnp.int32)

    # Cast the table to bf16 BEFORE the gather: gather / reverse / transpose /
    # pad all move half the bytes; the kernel consumes bf16 anyway.
    emb_table = params["emb"].astype(bf16)
    emb = jnp.take(emb_table, tokens, axis=0)                     # (B,T,D) bf16

    # Backward-direction stream: reverse each row within its valid length
    # (reproduces pack_padded_sequence semantics). Positions >= length are
    # never pooled.
    t_idx = jnp.arange(T, dtype=jnp.int32)[None, :]
    rev_idx = jnp.clip(lengths[:, None] - 1 - t_idx, 0, T - 1)
    emb_rev = jnp.take_along_axis(emb, rev_idx[:, :, None], axis=1)

    def to_stream(x_btd):
        # -> (n_batch_tiles, t_pad*BATCH_TILE, D), time-major rows per batch tile
        x = jnp.transpose(x_btd, (1, 0, 2))                       # (T,B,D)
        x = jnp.pad(x, ((0, t_pad - T), (0, b_pad - B), (0, 0)))  # (t_pad,b_pad,D)
        x = x.reshape(t_pad, n_batch_tiles, BATCH_TILE, D)
        x = jnp.transpose(x, (1, 0, 2, 3))                        # (nbt,t_pad,BT,D)
        return x.reshape(n_batch_tiles, t_pad * BATCH_TILE, D)

    xf = to_stream(emb)
    xb = to_stream(emb_rev)
    len_col = jnp.pad(lengths, (0, b_pad - B))[:, None]           # (b_pad, 1)

    wih_f = params["wih_f"].astype(bf16)
    whh_f = params["whh_f"].astype(bf16)
    wih_b = params["wih_b"].astype(bf16)
    whh_b = params["whh_b"].astype(bf16)
    b_f = params["b_f"].astype(jnp.float32)
    b_b = params["b_b"].astype(jnp.float32)
    wp = params["wp"]
    wp_f = jnp.zeros((H, c_pad), bf16).at[:, :C].set(wp[:H].astype(bf16))
    wp_b = jnp.zeros((H, c_pad), bf16).at[:, :C].set(wp[H:].astype(bf16))
    bp_pad = jnp.zeros((1, c_pad), jnp.float32).at[:, :C].set(params["bp"])

    # Loop-invariant operands: single-buffered (no dead 2x weight VMEM).
    def inv(shape):
        nd = len(shape)
        return pl.BlockSpec(shape, lambda b, t: (0,) * nd,
                            pipeline_mode=pl.Buffered(1))

    x_spec = pl.BlockSpec((None, tile_rows, D), lambda b, t: (b, t, 0))
    len_spec = pl.BlockSpec((BATCH_TILE, 1), lambda b, t: (b, 0))

    grid_spec = pltpu.PrefetchScalarGridSpec(
        num_scalar_prefetch=0,
        grid=(n_batch_tiles, n_time_tiles),
        in_specs=[
            x_spec,                                               # xf (streamed)
            x_spec,                                               # xb (streamed)
            len_spec,                                             # lengths
            inv((D, 4 * H)), inv((H, 4 * H)), inv((1, 4 * H)),    # fwd weights
            inv((D, 4 * H)), inv((H, 4 * H)), inv((1, 4 * H)),    # bwd weights
            inv((H, c_pad)), inv((H, c_pad)), inv((1, c_pad)),    # head
        ],
        out_specs=pl.BlockSpec((BATCH_TILE, c_pad), lambda b, t: (b, 0)),
        scratch_shapes=[
            pltpu.VMEM((tile_rows, 4 * H), jnp.float32),          # gx fwd
            pltpu.VMEM((tile_rows, 4 * H), jnp.float32),          # gx bwd
            pltpu.VMEM((BATCH_TILE, H), jnp.float32),             # h_f
            pltpu.VMEM((BATCH_TILE, H), jnp.float32),             # c_f
            pltpu.VMEM((BATCH_TILE, H), jnp.float32),             # h_b
            pltpu.VMEM((BATCH_TILE, H), jnp.float32),             # c_b
            pltpu.VMEM((BATCH_TILE, H), jnp.float32),             # m_f
            pltpu.VMEM((BATCH_TILE, H), jnp.float32),             # m_b
        ],
    )

    out = pl.pallas_call(
        bilstm_maxpool_kernel,
        out_shape=jax.ShapeDtypeStruct((b_pad, c_pad), jnp.float32),
        grid_spec=grid_spec,
        compiler_params=pltpu.CompilerParams(
            # batch tiles are independent (state re-inits at t==0) -> shard
            # across v7x's 2 TensorCores; time carries the recurrence.
            dimension_semantics=("parallel", "arbitrary"),
            vmem_limit_bytes=48 * 1024 * 1024,   # <= v7x physical 64 MiB
        ),
    )(xf, xb, len_col,
      wih_f, whh_f, b_f, wih_b, whh_b, b_b, wp_f, wp_b, bp_pad)

    return out[:B, :C]


# ----------------------------------------------------------------------------
# Pure-JAX reference (mirrors PyTorch forward incl. packed-seq semantics, with
# the same bf16-operand / f32-accumulation numerics as the kernel)
# ----------------------------------------------------------------------------
def reference_forward(tokens, lengths, params):
    B, T = tokens.shape
    H = params["whh_f"].shape[0]
    bf16, f32 = jnp.bfloat16, jnp.float32
    lengths = lengths.astype(jnp.int32)

    emb = jnp.take(params["emb"], tokens, axis=0)                 # (B,T,D)
    t_idx = jnp.arange(T, dtype=jnp.int32)[None, :]
    rev_idx = jnp.clip(lengths[:, None] - 1 - t_idx, 0, T - 1)
    emb_rev = jnp.take_along_axis(emb, rev_idx[:, :, None], axis=1)

    def run_lstm(x_btd, wih, whh, b):
        gx = jnp.dot(x_btd.astype(bf16), wih.astype(bf16),
                     preferred_element_type=f32) + b              # (B,T,4H)
        whh = whh.astype(bf16)

        def step(carry, gx_t):
            h, c = carry
            gates = gx_t + jnp.dot(h.astype(bf16), whh,
                                   preferred_element_type=f32)
            i = jax.nn.sigmoid(gates[:, 0:H])
            f = jax.nn.sigmoid(gates[:, H:2 * H])
            g = jnp.tanh(gates[:, 2 * H:3 * H])
            o = jax.nn.sigmoid(gates[:, 3 * H:4 * H])
            c = f * c + i * g
            h = o * jnp.tanh(c)
            return (h, c), h

        zeros = jnp.zeros((B, H), f32)
        _, hs = jax.lax.scan(step, (zeros, zeros), jnp.transpose(gx, (1, 0, 2)))
        return jnp.transpose(hs, (1, 0, 2))                       # (B,T,H)

    h_fwd = run_lstm(emb, params["wih_f"], params["whh_f"], params["b_f"][0])
    h_bwd_rev = run_lstm(emb_rev, params["wih_b"], params["whh_b"], params["b_b"][0])
    # map backward outputs back to original time order
    h_bwd = jnp.take_along_axis(h_bwd_rev, rev_idx[:, :, None], axis=1)

    mask = (t_idx < lengths[:, None]).astype(f32)[:, :, None]     # (B,T,1)
    enc = jnp.concatenate([h_fwd, h_bwd], axis=-1) * mask
    pooled = jnp.max(enc - 10000.0 * (1.0 - mask), axis=1)        # (B,2H)
    logits = jnp.dot(pooled.astype(bf16), params["wp"].astype(bf16),
                     preferred_element_type=f32) + params["bp"][0]
    return logits


# ----------------------------------------------------------------------------
# Deterministic parameter init + demo
# ----------------------------------------------------------------------------
def init_params(key, vocab_size, text_dim, text_hidden, class_num):
    ks = jax.random.split(key, 10)
    D, H, C = text_dim, text_hidden, class_num
    s = 0.1
    return {
        "emb":   jax.random.normal(ks[0], (vocab_size + 1, D), jnp.float32) * s,
        "wih_f": jax.random.normal(ks[1], (D, 4 * H), jnp.float32) * s,
        "whh_f": jax.random.normal(ks[2], (H, 4 * H), jnp.float32) * s,
        "b_f":   jax.random.normal(ks[3], (1, 4 * H), jnp.float32) * s,
        "wih_b": jax.random.normal(ks[4], (D, 4 * H), jnp.float32) * s,
        "whh_b": jax.random.normal(ks[5], (H, 4 * H), jnp.float32) * s,
        "b_b":   jax.random.normal(ks[6], (1, 4 * H), jnp.float32) * s,
        "wp":    jax.random.normal(ks[7], (2 * H, C), jnp.float32) * s,
        "bp":    jax.random.normal(ks[8], (1, C), jnp.float32) * s,
    }


if __name__ == "__main__":
    # Small but multi-tile: 2 batch tiles (b_pad=32) x 3 time tiles (t_pad=48)
    B, T = 18, 40
    vocab_size, text_dim, text_hidden, class_num = 50, 32, 32, 2

    key = jax.random.PRNGKey(0)
    k_par, k_tok, k_len = jax.random.split(key, 3)
    params = init_params(k_par, vocab_size, text_dim, text_hidden, class_num)

    tokens = jax.random.randint(k_tok, (B, T), 1, vocab_size + 1, dtype=jnp.int32)
    lengths = jax.random.randint(k_len, (B,), 1, T + 1, dtype=jnp.int32)
    # zero out padded token positions (as a dataloader would)
    tokens = tokens * (jnp.arange(T)[None, :] < lengths[:, None]).astype(jnp.int32)

    logits = text_single_model_forward(tokens, lengths, params)
    logits = jax.block_until_ready(logits)

    ref = reference_forward(tokens, lengths, params)
    assert logits.shape == (B, class_num)
    assert jnp.allclose(logits, ref, atol=2e-3, rtol=2e-3), (logits, ref)

    print("KERNEL_OK")
</pallas_src>

<mosaic_0001>
module attributes {stable_mosaic.version = 11 : i64} {
  func.func @bilstm_maxpool_kernel(%arg0: i32, %arg1: i32, %arg2: memref<1x256x32xbf16, #tpu.memory_space<vmem>>, %arg3: memref<1x256x32xbf16, #tpu.memory_space<vmem>>, %arg4: memref<16x1xi32, #tpu.memory_space<vmem>>, %arg5: memref<32x128xbf16, #tpu.memory_space<vmem>>, %arg6: memref<32x128xbf16, #tpu.memory_space<vmem>>, %arg7: memref<1x128xf32, #tpu.memory_space<vmem>>, %arg8: memref<32x128xbf16, #tpu.memory_space<vmem>>, %arg9: memref<32x128xbf16, #tpu.memory_space<vmem>>, %arg10: memref<1x128xf32, #tpu.memory_space<vmem>>, %arg11: memref<32x128xbf16, #tpu.memory_space<vmem>>, %arg12: memref<32x128xbf16, #tpu.memory_space<vmem>>, %arg13: memref<1x128xf32, #tpu.memory_space<vmem>>, %arg14: memref<16x128xf32, #tpu.memory_space<vmem>>, %arg15: memref<256x128xf32, #tpu.memory_space<vmem>>, %arg16: memref<256x128xf32, #tpu.memory_space<vmem>>, %arg17: memref<16x32xf32, #tpu.memory_space<vmem>>, %arg18: memref<16x32xf32, #tpu.memory_space<vmem>>, %arg19: memref<16x32xf32, #tpu.memory_space<vmem>>, %arg20: memref<16x32xf32, #tpu.memory_space<vmem>>, %arg21: memref<16x32xf32, #tpu.memory_space<vmem>>, %arg22: memref<16x32xf32, #tpu.memory_space<vmem>>) attributes {dimension_semantics = [#tpu.dimension_semantics<parallel>, #tpu.dimension_semantics<arbitrary>], iteration_bounds = array<i64: 2, 3>, scalar_prefetch = 0 : i64, scratch_operands = 8 : i64, tpu.core_type = #tpu.core_type<tc>, window_params = [{transform_indices = @transform_0, window_bounds = array<i64: 1, 256, 32>}, {transform_indices = @transform_1, window_bounds = array<i64: 1, 256, 32>}, {transform_indices = @transform_2, window_bounds = array<i64: 16, 1>}, {pipeline_mode = #tpu.pipeline_mode<synchronous>, transform_indices = @transform_3, window_bounds = array<i64: 32, 128>}, {pipeline_mode = #tpu.pipeline_mode<synchronous>, transform_indices = @transform_4, window_bounds = array<i64: 32, 128>}, {pipeline_mode = #tpu.pipeline_mode<synchronous>, transform_indices = @transform_5, window_bounds = array<i64: 1, 128>}, {pipeline_mode = #tpu.pipeline_mode<synchronous>, transform_indices = @transform_6, window_bounds = array<i64: 32, 128>}, {pipeline_mode = #tpu.pipeline_mode<synchronous>, transform_indices = @transform_7, window_bounds = array<i64: 32, 128>}, {pipeline_mode = #tpu.pipeline_mode<synchronous>, transform_indices = @transform_8, window_bounds = array<i64: 1, 128>}, {pipeline_mode = #tpu.pipeline_mode<synchronous>, transform_indices = @transform_9, window_bounds = array<i64: 32, 128>}, {pipeline_mode = #tpu.pipeline_mode<synchronous>, transform_indices = @transform_10, window_bounds = array<i64: 32, 128>}, {pipeline_mode = #tpu.pipeline_mode<synchronous>, transform_indices = @transform_11, window_bounds = array<i64: 1, 128>}, {transform_indices = @transform_12, window_bounds = array<i64: 16, 128>}]} {
    %c0_i32 = arith.constant 0 : i32
    %0 = arith.cmpi eq, %arg1, %c0_i32 : i32
    %1 = arith.extui %0 : i1 to i32
    %c0_i32_0 = arith.constant 0 : i32
    %2 = arith.cmpi ne, %1, %c0_i32_0 : i32
    scf.if %2 {
      %cst_230 = arith.constant 0.000000e+00 : f32
      %1081 = vector.broadcast %cst_230 : f32 to vector<16x32xf32>
      %cst_231 = arith.constant -1.000000e+04 : f32
      %1082 = vector.broadcast %cst_231 : f32 to vector<16x32xf32>
      %c0_232 = arith.constant 0 : index
      %c0_233 = arith.constant 0 : index
      %1083 = vector.load %arg17[%c0_232, %c0_233] : memref<16x32xf32, #tpu.memory_space<vmem>>, vector<16x32xf32>
      tpu.vector_store %arg17[%c0_232, %c0_233], %1081 {strides = array<i32>} : memref<16x32xf32, #tpu.memory_space<vmem>>, vector<16x32xf32>,
      %c0_234 = arith.constant 0 : index
      %c0_235 = arith.constant 0 : index
      %1084 = vector.load %arg18[%c0_234, %c0_235] : memref<16x32xf32, #tpu.memory_space<vmem>>, vector<16x32xf32>
      tpu.vector_store %arg18[%c0_234, %c0_235], %1081 {strides = array<i32>} : memref<16x32xf32, #tpu.memory_space<vmem>>, vector<16x32xf32>,
      %c0_236 = arith.constant 0 : index
      %c0_237 = arith.constant 0 : index
      %1085 = vector.load %arg19[%c0_236, %c0_237] : memref<16x32xf32, #tpu.memory_space<vmem>>, vector<16x32xf32>
      tpu.vector_store %arg19[%c0_236, %c0_237], %1081 {strides = array<i32>} : memref<16x32xf32, #tpu.memory_space<vmem>>, vector<16x32xf32>,
      %c0_238 = arith.constant 0 : index
      %c0_239 = arith.constant 0 : index
      %1086 = vector.load %arg20[%c0_238, %c0_239] : memref<16x32xf32, #tpu.memory_space<vmem>>, vector<16x32xf32>
      tpu.vector_store %arg20[%c0_238, %c0_239], %1081 {strides = array<i32>} : memref<16x32xf32, #tpu.memory_space<vmem>>, vector<16x32xf32>,
      %c0_240 = arith.constant 0 : index
      %c0_241 = arith.constant 0 : index
      %1087 = vector.load %arg21[%c0_240, %c0_241] : memref<16x32xf32, #tpu.memory_space<vmem>>, vector<16x32xf32>
      tpu.vector_store %arg21[%c0_240, %c0_241], %1082 {strides = array<i32>} : memref<16x32xf32, #tpu.memory_space<vmem>>, vector<16x32xf32>,
      %c0_242 = arith.constant 0 : index
      %c0_243 = arith.constant 0 : index
      %1088 = vector.load %arg22[%c0_242, %c0_243] : memref<16x32xf32, #tpu.memory_space<vmem>>, vector<16x32xf32>
      tpu.vector_store %arg22[%c0_242, %c0_243], %1082 {strides = array<i32>} : memref<16x32xf32, #tpu.memory_space<vmem>>, vector<16x32xf32>,
    } else {
    }
    %c0 = arith.constant 0 : index
    %c0_1 = arith.constant 0 : index
    %c0_2 = arith.constant 0 : index
    %3 = vector.load %arg2[%c0, %c0_1, %c0_2] : memref<1x256x32xbf16, #tpu.memory_space<vmem>>, vector<1x256x32xbf16>
    %4 = vector.shape_cast %3 : vector<1x256x32xbf16> to vector<256x32xbf16>
    %c0_3 = arith.constant 0 : index
    %c0_4 = arith.constant 0 : index
    %5 = vector.load %arg5[%c0_3, %c0_4] : memref<32x128xbf16, #tpu.memory_space<vmem>>, vector<32x128xbf16>
    %cst = arith.constant dense<0.000000e+00> : vector<256x128xf32>
    %6 = tpu.matmul %4, %5, %cst {dimension_numbers = #tpu.dot_dimension_numbers<[1], [0], [0], [1], [0, 0, 1, 1], [], []>} : vector<256x32xbf16>, vector<32x128xbf16>, vector<256x128xf32> -> vector<256x128xf32>
    %c0_5 = arith.constant 0 : index
    %c0_6 = arith.constant 0 : index
    %7 = vector.load %arg7[%c0_5, %c0_6] : memref<1x128xf32, #tpu.memory_space<vmem>>, vector<1x128xf32>
    %8 = vector.broadcast %7 : vector<1x128xf32> to vector<256x128xf32>
    %9 = arith.addf %6, %8 : vector<256x128xf32>
    %c0_7 = arith.constant 0 : index
    %c0_8 = arith.constant 0 : index
    %10 = vector.load %arg15[%c0_7, %c0_8] : memref<256x128xf32, #tpu.memory_space<vmem>>, vector<256x128xf32>
    tpu.vector_store %arg15[%c0_7, %c0_8], %9 {strides = array<i32>} : memref<256x128xf32, #tpu.memory_space<vmem>>, vector<256x128xf32>,
    %c0_9 = arith.constant 0 : index
    %c0_10 = arith.constant 0 : index
    %c0_11 = arith.constant 0 : index
    %11 = vector.load %arg3[%c0_9, %c0_10, %c0_11] : memref<1x256x32xbf16, #tpu.memory_space<vmem>>, vector<1x256x32xbf16>
    %12 = vector.shape_cast %11 : vector<1x256x32xbf16> to vector<256x32xbf16>
    %c0_12 = arith.constant 0 : index
    %c0_13 = arith.constant 0 : index
    %13 = vector.load %arg8[%c0_12, %c0_13] : memref<32x128xbf16, #tpu.memory_space<vmem>>, vector<32x128xbf16>
    %cst_14 = arith.constant dense<0.000000e+00> : vector<256x128xf32>
    %14 = tpu.matmul %12, %13, %cst_14 {dimension_numbers = #tpu.dot_dimension_numbers<[1], [0], [0], [1], [0, 0, 1, 1], [], []>} : vector<256x32xbf16>, vector<32x128xbf16>, vector<256x128xf32> -> vector<256x128xf32>
    %c0_15 = arith.constant 0 : index
    %c0_16 = arith.constant 0 : index
    %15 = vector.load %arg10[%c0_15, %c0_16] : memref<1x128xf32, #tpu.memory_space<vmem>>, vector<1x128xf32>
    %16 = vector.broadcast %15 : vector<1x128xf32> to vector<256x128xf32>
    %17 = arith.addf %14, %16 : vector<256x128xf32>
    %c0_17 = arith.constant 0 : index
    %c0_18 = arith.constant 0 : index
    %18 = vector.load %arg16[%c0_17, %c0_18] : memref<256x128xf32, #tpu.memory_space<vmem>>, vector<256x128xf32>
    tpu.vector_store %arg16[%c0_17, %c0_18], %17 {strides = array<i32>} : memref<256x128xf32, #tpu.memory_space<vmem>>, vector<256x128xf32>,
    %c0_19 = arith.constant 0 : index
    %c0_20 = arith.constant 0 : index
    %19 = vector.load %arg6[%c0_19, %c0_20] : memref<32x128xbf16, #tpu.memory_space<vmem>>, vector<32x128xbf16>
    %c0_21 = arith.constant 0 : index
    %c0_22 = arith.constant 0 : index
    %20 = vector.load %arg9[%c0_21, %c0_22] : memref<32x128xbf16, #tpu.memory_space<vmem>>, vector<32x128xbf16>
    %c0_23 = arith.constant 0 : index
    %c0_24 = arith.constant 0 : index
    %21 = vector.load %arg4[%c0_23, %c0_24] : memref<16x1xi32, #tpu.memory_space<vmem>>, vector<16x1xi32>
    %22 = vector.shape_cast %21 : vector<16x1xi32> to vector<16x1xi32>
    %23 = vector.broadcast %22 : vector<16x1xi32> to vector<16x32xi32>
    %cst_25 = arith.constant -1.000000e+04 : f32
    %24 = vector.broadcast %cst_25 : f32 to vector<16x32xf32>
    %c16_i32 = arith.constant 16 : i32
    %25 = arith.muli %arg1, %c16_i32 : i32
    %c0_26 = arith.constant 0 : index
    %c0_27 = arith.constant 0 : index
    %26 = vector.load %arg17[%c0_26, %c0_27] : memref<16x32xf32, #tpu.memory_space<vmem>>, vector<16x32xf32>
    %c0_28 = arith.constant 0 : index
    %c0_29 = arith.constant 0 : index
    %27 = vector.load %arg18[%c0_28, %c0_29] : memref<16x32xf32, #tpu.memory_space<vmem>>, vector<16x32xf32>
    %c0_30 = arith.constant 0 : index
    %c0_31 = arith.constant 0 : index
    %28 = vector.load %arg19[%c0_30, %c0_31] : memref<16x32xf32, #tpu.memory_space<vmem>>, vector<16x32xf32>
    %c0_32 = arith.constant 0 : index
    %c0_33 = arith.constant 0 : index
    %29 = vector.load %arg20[%c0_32, %c0_33] : memref<16x32xf32, #tpu.memory_space<vmem>>, vector<16x32xf32>
    %c0_34 = arith.constant 0 : index
    %c0_35 = arith.constant 0 : index
    %30 = vector.load %arg21[%c0_34, %c0_35] : memref<16x32xf32, #tpu.memory_space<vmem>>, vector<16x32xf32>
    %c0_36 = arith.constant 0 : index
    %c0_37 = arith.constant 0 : index
    %31 = vector.load %arg22[%c0_36, %c0_37] : memref<16x32xf32, #tpu.memory_space<vmem>>, vector<16x32xf32>
    %c0_38 = arith.constant 0 : index
    %c0_39 = arith.constant 0 : index
    %32 = vector.load %arg15[%c0_38, %c0_39] : memref<256x128xf32, #tpu.memory_space<vmem>>, vector<16x128xf32>
    %33 = arith.truncf %26 : vector<16x32xf32> to vector<16x32xbf16>
    %cst_40 = arith.constant dense<0.000000e+00> : vector<16x128xf32>
    %34 = tpu.matmul %33, %19, %cst_40 {dimension_numbers = #tpu.dot_dimension_numbers<[1], [0], [0], [1], [0, 0, 1, 1], [], []>} : vector<16x32xbf16>, vector<32x128xbf16>, vector<16x128xf32> -> vector<16x128xf32>
    %35 = arith.addf %32, %34 : vector<16x128xf32>
    %c0_41 = arith.constant 0 : index
    %c0_42 = arith.constant 0 : index
    %36 = vector.load %arg16[%c0_41, %c0_42] : memref<256x128xf32, #tpu.memory_space<vmem>>, vector<16x128xf32>
    %37 = arith.truncf %28 : vector<16x32xf32> to vector<16x32xbf16>
    %cst_43 = arith.constant dense<0.000000e+00> : vector<16x128xf32>
    %38 = tpu.matmul %37, %20, %cst_43 {dimension_numbers = #tpu.dot_dimension_numbers<[1], [0], [0], [1], [0, 0, 1, 1], [], []>} : vector<16x32xbf16>, vector<32x128xbf16>, vector<16x128xf32> -> vector<16x128xf32>
    %39 = arith.addf %36, %38 : vector<16x128xf32>
    %40 = vector.extract_strided_slice %35 {offsets = [0, 0], sizes = [16, 32], strides = [1, 1]} : vector<16x128xf32> to vector<16x32xf32>
    %41 = arith.negf %40 : vector<16x32xf32>
    %42 = math.exp %41 : vector<16x32xf32>
    %cst_44 = arith.constant 1.000000e+00 : f32
    %43 = vector.broadcast %cst_44 : f32 to vector<16x32xf32>
    %44 = arith.addf %43, %42 : vector<16x32xf32>
    %45 = arith.divf %43, %44 : vector<16x32xf32>
    %46 = vector.extract_strided_slice %35 {offsets = [0, 32], sizes = [16, 32], strides = [1, 1]} : vector<16x128xf32> to vector<16x32xf32>
    %47 = arith.negf %46 : vector<16x32xf32>
    %48 = math.exp %47 : vector<16x32xf32>
    %cst_45 = arith.constant 1.000000e+00 : f32
    %49 = vector.broadcast %cst_45 : f32 to vector<16x32xf32>
    %50 = arith.addf %49, %48 : vector<16x32xf32>
    %51 = arith.divf %49, %50 : vector<16x32xf32>
    %52 = vector.extract_strided_slice %35 {offsets = [0, 64], sizes = [16, 32], strides = [1, 1]} : vector<16x128xf32> to vector<16x32xf32>
    %53 = math.tanh %52 : vector<16x32xf32>
    %54 = vector.extract_strided_slice %35 {offsets = [0, 96], sizes = [16, 32], strides = [1, 1]} : vector<16x128xf32> to vector<16x32xf32>
    %55 = arith.negf %54 : vector<16x32xf32>
    %56 = math.exp %55 : vector<16x32xf32>
    %cst_46 = arith.constant 1.000000e+00 : f32
    %57 = vector.broadcast %cst_46 : f32 to vector<16x32xf32>
    %58 = arith.addf %57, %56 : vector<16x32xf32>
    %59 = arith.divf %57, %58 : vector<16x32xf32>
    %60 = arith.mulf %51, %27 : vector<16x32xf32>
    %61 = arith.mulf %45, %53 : vector<16x32xf32>
    %62 = arith.addf %60, %61 : vector<16x32xf32>
    %63 = math.tanh %62 : vector<16x32xf32>
    %64 = arith.mulf %59, %63 : vector<16x32xf32>
    %65 = vector.extract_strided_slice %39 {offsets = [0, 0], sizes = [16, 32], strides = [1, 1]} : vector<16x128xf32> to vector<16x32xf32>
    %66 = arith.negf %65 : vector<16x32xf32>
    %67 = math.exp %66 : vector<16x32xf32>
    %cst_47 = arith.constant 1.000000e+00 : f32
    %68 = vector.broadcast %cst_47 : f32 to vector<16x32xf32>
    %69 = arith.addf %68, %67 : vector<16x32xf32>
    %70 = arith.divf %68, %69 : vector<16x32xf32>
    %71 = vector.extract_strided_slice %39 {offsets = [0, 32], sizes = [16, 32], strides = [1, 1]} : vector<16x128xf32> to vector<16x32xf32>
    %72 = arith.negf %71 : vector<16x32xf32>
    %73 = math.exp %72 : vector<16x32xf32>
    %cst_48 = arith.constant 1.000000e+00 : f32
    %74 = vector.broadcast %cst_48 : f32 to vector<16x32xf32>
    %75 = arith.addf %74, %73 : vector<16x32xf32>
    %76 = arith.divf %74, %75 : vector<16x32xf32>
    %77 = vector.extract_strided_slice %39 {offsets = [0, 64], sizes = [16, 32], strides = [1, 1]} : vector<16x128xf32> to vector<16x32xf32>
    %78 = math.tanh %77 : vector<16x32xf32>
    %79 = vector.extract_strided_slice %39 {offsets = [0, 96], sizes = [16, 32], strides = [1, 1]} : vector<16x128xf32> to vector<16x32xf32>
    %80 = arith.negf %79 : vector<16x32xf32>
    %81 = math.exp %80 : vector<16x32xf32>
    %cst_49 = arith.constant 1.000000e+00 : f32
    %82 = vector.broadcast %cst_49 : f32 to vector<16x32xf32>
    %83 = arith.addf %82, %81 : vector<16x32xf32>
    %84 = arith.divf %82, %83 : vector<16x32xf32>
    %85 = arith.mulf %76, %29 : vector<16x32xf32>
    %86 = arith.mulf %70, %78 : vector<16x32xf32>
    %87 = arith.addf %85, %86 : vector<16x32xf32>
    %88 = math.tanh %87 : vector<16x32xf32>
    %89 = arith.mulf %84, %88 : vector<16x32xf32>
    %c0_i32_50 = arith.constant 0 : i32
    %90 = arith.addi %25, %c0_i32_50 : i32
    %91 = vector.broadcast %90 : i32 to vector<16x32xi32>
    %92 = arith.cmpi slt, %91, %23 : vector<16x32xi32>
    %93 = arith.select %92, %64, %24 : vector<16x32xi1>, vector<16x32xf32>
    %94 = arith.maximumf %30, %93 : vector<16x32xf32>
    %95 = arith.select %92, %89, %24 : vector<16x32xi1>, vector<16x32xf32>
    %96 = arith.maximumf %31, %95 : vector<16x32xf32>
    %c16 = arith.constant 16 : index
    %c0_51 = arith.constant 0 : index
    %97 = vector.load %arg15[%c16, %c0_51] : memref<256x128xf32, #tpu.memory_space<vmem>>, vector<16x128xf32>
    %98 = arith.truncf %64 : vector<16x32xf32> to vector<16x32xbf16>
    %cst_52 = arith.constant dense<0.000000e+00> : vector<16x128xf32>
    %99 = tpu.matmul %98, %19, %cst_52 {dimension_numbers = #tpu.dot_dimension_numbers<[1], [0], [0], [1], [0, 0, 1, 1], [], []>} : vector<16x32xbf16>, vector<32x128xbf16>, vector<16x128xf32> -> vector<16x128xf32>
    %100 = arith.addf %97, %99 : vector<16x128xf32>
    %c16_53 = arith.constant 16 : index
    %c0_54 = arith.constant 0 : index
    %101 = vector.load %arg16[%c16_53, %c0_54] : memref<256x128xf32, #tpu.memory_space<vmem>>, vector<16x128xf32>
    %102 = arith.truncf %89 : vector<16x32xf32> to vector<16x32xbf16>
    %cst_55 = arith.constant dense<0.000000e+00> : vector<16x128xf32>
    %103 = tpu.matmul %102, %20, %cst_55 {dimension_numbers = #tpu.dot_dimension_numbers<[1], [0], [0], [1], [0, 0, 1, 1], [], []>} : vector<16x32xbf16>, vector<32x128xbf16>, vector<16x128xf32> -> vector<16x128xf32>
    %104 = arith.addf %101, %103 : vector<16x128xf32>
    %105 = vector.extract_strided_slice %100 {offsets = [0, 0], sizes = [16, 32], strides = [1, 1]} : vector<16x128xf32> to vector<16x32xf32>
    %106 = arith.negf %105 : vector<16x32xf32>
    %107 = math.exp %106 : vector<16x32xf32>
    %cst_56 = arith.constant 1.000000e+00 : f32
    %108 = vector.broadcast %cst_56 : f32 to vector<16x32xf32>
    %109 = arith.addf %108, %107 : vector<16x32xf32>
    %110 = arith.divf %108, %109 : vector<16x32xf32>
    %111 = vector.extract_strided_slice %100 {offsets = [0, 32], sizes = [16, 32], strides = [1, 1]} : vector<16x128xf32> to vector<16x32xf32>
    %112 = arith.negf %111 : vector<16x32xf32>
    %113 = math.exp %112 : vector<16x32xf32>
    %cst_57 = arith.constant 1.000000e+00 : f32
    %114 = vector.broadcast %cst_57 : f32 to vector<16x32xf32>
    %115 = arith.addf %114, %113 : vector<16x32xf32>
    %116 = arith.divf %114, %115 : vector<16x32xf32>
    %117 = vector.extract_strided_slice %100 {offsets = [0, 64], sizes = [16, 32], strides = [1, 1]} : vector<16x128xf32> to vector<16x32xf32>
    %118 = math.tanh %117 : vector<16x32xf32>
    %119 = vector.extract_strided_slice %100 {offsets = [0, 96], sizes = [16, 32], strides = [1, 1]} : vector<16x128xf32> to vector<16x32xf32>
    %120 = arith.negf %119 : vector<16x32xf32>
    %121 = math.exp %120 : vector<16x32xf32>
    %cst_58 = arith.constant 1.000000e+00 : f32
    %122 = vector.broadcast %cst_58 : f32 to vector<16x32xf32>
    %123 = arith.addf %122, %121 : vector<16x32xf32>
    %124 = arith.divf %122, %123 : vector<16x32xf32>
    %125 = arith.mulf %116, %62 : vector<16x32xf32>
    %126 = arith.mulf %110, %118 : vector<16x32xf32>
    %127 = arith.addf %125, %126 : vector<16x32xf32>
    %128 = math.tanh %127 : vector<16x32xf32>
    %129 = arith.mulf %124, %128 : vector<16x32xf32>
    %130 = vector.extract_strided_slice %104 {offsets = [0, 0], sizes = [16, 32], strides = [1, 1]} : vector<16x128xf32> to vector<16x32xf32>
    %131 = arith.negf %130 : vector<16x32xf32>
    %132 = math.exp %131 : vector<16x32xf32>
    %cst_59 = arith.constant 1.000000e+00 : f32
    %133 = vector.broadcast %cst_59 : f32 to vector<16x32xf32>
    %134 = arith.addf %133, %132 : vector<16x32xf32>
    %135 = arith.divf %133, %134 : vector<16x32xf32>
    %136 = vector.extract_strided_slice %104 {offsets = [0, 32], sizes = [16, 32], strides = [1, 1]} : vector<16x128xf32> to vector<16x32xf32>
    %137 = arith.negf %136 : vector<16x32xf32>
    %138 = math.exp %137 : vector<16x32xf32>
    %cst_60 = arith.constant 1.000000e+00 : f32
    %139 = vector.broadcast %cst_60 : f32 to vector<16x32xf32>
    %140 = arith.addf %139, %138 : vector<16x32xf32>
    %141 = arith.divf %139, %140 : vector<16x32xf32>
    %142 = vector.extract_strided_slice %104 {offsets = [0, 64], sizes = [16, 32], strides = [1, 1]} : vector<16x128xf32> to vector<16x32xf32>
    %143 = math.tanh %142 : vector<16x32xf32>
    %144 = vector.extract_strided_slice %104 {offsets = [0, 96], sizes = [16, 32], strides = [1, 1]} : vector<16x128xf32> to vector<16x32xf32>
    %145 = arith.negf %144 : vector<16x32xf32>
    %146 = math.exp %145 : vector<16x32xf32>
    %cst_61 = arith.constant 1.000000e+00 : f32
    %147 = vector.broadcast %cst_61 : f32 to vector<16x32xf32>
    %148 = arith.addf %147, %146 : vector<16x32xf32>
    %149 = arith.divf %147, %148 : vector<16x32xf32>
    %150 = arith.mulf %141, %87 : vector<16x32xf32>
    %151 = arith.mulf %135, %143 : vector<16x32xf32>
    %152 = arith.addf %150, %151 : vector<16x32xf32>
    %153 = math.tanh %152 : vector<16x32xf32>
    %154 = arith.mulf %149, %153 : vector<16x32xf32>
    %c1_i32 = arith.constant 1 : i32
    %155 = arith.addi %25, %c1_i32 : i32
    %156 = vector.broadcast %155 : i32 to vector<16x32xi32>
    %157 = arith.cmpi slt, %156, %23 : vector<16x32xi32>
    %158 = arith.select %157, %129, %24 : vector<16x32xi1>, vector<16x32xf32>
    %159 = arith.maximumf %94, %158 : vector<16x32xf32>
    %160 = arith.select %157, %154, %24 : vector<16x32xi1>, vector<16x32xf32>
    %161 = arith.maximumf %96, %160 : vector<16x32xf32>
    %c32 = arith.constant 32 : index
    %c0_62 = arith.constant 0 : index
    %162 = vector.load %arg15[%c32, %c0_62] : memref<256x128xf32, #tpu.memory_space<vmem>>, vector<16x128xf32>
    %163 = arith.truncf %129 : vector<16x32xf32> to vector<16x32xbf16>
    %cst_63 = arith.constant dense<0.000000e+00> : vector<16x128xf32>
    %164 = tpu.matmul %163, %19, %cst_63 {dimension_numbers = #tpu.dot_dimension_numbers<[1], [0], [0], [1], [0, 0, 1, 1], [], []>} : vector<16x32xbf16>, vector<32x128xbf16>, vector<16x128xf32> -> vector<16x128xf32>
    %165 = arith.addf %162, %164 : vector<16x128xf32>
    %c32_64 = arith.constant 32 : index
    %c0_65 = arith.constant 0 : index
    %166 = vector.load %arg16[%c32_64, %c0_65] : memref<256x128xf32, #tpu.memory_space<vmem>>, vector<16x128xf32>
    %167 = arith.truncf %154 : vector<16x32xf32> to vector<16x32xbf16>
    %cst_66 = arith.constant dense<0.000000e+00> : vector<16x128xf32>
    %168 = tpu.matmul %167, %20, %cst_66 {dimension_numbers = #tpu.dot_dimension_numbers<[1], [0], [0], [1], [0, 0, 1, 1], [], []>} : vector<16x32xbf16>, vector<32x128xbf16>, vector<16x128xf32> -> vector<16x128xf32>
    %169 = arith.addf %166, %168 : vector<16x128xf32>
    %170 = vector.extract_strided_slice %165 {offsets = [0, 0], sizes = [16, 32], strides = [1, 1]} : vector<16x128xf32> to vector<16x32xf32>
    %171 = arith.negf %170 : vector<16x32xf32>
    %172 = math.exp %171 : vector<16x32xf32>
    %cst_67 = arith.constant 1.000000e+00 : f32
    %173 = vector.broadcast %cst_67 : f32 to vector<16x32xf32>
    %174 = arith.addf %173, %172 : vector<16x32xf32>
    %175 = arith.divf %173, %174 : vector<16x32xf32>
    %176 = vector.extract_strided_slice %165 {offsets = [0, 32], sizes = [16, 32], strides = [1, 1]} : vector<16x128xf32> to vector<16x32xf32>
    %177 = arith.negf %176 : vector<16x32xf32>
    %178 = math.exp %177 : vector<16x32xf32>
    %cst_68 = arith.constant 1.000000e+00 : f32
    %179 = vector.broadcast %cst_68 : f32 to vector<16x32xf32>
    %180 = arith.addf %179, %178 : vector<16x32xf32>
    %181 = arith.divf %179, %180 : vector<16x32xf32>
    %182 = vector.extract_strided_slice %165 {offsets = [0, 64], sizes = [16, 32], strides = [1, 1]} : vector<16x128xf32> to vector<16x32xf32>
    %183 = math.tanh %182 : vector<16x32xf32>
    %184 = vector.extract_strided_slice %165 {offsets = [0, 96], sizes = [16, 32], strides = [1, 1]} : vector<16x128xf32> to vector<16x32xf32>
    %185 = arith.negf %184 : vector<16x32xf32>
    %186 = math.exp %185 : vector<16x32xf32>
    %cst_69 = arith.constant 1.000000e+00 : f32
    %187 = vector.broadcast %cst_69 : f32 to vector<16x32xf32>
    %188 = arith.addf %187, %186 : vector<16x32xf32>
    %189 = arith.divf %187, %188 : vector<16x32xf32>
    %190 = arith.mulf %181, %127 : vector<16x32xf32>
    %191 = arith.mulf %175, %183 : vector<16x32xf32>
    %192 = arith.addf %190, %191 : vector<16x32xf32>
    %193 = math.tanh %192 : vector<16x32xf32>
    %194 = arith.mulf %189, %193 : vector<16x32xf32>
    %195 = vector.extract_strided_slice %169 {offsets = [0, 0], sizes = [16, 32], strides = [1, 1]} : vector<16x128xf32> to vector<16x32xf32>
    %196 = arith.negf %195 : vector<16x32xf32>
    %197 = math.exp %196 : vector<16x32xf32>
    %cst_70 = arith.constant 1.000000e+00 : f32
    %198 = vector.broadcast %cst_70 : f32 to vector<16x32xf32>
    %199 = arith.addf %198, %197 : vector<16x32xf32>
    %200 = arith.divf %198, %199 : vector<16x32xf32>
    %201 = vector.extract_strided_slice %169 {offsets = [0, 32], sizes = [16, 32], strides = [1, 1]} : vector<16x128xf32> to vector<16x32xf32>
    %202 = arith.negf %201 : vector<16x32xf32>
    %203 = math.exp %202 : vector<16x32xf32>
    %cst_71 = arith.constant 1.000000e+00 : f32
    %204 = vector.broadcast %cst_71 : f32 to vector<16x32xf32>
    %205 = arith.addf %204, %203 : vector<16x32xf32>
    %206 = arith.divf %204, %205 : vector<16x32xf32>
    %207 = vector.extract_strided_slice %169 {offsets = [0, 64], sizes = [16, 32], strides = [1, 1]} : vector<16x128xf32> to vector<16x32xf32>
    %208 = math.tanh %207 : vector<16x32xf32>
    %209 = vector.extract_strided_slice %169 {offsets = [0, 96], sizes = [16, 32], strides = [1, 1]} : vector<16x128xf32> to vector<16x32xf32>
    %210 = arith.negf %209 : vector<16x32xf32>
    %211 = math.exp %210 : vector<16x32xf32>
    %cst_72 = arith.constant 1.000000e+00 : f32
    %212 = vector.broadcast %cst_72 : f32 to vector<16x32xf32>
    %213 = arith.addf %212, %211 : vector<16x32xf32>
    %214 = arith.divf %212, %213 : vector<16x32xf32>
    %215 = arith.mulf %206, %152 : vector<16x32xf32>
    %216 = arith.mulf %200, %208 : vector<16x32xf32>
    %217 = arith.addf %215, %216 : vector<16x32xf32>
    %218 = math.tanh %217 : vector<16x32xf32>
    %219 = arith.mulf %214, %218 : vector<16x32xf32>
    %c2_i32 = arith.constant 2 : i32
    %220 = arith.addi %25, %c2_i32 : i32
    %221 = vector.broadcast %220 : i32 to vector<16x32xi32>
    %222 = arith.cmpi slt, %221, %23 : vector<16x32xi32>
    %223 = arith.select %222, %194, %24 : vector<16x32xi1>, vector<16x32xf32>
    %224 = arith.maximumf %159, %223 : vector<16x32xf32>
    %225 = arith.select %222, %219, %24 : vector<16x32xi1>, vector<16x32xf32>
    %226 = arith.maximumf %161, %225 : vector<16x32xf32>
    %c48 = arith.constant 48 : index
    %c0_73 = arith.constant 0 : index
    %227 = vector.load %arg15[%c48, %c0_73] : memref<256x128xf32, #tpu.memory_space<vmem>>, vector<16x128xf32>
    %228 = arith.truncf %194 : vector<16x32xf32> to vector<16x32xbf16>
    %cst_74 = arith.constant dense<0.000000e+00> : vector<16x128xf32>
    %229 = tpu.matmul %228, %19, %cst_74 {dimension_numbers = #tpu.dot_dimension_numbers<[1], [0], [0], [1], [0, 0, 1, 1], [], []>} : vector<16x32xbf16>, vector<32x128xbf16>, vector<16x128xf32> -> vector<16x128xf32>
    %230 = arith.addf %227, %229 : vector<16x128xf32>
    %c48_75 = arith.constant 48 : index
    %c0_76 = arith.constant 0 : index
    %231 = vector.load %arg16[%c48_75, %c0_76] : memref<256x128xf32, #tpu.memory_space<vmem>>, vector<16x128xf32>
    %232 = arith.truncf %219 : vector<16x32xf32> to vector<16x32xbf16>
    %cst_77 = arith.constant dense<0.000000e+00> : vector<16x128xf32>
    %233 = tpu.matmul %232, %20, %cst_77 {dimension_numbers = #tpu.dot_dimension_numbers<[1], [0], [0], [1], [0, 0, 1, 1], [], []>} : vector<16x32xbf16>, vector<32x128xbf16>, vector<16x128xf32> -> vector<16x128xf32>
    %234 = arith.addf %231, %233 : vector<16x128xf32>
    %235 = vector.extract_strided_slice %230 {offsets = [0, 0], sizes = [16, 32], strides = [1, 1]} : vector<16x128xf32> to vector<16x32xf32>
    %236 = arith.negf %235 : vector<16x32xf32>
    %237 = math.exp %236 : vector<16x32xf32>
    %cst_78 = arith.constant 1.000000e+00 : f32
    %238 = vector.broadcast %cst_78 : f32 to vector<16x32xf32>
    %239 = arith.addf %238, %237 : vector<16x32xf32>
    %240 = arith.divf %238, %239 : vector<16x32xf32>
    %241 = vector.extract_strided_slice %230 {offsets = [0, 32], sizes = [16, 32], strides = [1, 1]} : vector<16x128xf32> to vector<16x32xf32>
    %242 = arith.negf %241 : vector<16x32xf32>
    %243 = math.exp %242 : vector<16x32xf32>
    %cst_79 = arith.constant 1.000000e+00 : f32
    %244 = vector.broadcast %cst_79 : f32 to vector<16x32xf32>
    %245 = arith.addf %244, %243 : vector<16x32xf32>
    %246 = arith.divf %244, %245 : vector<16x32xf32>
    %247 = vector.extract_strided_slice %230 {offsets = [0, 64], sizes = [16, 32], strides = [1, 1]} : vector<16x128xf32> to vector<16x32xf32>
    %248 = math.tanh %247 : vector<16x32xf32>
    %249 = vector.extract_strided_slice %230 {offsets = [0, 96], sizes = [16, 32], strides = [1, 1]} : vector<16x128xf32> to vector<16x32xf32>
    %250 = arith.negf %249 : vector<16x32xf32>
    %251 = math.exp %250 : vector<16x32xf32>
    %cst_80 = arith.constant 1.000000e+00 : f32
    %252 = vector.broadcast %cst_80 : f32 to vector<16x32xf32>
    %253 = arith.addf %252, %251 : vector<16x32xf32>
    %254 = arith.divf %252, %253 : vector<16x32xf32>
    %255 = arith.mulf %246, %192 : vector<16x32xf32>
    %256 = arith.mulf %240, %248 : vector<16x32xf32>
    %257 = arith.addf %255, %256 : vector<16x32xf32>
    %258 = math.tanh %257 : vector<16x32xf32>
    %259 = arith.mulf %254, %258 : vector<16x32xf32>
    %260 = vector.extract_strided_slice %234 {offsets = [0, 0], sizes = [16, 32], strides = [1, 1]} : vector<16x128xf32> to vector<16x32xf32>
    %261 = arith.negf %260 : vector<16x32xf32>
    %262 = math.exp %261 : vector<16x32xf32>
    %cst_81 = arith.constant 1.000000e+00 : f32
    %263 = vector.broadcast %cst_81 : f32 to vector<16x32xf32>
    %264 = arith.addf %263, %262 : vector<16x32xf32>
    %265 = arith.divf %263, %264 : vector<16x32xf32>
    %266 = vector.extract_strided_slice %234 {offsets = [0, 32], sizes = [16, 32], strides = [1, 1]} : vector<16x128xf32> to vector<16x32xf32>
    %267 = arith.negf %266 : vector<16x32xf32>
    %268 = math.exp %267 : vector<16x32xf32>
    %cst_82 = arith.constant 1.000000e+00 : f32
    %269 = vector.broadcast %cst_82 : f32 to vector<16x32xf32>
    %270 = arith.addf %269, %268 : vector<16x32xf32>
    %271 = arith.divf %269, %270 : vector<16x32xf32>
    %272 = vector.extract_strided_slice %234 {offsets = [0, 64], sizes = [16, 32], strides = [1, 1]} : vector<16x128xf32> to vector<16x32xf32>
    %273 = math.tanh %272 : vector<16x32xf32>
    %274 = vector.extract_strided_slice %234 {offsets = [0, 96], sizes = [16, 32], strides = [1, 1]} : vector<16x128xf32> to vector<16x32xf32>
    %275 = arith.negf %274 : vector<16x32xf32>
    %276 = math.exp %275 : vector<16x32xf32>
    %cst_83 = arith.constant 1.000000e+00 : f32
    %277 = vector.broadcast %cst_83 : f32 to vector<16x32xf32>
    %278 = arith.addf %277, %276 : vector<16x32xf32>
    %279 = arith.divf %277, %278 : vector<16x32xf32>
    %280 = arith.mulf %271, %217 : vector<16x32xf32>
    %281 = arith.mulf %265, %273 : vector<16x32xf32>
    %282 = arith.addf %280, %281 : vector<16x32xf32>
    %283 = math.tanh %282 : vector<16x32xf32>
    %284 = arith.mulf %279, %283 : vector<16x32xf32>
    %c3_i32 = arith.constant 3 : i32
    %285 = arith.addi %25, %c3_i32 : i32
    %286 = vector.broadcast %285 : i32 to vector<16x32xi32>
    %287 = arith.cmpi slt, %286, %23 : vector<16x32xi32>
    %288 = arith.select %287, %259, %24 : vector<16x32xi1>, vector<16x32xf32>
    %289 = arith.maximumf %224, %288 : vector<16x32xf32>
    %290 = arith.select %287, %284, %24 : vector<16x32xi1>, vector<16x32xf32>
    %291 = arith.maximumf %226, %290 : vector<16x32xf32>
    %c64 = arith.constant 64 : index
    %c0_84 = arith.constant 0 : index
    %292 = vector.load %arg15[%c64, %c0_84] : memref<256x128xf32, #tpu.memory_space<vmem>>, vector<16x128xf32>
    %293 = arith.truncf %259 : vector<16x32xf32> to vector<16x32xbf16>
    %cst_85 = arith.constant dense<0.000000e+00> : vector<16x128xf32>
    %294 = tpu.matmul %293, %19, %cst_85 {dimension_numbers = #tpu.dot_dimension_numbers<[1], [0], [0], [1], [0, 0, 1, 1], [], []>} : vector<16x32xbf16>, vector<32x128xbf16>, vector<16x128xf32> -> vector<16x128xf32>
    %295 = arith.addf %292, %294 : vector<16x128xf32>
    %c64_86 = arith.constant 64 : index
    %c0_87 = arith.constant 0 : index
    %296 = vector.load %arg16[%c64_86, %c0_87] : memref<256x128xf32, #tpu.memory_space<vmem>>, vector<16x128xf32>
    %297 = arith.truncf %284 : vector<16x32xf32> to vector<16x32xbf16>
    %cst_88 = arith.constant dense<0.000000e+00> : vector<16x128xf32>
    %298 = tpu.matmul %297, %20, %cst_88 {dimension_numbers = #tpu.dot_dimension_numbers<[1], [0], [0], [1], [0, 0, 1, 1], [], []>} : vector<16x32xbf16>, vector<32x128xbf16>, vector<16x128xf32> -> vector<16x128xf32>
    %299 = arith.addf %296, %298 : vector<16x128xf32>
    %300 = vector.extract_strided_slice %295 {offsets = [0, 0], sizes = [16, 32], strides = [1, 1]} : vector<16x128xf32> to vector<16x32xf32>
    %301 = arith.negf %300 : vector<16x32xf32>
    %302 = math.exp %301 : vector<16x32xf32>
    %cst_89 = arith.constant 1.000000e+00 : f32
    %303 = vector.broadcast %cst_89 : f32 to vector<16x32xf32>
    %304 = arith.addf %303, %302 : vector<16x32xf32>
    %305 = arith.divf %303, %304 : vector<16x32xf32>
    %306 = vector.extract_strided_slice %295 {offsets = [0, 32], sizes = [16, 32], strides = [1, 1]} : vector<16x128xf32> to vector<16x32xf32>
    %307 = arith.negf %306 : vector<16x32xf32>
    %308 = math.exp %307 : vector<16x32xf32>
    %cst_90 = arith.constant 1.000000e+00 : f32
    %309 = vector.broadcast %cst_90 : f32 to vector<16x32xf32>
    %310 = arith.addf %309, %308 : vector<16x32xf32>
    %311 = arith.divf %309, %310 : vector<16x32xf32>
    %312 = vector.extract_strided_slice %295 {offsets = [0, 64], sizes = [16, 32], strides = [1, 1]} : vector<16x128xf32> to vector<16x32xf32>
    %313 = math.tanh %312 : vector<16x32xf32>
    %314 = vector.extract_strided_slice %295 {offsets = [0, 96], sizes = [16, 32], strides = [1, 1]} : vector<16x128xf32> to vector<16x32xf32>
    %315 = arith.negf %314 : vector<16x32xf32>
    %316 = math.exp %315 : vector<16x32xf32>
    %cst_91 = arith.constant 1.000000e+00 : f32
    %317 = vector.broadcast %cst_91 : f32 to vector<16x32xf32>
    %318 = arith.addf %317, %316 : vector<16x32xf32>
    %319 = arith.divf %317, %318 : vector<16x32xf32>
    %320 = arith.mulf %311, %257 : vector<16x32xf32>
    %321 = arith.mulf %305, %313 : vector<16x32xf32>
    %322 = arith.addf %320, %321 : vector<16x32xf32>
    %323 = math.tanh %322 : vector<16x32xf32>
    %324 = arith.mulf %319, %323 : vector<16x32xf32>
    %325 = vector.extract_strided_slice %299 {offsets = [0, 0], sizes = [16, 32], strides = [1, 1]} : vector<16x128xf32> to vector<16x32xf32>
    %326 = arith.negf %325 : vector<16x32xf32>
    %327 = math.exp %326 : vector<16x32xf32>
    %cst_92 = arith.constant 1.000000e+00 : f32
    %328 = vector.broadcast %cst_92 : f32 to vector<16x32xf32>
    %329 = arith.addf %328, %327 : vector<16x32xf32>
    %330 = arith.divf %328, %329 : vector<16x32xf32>
    %331 = vector.extract_strided_slice %299 {offsets = [0, 32], sizes = [16, 32], strides = [1, 1]} : vector<16x128xf32> to vector<16x32xf32>
    %332 = arith.negf %331 : vector<16x32xf32>
    %333 = math.exp %332 : vector<16x32xf32>
    %cst_93 = arith.constant 1.000000e+00 : f32
    %334 = vector.broadcast %cst_93 : f32 to vector<16x32xf32>
    %335 = arith.addf %334, %333 : vector<16x32xf32>
    %336 = arith.divf %334, %335 : vector<16x32xf32>
    %337 = vector.extract_strided_slice %299 {offsets = [0, 64], sizes = [16, 32], strides = [1, 1]} : vector<16x128xf32> to vector<16x32xf32>
    %338 = math.tanh %337 : vector<16x32xf32>
    %339 = vector.extract_strided_slice %299 {offsets = [0, 96], sizes = [16, 32], strides = [1, 1]} : vector<16x128xf32> to vector<16x32xf32>
    %340 = arith.negf %339 : vector<16x32xf32>
    %341 = math.exp %340 : vector<16x32xf32>
    %cst_94 = arith.constant 1.000000e+00 : f32
    %342 = vector.broadcast %cst_94 : f32 to vector<16x32xf32>
    %343 = arith.addf %342, %341 : vector<16x32xf32>
    %344 = arith.divf %342, %343 : vector<16x32xf32>
    %345 = arith.mulf %336, %282 : vector<16x32xf32>
    %346 = arith.mulf %330, %338 : vector<16x32xf32>
    %347 = arith.addf %345, %346 : vector<16x32xf32>
    %348 = math.tanh %347 : vector<16x32xf32>
    %349 = arith.mulf %344, %348 : vector<16x32xf32>
    %c4_i32 = arith.constant 4 : i32
    %350 = arith.addi %25, %c4_i32 : i32
    %351 = vector.broadcast %350 : i32 to vector<16x32xi32>
    %352 = arith.cmpi slt, %351, %23 : vector<16x32xi32>
    %353 = arith.select %352, %324, %24 : vector<16x32xi1>, vector<16x32xf32>
    %354 = arith.maximumf %289, %353 : vector<16x32xf32>
    %355 = arith.select %352, %349, %24 : vector<16x32xi1>, vector<16x32xf32>
    %356 = arith.maximumf %291, %355 : vector<16x32xf32>
    %c80 = arith.constant 80 : index
    %c0_95 = arith.constant 0 : index
    %357 = vector.load %arg15[%c80, %c0_95] : memref<256x128xf32, #tpu.memory_space<vmem>>, vector<16x128xf32>
    %358 = arith.truncf %324 : vector<16x32xf32> to vector<16x32xbf16>
    %cst_96 = arith.constant dense<0.000000e+00> : vector<16x128xf32>
    %359 = tpu.matmul %358, %19, %cst_96 {dimension_numbers = #tpu.dot_dimension_numbers<[1], [0], [0], [1], [0, 0, 1, 1], [], []>} : vector<16x32xbf16>, vector<32x128xbf16>, vector<16x128xf32> -> vector<16x128xf32>
    %360 = arith.addf %357, %359 : vector<16x128xf32>
    %c80_97 = arith.constant 80 : index
    %c0_98 = arith.constant 0 : index
    %361 = vector.load %arg16[%c80_97, %c0_98] : memref<256x128xf32, #tpu.memory_space<vmem>>, vector<16x128xf32>
    %362 = arith.truncf %349 : vector<16x32xf32> to vector<16x32xbf16>
    %cst_99 = arith.constant dense<0.000000e+00> : vector<16x128xf32>
    %363 = tpu.matmul %362, %20, %cst_99 {dimension_numbers = #tpu.dot_dimension_numbers<[1], [0], [0], [1], [0, 0, 1, 1], [], []>} : vector<16x32xbf16>, vector<32x128xbf16>, vector<16x128xf32> -> vector<16x128xf32>
    %364 = arith.addf %361, %363 : vector<16x128xf32>
    %365 = vector.extract_strided_slice %360 {offsets = [0, 0], sizes = [16, 32], strides = [1, 1]} : vector<16x128xf32> to vector<16x32xf32>
    %366 = arith.negf %365 : vector<16x32xf32>
    %367 = math.exp %366 : vector<16x32xf32>
    %cst_100 = arith.constant 1.000000e+00 : f32
    %368 = vector.broadcast %cst_100 : f32 to vector<16x32xf32>
    %369 = arith.addf %368, %367 : vector<16x32xf32>
    %370 = arith.divf %368, %369 : vector<16x32xf32>
    %371 = vector.extract_strided_slice %360 {offsets = [0, 32], sizes = [16, 32], strides = [1, 1]} : vector<16x128xf32> to vector<16x32xf32>
    %372 = arith.negf %371 : vector<16x32xf32>
    %373 = math.exp %372 : vector<16x32xf32>
    %cst_101 = arith.constant 1.000000e+00 : f32
    %374 = vector.broadcast %cst_101 : f32 to vector<16x32xf32>
    %375 = arith.addf %374, %373 : vector<16x32xf32>
    %376 = arith.divf %374, %375 : vector<16x32xf32>
    %377 = vector.extract_strided_slice %360 {offsets = [0, 64], sizes = [16, 32], strides = [1, 1]} : vector<16x128xf32> to vector<16x32xf32>
    %378 = math.tanh %377 : vector<16x32xf32>
    %379 = vector.extract_strided_slice %360 {offsets = [0, 96], sizes = [16, 32], strides = [1, 1]} : vector<16x128xf32> to vector<16x32xf32>
    %380 = arith.negf %379 : vector<16x32xf32>
    %381 = math.exp %380 : vector<16x32xf32>
    %cst_102 = arith.constant 1.000000e+00 : f32
    %382 = vector.broadcast %cst_102 : f32 to vector<16x32xf32>
    %383 = arith.addf %382, %381 : vector<16x32xf32>
    %384 = arith.divf %382, %383 : vector<16x32xf32>
    %385 = arith.mulf %376, %322 : vector<16x32xf32>
    %386 = arith.mulf %370, %378 : vector<16x32xf32>
    %387 = arith.addf %385, %386 : vector<16x32xf32>
    %388 = math.tanh %387 : vector<16x32xf32>
    %389 = arith.mulf %384, %388 : vector<16x32xf32>
    %390 = vector.extract_strided_slice %364 {offsets = [0, 0], sizes = [16, 32], strides = [1, 1]} : vector<16x128xf32> to vector<16x32xf32>
    %391 = arith.negf %390 : vector<16x32xf32>
    %392 = math.exp %391 : vector<16x32xf32>
    %cst_103 = arith.constant 1.000000e+00 : f32
    %393 = vector.broadcast %cst_103 : f32 to vector<16x32xf32>
    %394 = arith.addf %393, %392 : vector<16x32xf32>
    %395 = arith.divf %393, %394 : vector<16x32xf32>
    %396 = vector.extract_strided_slice %364 {offsets = [0, 32], sizes = [16, 32], strides = [1, 1]} : vector<16x128xf32> to vector<16x32xf32>
    %397 = arith.negf %396 : vector<16x32xf32>
    %398 = math.exp %397 : vector<16x32xf32>
    %cst_104 = arith.constant 1.000000e+00 : f32
    %399 = vector.broadcast %cst_104 : f32 to vector<16x32xf32>
    %400 = arith.addf %399, %398 : vector<16x32xf32>
    %401 = arith.divf %399, %400 : vector<16x32xf32>
    %402 = vector.extract_strided_slice %364 {offsets = [0, 64], sizes = [16, 32], strides = [1, 1]} : vector<16x128xf32> to vector<16x32xf32>
    %403 = math.tanh %402 : vector<16x32xf32>
    %404 = vector.extract_strided_slice %364 {offsets = [0, 96], sizes = [16, 32], strides = [1, 1]} : vector<16x128xf32> to vector<16x32xf32>
    %405 = arith.negf %404 : vector<16x32xf32>
    %406 = math.exp %405 : vector<16x32xf32>
    %cst_105 = arith.constant 1.000000e+00 : f32
    %407 = vector.broadcast %cst_105 : f32 to vector<16x32xf32>
    %408 = arith.addf %407, %406 : vector<16x32xf32>
    %409 = arith.divf %407, %408 : vector<16x32xf32>
    %410 = arith.mulf %401, %347 : vector<16x32xf32>
    %411 = arith.mulf %395, %403 : vector<16x32xf32>
    %412 = arith.addf %410, %411 : vector<16x32xf32>
    %413 = math.tanh %412 : vector<16x32xf32>
    %414 = arith.mulf %409, %413 : vector<16x32xf32>
    %c5_i32 = arith.constant 5 : i32
    %415 = arith.addi %25, %c5_i32 : i32
    %416 = vector.broadcast %415 : i32 to vector<16x32xi32>
    %417 = arith.cmpi slt, %416, %23 : vector<16x32xi32>
    %418 = arith.select %417, %389, %24 : vector<16x32xi1>, vector<16x32xf32>
    %419 = arith.maximumf %354, %418 : vector<16x32xf32>
    %420 = arith.select %417, %414, %24 : vector<16x32xi1>, vector<16x32xf32>
    %421 = arith.maximumf %356, %420 : vector<16x32xf32>
    %c96 = arith.constant 96 : index
    %c0_106 = arith.constant 0 : index
    %422 = vector.load %arg15[%c96, %c0_106] : memref<256x128xf32, #tpu.memory_space<vmem>>, vector<16x128xf32>
    %423 = arith.truncf %389 : vector<16x32xf32> to vector<16x32xbf16>
    %cst_107 = arith.constant dense<0.000000e+00> : vector<16x128xf32>
    %424 = tpu.matmul %423, %19, %cst_107 {dimension_numbers = #tpu.dot_dimension_numbers<[1], [0], [0], [1], [0, 0, 1, 1], [], []>} : vector<16x32xbf16>, vector<32x128xbf16>, vector<16x128xf32> -> vector<16x128xf32>
    %425 = arith.addf %422, %424 : vector<16x128xf32>
    %c96_108 = arith.constant 96 : index
    %c0_109 = arith.constant 0 : index
    %426 = vector.load %arg16[%c96_108, %c0_109] : memref<256x128xf32, #tpu.memory_space<vmem>>, vector<16x128xf32>
    %427 = arith.truncf %414 : vector<16x32xf32> to vector<16x32xbf16>
    %cst_110 = arith.constant dense<0.000000e+00> : vector<16x128xf32>
    %428 = tpu.matmul %427, %20, %cst_110 {dimension_numbers = #tpu.dot_dimension_numbers<[1], [0], [0], [1], [0, 0, 1, 1], [], []>} : vector<16x32xbf16>, vector<32x128xbf16>, vector<16x128xf32> -> vector<16x128xf32>
    %429 = arith.addf %426, %428 : vector<16x128xf32>
    %430 = vector.extract_strided_slice %425 {offsets = [0, 0], sizes = [16, 32], strides = [1, 1]} : vector<16x128xf32> to vector<16x32xf32>
    %431 = arith.negf %430 : vector<16x32xf32>
    %432 = math.exp %431 : vector<16x32xf32>
    %cst_111 = arith.constant 1.000000e+00 : f32
    %433 = vector.broadcast %cst_111 : f32 to vector<16x32xf32>
    %434 = arith.addf %433, %432 : vector<16x32xf32>
    %435 = arith.divf %433, %434 : vector<16x32xf32>
    %436 = vector.extract_strided_slice %425 {offsets = [0, 32], sizes = [16, 32], strides = [1, 1]} : vector<16x128xf32> to vector<16x32xf32>
    %437 = arith.negf %436 : vector<16x32xf32>
    %438 = math.exp %437 : vector<16x32xf32>
    %cst_112 = arith.constant 1.000000e+00 : f32
    %439 = vector.broadcast %cst_112 : f32 to vector<16x32xf32>
    %440 = arith.addf %439, %438 : vector<16x32xf32>
    %441 = arith.divf %439, %440 : vector<16x32xf32>
    %442 = vector.extract_strided_slice %425 {offsets = [0, 64], sizes = [16, 32], strides = [1, 1]} : vector<16x128xf32> to vector<16x32xf32>
    %443 = math.tanh %442 : vector<16x32xf32>
    %444 = vector.extract_strided_slice %425 {offsets = [0, 96], sizes = [16, 32], strides = [1, 1]} : vector<16x128xf32> to vector<16x32xf32>
    %445 = arith.negf %444 : vector<16x32xf32>
    %446 = math.exp %445 : vector<16x32xf32>
    %cst_113 = arith.constant 1.000000e+00 : f32
    %447 = vector.broadcast %cst_113 : f32 to vector<16x32xf32>
    %448 = arith.addf %447, %446 : vector<16x32xf32>
    %449 = arith.divf %447, %448 : vector<16x32xf32>
    %450 = arith.mulf %441, %387 : vector<16x32xf32>
    %451 = arith.mulf %435, %443 : vector<16x32xf32>
    %452 = arith.addf %450, %451 : vector<16x32xf32>
    %453 = math.tanh %452 : vector<16x32xf32>
    %454 = arith.mulf %449, %453 : vector<16x32xf32>
    %455 = vector.extract_strided_slice %429 {offsets = [0, 0], sizes = [16, 32], strides = [1, 1]} : vector<16x128xf32> to vector<16x32xf32>
    %456 = arith.negf %455 : vector<16x32xf32>
    %457 = math.exp %456 : vector<16x32xf32>
    %cst_114 = arith.constant 1.000000e+00 : f32
    %458 = vector.broadcast %cst_114 : f32 to vector<16x32xf32>
    %459 = arith.addf %458, %457 : vector<16x32xf32>
    %460 = arith.divf %458, %459 : vector<16x32xf32>
    %461 = vector.extract_strided_slice %429 {offsets = [0, 32], sizes = [16, 32], strides = [1, 1]} : vector<16x128xf32> to vector<16x32xf32>
    %462 = arith.negf %461 : vector<16x32xf32>
    %463 = math.exp %462 : vector<16x32xf32>
    %cst_115 = arith.constant 1.000000e+00 : f32
    %464 = vector.broadcast %cst_115 : f32 to vector<16x32xf32>
    %465 = arith.addf %464, %463 : vector<16x32xf32>
    %466 = arith.divf %464, %465 : vector<16x32xf32>
    %467 = vector.extract_strided_slice %429 {offsets = [0, 64], sizes = [16, 32], strides = [1, 1]} : vector<16x128xf32> to vector<16x32xf32>
    %468 = math.tanh %467 : vector<16x32xf32>
    %469 = vector.extract_strided_slice %429 {offsets = [0, 96], sizes = [16, 32], strides = [1, 1]} : vector<16x128xf32> to vector<16x32xf32>
    %470 = arith.negf %469 : vector<16x32xf32>
    %471 = math.exp %470 : vector<16x32xf32>
    %cst_116 = arith.constant 1.000000e+00 : f32
    %472 = vector.broadcast %cst_116 : f32 to vector<16x32xf32>
    %473 = arith.addf %472, %471 : vector<16x32xf32>
    %474 = arith.divf %472, %473 : vector<16x32xf32>
    %475 = arith.mulf %466, %412 : vector<16x32xf32>
    %476 = arith.mulf %460, %468 : vector<16x32xf32>
    %477 = arith.addf %475, %476 : vector<16x32xf32>
    %478 = math.tanh %477 : vector<16x32xf32>
    %479 = arith.mulf %474, %478 : vector<16x32xf32>
    %c6_i32 = arith.constant 6 : i32
    %480 = arith.addi %25, %c6_i32 : i32
    %481 = vector.broadcast %480 : i32 to vector<16x32xi32>
    %482 = arith.cmpi slt, %481, %23 : vector<16x32xi32>
    %483 = arith.select %482, %454, %24 : vector<16x32xi1>, vector<16x32xf32>
    %484 = arith.maximumf %419, %483 : vector<16x32xf32>
    %485 = arith.select %482, %479, %24 : vector<16x32xi1>, vector<16x32xf32>
    %486 = arith.maximumf %421, %485 : vector<16x32xf32>
    %c112 = arith.constant 112 : index
    %c0_117 = arith.constant 0 : index
    %487 = vector.load %arg15[%c112, %c0_117] : memref<256x128xf32, #tpu.memory_space<vmem>>, vector<16x128xf32>
    %488 = arith.truncf %454 : vector<16x32xf32> to vector<16x32xbf16>
    %cst_118 = arith.constant dense<0.000000e+00> : vector<16x128xf32>
    %489 = tpu.matmul %488, %19, %cst_118 {dimension_numbers = #tpu.dot_dimension_numbers<[1], [0], [0], [1], [0, 0, 1, 1], [], []>} : vector<16x32xbf16>, vector<32x128xbf16>, vector<16x128xf32> -> vector<16x128xf32>
    %490 = arith.addf %487, %489 : vector<16x128xf32>
    %c112_119 = arith.constant 112 : index
    %c0_120 = arith.constant 0 : index
    %491 = vector.load %arg16[%c112_119, %c0_120] : memref<256x128xf32, #tpu.memory_space<vmem>>, vector<16x128xf32>
    %492 = arith.truncf %479 : vector<16x32xf32> to vector<16x32xbf16>
    %cst_121 = arith.constant dense<0.000000e+00> : vector<16x128xf32>
    %493 = tpu.matmul %492, %20, %cst_121 {dimension_numbers = #tpu.dot_dimension_numbers<[1], [0], [0], [1], [0, 0, 1, 1], [], []>} : vector<16x32xbf16>, vector<32x128xbf16>, vector<16x128xf32> -> vector<16x128xf32>
    %494 = arith.addf %491, %493 : vector<16x128xf32>
    %495 = vector.extract_strided_slice %490 {offsets = [0, 0], sizes = [16, 32], strides = [1, 1]} : vector<16x128xf32> to vector<16x32xf32>
    %496 = arith.negf %495 : vector<16x32xf32>
    %497 = math.exp %496 : vector<16x32xf32>
    %cst_122 = arith.constant 1.000000e+00 : f32
    %498 = vector.broadcast %cst_122 : f32 to vector<16x32xf32>
    %499 = arith.addf %498, %497 : vector<16x32xf32>
    %500 = arith.divf %498, %499 : vector<16x32xf32>
    %501 = vector.extract_strided_slice %490 {offsets = [0, 32], sizes = [16, 32], strides = [1, 1]} : vector<16x128xf32> to vector<16x32xf32>
    %502 = arith.negf %501 : vector<16x32xf32>
    %503 = math.exp %502 : vector<16x32xf32>
    %cst_123 = arith.constant 1.000000e+00 : f32
    %504 = vector.broadcast %cst_123 : f32 to vector<16x32xf32>
    %505 = arith.addf %504, %503 : vector<16x32xf32>
    %506 = arith.divf %504, %505 : vector<16x32xf32>
    %507 = vector.extract_strided_slice %490 {offsets = [0, 64], sizes = [16, 32], strides = [1, 1]} : vector<16x128xf32> to vector<16x32xf32>
    %508 = math.tanh %507 : vector<16x32xf32>
    %509 = vector.extract_strided_slice %490 {offsets = [0, 96], sizes = [16, 32], strides = [1, 1]} : vector<16x128xf32> to vector<16x32xf32>
    %510 = arith.negf %509 : vector<16x32xf32>
    %511 = math.exp %510 : vector<16x32xf32>
    %cst_124 = arith.constant 1.000000e+00 : f32
    %512 = vector.broadcast %cst_124 : f32 to vector<16x32xf32>
    %513 = arith.addf %512, %511 : vector<16x32xf32>
    %514 = arith.divf %512, %513 : vector<16x32xf32>
    %515 = arith.mulf %506, %452 : vector<16x32xf32>
    %516 = arith.mulf %500, %508 : vector<16x32xf32>
    %517 = arith.addf %515, %516 : vector<16x32xf32>
    %518 = math.tanh %517 : vector<16x32xf32>
    %519 = arith.mulf %514, %518 : vector<16x32xf32>
    %520 = vector.extract_strided_slice %494 {offsets = [0, 0], sizes = [16, 32], strides = [1, 1]} : vector<16x128xf32> to vector<16x32xf32>
    %521 = arith.negf %520 : vector<16x32xf32>
    %522 = math.exp %521 : vector<16x32xf32>
    %cst_125 = arith.constant 1.000000e+00 : f32
    %523 = vector.broadcast %cst_125 : f32 to vector<16x32xf32>
    %524 = arith.addf %523, %522 : vector<16x32xf32>
    %525 = arith.divf %523, %524 : vector<16x32xf32>
    %526 = vector.extract_strided_slice %494 {offsets = [0, 32], sizes = [16, 32], strides = [1, 1]} : vector<16x128xf32> to vector<16x32xf32>
    %527 = arith.negf %526 : vector<16x32xf32>
    %528 = math.exp %527 : vector<16x32xf32>
    %cst_126 = arith.constant 1.000000e+00 : f32
    %529 = vector.broadcast %cst_126 : f32 to vector<16x32xf32>
    %530 = arith.addf %529, %528 : vector<16x32xf32>
    %531 = arith.divf %529, %530 : vector<16x32xf32>
    %532 = vector.extract_strided_slice %494 {offsets = [0, 64], sizes = [16, 32], strides = [1, 1]} : vector<16x128xf32> to vector<16x32xf32>
    %533 = math.tanh %532 : vector<16x32xf32>
    %534 = vector.extract_strided_slice %494 {offsets = [0, 96], sizes = [16, 32], strides = [1, 1]} : vector<16x128xf32> to vector<16x32xf32>
    %535 = arith.negf %534 : vector<16x32xf32>
    %536 = math.exp %535 : vector<16x32xf32>
    %cst_127 = arith.constant 1.000000e+00 : f32
    %537 = vector.broadcast %cst_127 : f32 to vector<16x32xf32>
    %538 = arith.addf %537, %536 : vector<16x32xf32>
    %539 = arith.divf %537, %538 : vector<16x32xf32>
    %540 = arith.mulf %531, %477 : vector<16x32xf32>
    %541 = arith.mulf %525, %533 : vector<16x32xf32>
    %542 = arith.addf %540, %541 : vector<16x32xf32>
    %543 = math.tanh %542 : vector<16x32xf32>
    %544 = arith.mulf %539, %543 : vector<16x32xf32>
    %c7_i32 = arith.constant 7 : i32
    %545 = arith.addi %25, %c7_i32 : i32
    %546 = vector.broadcast %545 : i32 to vector<16x32xi32>
    %547 = arith.cmpi slt, %546, %23 : vector<16x32xi32>
    %548 = arith.select %547, %519, %24 : vector<16x32xi1>, vector<16x32xf32>
    %549 = arith.maximumf %484, %548 : vector<16x32xf32>
    %550 = arith.select %547, %544, %24 : vector<16x32xi1>, vector<16x32xf32>
    %551 = arith.maximumf %486, %550 : vector<16x32xf32>
    %c128 = arith.constant 128 : index
    %c0_128 = arith.constant 0 : index
    %552 = vector.load %arg15[%c128, %c0_128] : memref<256x128xf32, #tpu.memory_space<vmem>>, vector<16x128xf32>
    %553 = arith.truncf %519 : vector<16x32xf32> to vector<16x32xbf16>
    %cst_129 = arith.constant dense<0.000000e+00> : vector<16x128xf32>
    %554 = tpu.matmul %553, %19, %cst_129 {dimension_numbers = #tpu.dot_dimension_numbers<[1], [0], [0], [1], [0, 0, 1, 1], [], []>} : vector<16x32xbf16>, vector<32x128xbf16>, vector<16x128xf32> -> vector<16x128xf32>
    %555 = arith.addf %552, %554 : vector<16x128xf32>
    %c128_130 = arith.constant 128 : index
    %c0_131 = arith.constant 0 : index
    %556 = vector.load %arg16[%c128_130, %c0_131] : memref<256x128xf32, #tpu.memory_space<vmem>>, vector<16x128xf32>
    %557 = arith.truncf %544 : vector<16x32xf32> to vector<16x32xbf16>
    %cst_132 = arith.constant dense<0.000000e+00> : vector<16x128xf32>
    %558 = tpu.matmul %557, %20, %cst_132 {dimension_numbers = #tpu.dot_dimension_numbers<[1], [0], [0], [1], [0, 0, 1, 1], [], []>} : vector<16x32xbf16>, vector<32x128xbf16>, vector<16x128xf32> -> vector<16x128xf32>
    %559 = arith.addf %556, %558 : vector<16x128xf32>
    %560 = vector.extract_strided_slice %555 {offsets = [0, 0], sizes = [16, 32], strides = [1, 1]} : vector<16x128xf32> to vector<16x32xf32>
    %561 = arith.negf %560 : vector<16x32xf32>
    %562 = math.exp %561 : vector<16x32xf32>
    %cst_133 = arith.constant 1.000000e+00 : f32
    %563 = vector.broadcast %cst_133 : f32 to vector<16x32xf32>
    %564 = arith.addf %563, %562 : vector<16x32xf32>
    %565 = arith.divf %563, %564 : vector<16x32xf32>
    %566 = vector.extract_strided_slice %555 {offsets = [0, 32], sizes = [16, 32], strides = [1, 1]} : vector<16x128xf32> to vector<16x32xf32>
    %567 = arith.negf %566 : vector<16x32xf32>
    %568 = math.exp %567 : vector<16x32xf32>
    %cst_134 = arith.constant 1.000000e+00 : f32
    %569 = vector.broadcast %cst_134 : f32 to vector<16x32xf32>
    %570 = arith.addf %569, %568 : vector<16x32xf32>
    %571 = arith.divf %569, %570 : vector<16x32xf32>
    %572 = vector.extract_strided_slice %555 {offsets = [0, 64], sizes = [16, 32], strides = [1, 1]} : vector<16x128xf32> to vector<16x32xf32>
    %573 = math.tanh %572 : vector<16x32xf32>
    %574 = vector.extract_strided_slice %555 {offsets = [0, 96], sizes = [16, 32], strides = [1, 1]} : vector<16x128xf32> to vector<16x32xf32>
    %575 = arith.negf %574 : vector<16x32xf32>
    %576 = math.exp %575 : vector<16x32xf32>
    %cst_135 = arith.constant 1.000000e+00 : f32
    %577 = vector.broadcast %cst_135 : f32 to vector<16x32xf32>
    %578 = arith.addf %577, %576 : vector<16x32xf32>
    %579 = arith.divf %577, %578 : vector<16x32xf32>
    %580 = arith.mulf %571, %517 : vector<16x32xf32>
    %581 = arith.mulf %565, %573 : vector<16x32xf32>
    %582 = arith.addf %580, %581 : vector<16x32xf32>
    %583 = math.tanh %582 : vector<16x32xf32>
    %584 = arith.mulf %579, %583 : vector<16x32xf32>
    %585 = vector.extract_strided_slice %559 {offsets = [0, 0], sizes = [16, 32], strides = [1, 1]} : vector<16x128xf32> to vector<16x32xf32>
    %586 = arith.negf %585 : vector<16x32xf32>
    %587 = math.exp %586 : vector<16x32xf32>
    %cst_136 = arith.constant 1.000000e+00 : f32
    %588 = vector.broadcast %cst_136 : f32 to vector<16x32xf32>
    %589 = arith.addf %588, %587 : vector<16x32xf32>
    %590 = arith.divf %588, %589 : vector<16x32xf32>
    %591 = vector.extract_strided_slice %559 {offsets = [0, 32], sizes = [16, 32], strides = [1, 1]} : vector<16x128xf32> to vector<16x32xf32>
    %592 = arith.negf %591 : vector<16x32xf32>
    %593 = math.exp %592 : vector<16x32xf32>
    %cst_137 = arith.constant 1.000000e+00 : f32
    %594 = vector.broadcast %cst_137 : f32 to vector<16x32xf32>
    %595 = arith.addf %594, %593 : vector<16x32xf32>
    %596 = arith.divf %594, %595 : vector<16x32xf32>
    %597 = vector.extract_strided_slice %559 {offsets = [0, 64], sizes = [16, 32], strides = [1, 1]} : vector<16x128xf32> to vector<16x32xf32>
    %598 = math.tanh %597 : vector<16x32xf32>
    %599 = vector.extract_strided_slice %559 {offsets = [0, 96], sizes = [16, 32], strides = [1, 1]} : vector<16x128xf32> to vector<16x32xf32>
    %600 = arith.negf %599 : vector<16x32xf32>
    %601 = math.exp %600 : vector<16x32xf32>
    %cst_138 = arith.constant 1.000000e+00 : f32
    %602 = vector.broadcast %cst_138 : f32 to vector<16x32xf32>
    %603 = arith.addf %602, %601 : vector<16x32xf32>
    %604 = arith.divf %602, %603 : vector<16x32xf32>
    %605 = arith.mulf %596, %542 : vector<16x32xf32>
    %606 = arith.mulf %590, %598 : vector<16x32xf32>
    %607 = arith.addf %605, %606 : vector<16x32xf32>
    %608 = math.tanh %607 : vector<16x32xf32>
    %609 = arith.mulf %604, %608 : vector<16x32xf32>
    %c8_i32 = arith.constant 8 : i32
    %610 = arith.addi %25, %c8_i32 : i32
    %611 = vector.broadcast %610 : i32 to vector<16x32xi32>
    %612 = arith.cmpi slt, %611, %23 : vector<16x32xi32>
    %613 = arith.select %612, %584, %24 : vector<16x32xi1>, vector<16x32xf32>
    %614 = arith.maximumf %549, %613 : vector<16x32xf32>
    %615 = arith.select %612, %609, %24 : vector<16x32xi1>, vector<16x32xf32>
    %616 = arith.maximumf %551, %615 : vector<16x32xf32>
    %c144 = arith.constant 144 : index
    %c0_139 = arith.constant 0 : index
    %617 = vector.load %arg15[%c144, %c0_139] : memref<256x128xf32, #tpu.memory_space<vmem>>, vector<16x128xf32>
    %618 = arith.truncf %584 : vector<16x32xf32> to vector<16x32xbf16>
    %cst_140 = arith.constant dense<0.000000e+00> : vector<16x128xf32>
    %619 = tpu.matmul %618, %19, %cst_140 {dimension_numbers = #tpu.dot_dimension_numbers<[1], [0], [0], [1], [0, 0, 1, 1], [], []>} : vector<16x32xbf16>, vector<32x128xbf16>, vector<16x128xf32> -> vector<16x128xf32>
    %620 = arith.addf %617, %619 : vector<16x128xf32>
    %c144_141 = arith.constant 144 : index
    %c0_142 = arith.constant 0 : index
    %621 = vector.load %arg16[%c144_141, %c0_142] : memref<256x128xf32, #tpu.memory_space<vmem>>, vector<16x128xf32>
    %622 = arith.truncf %609 : vector<16x32xf32> to vector<16x32xbf16>
    %cst_143 = arith.constant dense<0.000000e+00> : vector<16x128xf32>
    %623 = tpu.matmul %622, %20, %cst_143 {dimension_numbers = #tpu.dot_dimension_numbers<[1], [0], [0], [1], [0, 0, 1, 1], [], []>} : vector<16x32xbf16>, vector<32x128xbf16>, vector<16x128xf32> -> vector<16x128xf32>
    %624 = arith.addf %621, %623 : vector<16x128xf32>
    %625 = vector.extract_strided_slice %620 {offsets = [0, 0], sizes = [16, 32], strides = [1, 1]} : vector<16x128xf32> to vector<16x32xf32>
    %626 = arith.negf %625 : vector<16x32xf32>
    %627 = math.exp %626 : vector<16x32xf32>
    %cst_144 = arith.constant 1.000000e+00 : f32
    %628 = vector.broadcast %cst_144 : f32 to vector<16x32xf32>
    %629 = arith.addf %628, %627 : vector<16x32xf32>
    %630 = arith.divf %628, %629 : vector<16x32xf32>
    %631 = vector.extract_strided_slice %620 {offsets = [0, 32], sizes = [16, 32], strides = [1, 1]} : vector<16x128xf32> to vector<16x32xf32>
    %632 = arith.negf %631 : vector<16x32xf32>
    %633 = math.exp %632 : vector<16x32xf32>
    %cst_145 = arith.constant 1.000000e+00 : f32
    %634 = vector.broadcast %cst_145 : f32 to vector<16x32xf32>
    %635 = arith.addf %634, %633 : vector<16x32xf32>
    %636 = arith.divf %634, %635 : vector<16x32xf32>
    %637 = vector.extract_strided_slice %620 {offsets = [0, 64], sizes = [16, 32], strides = [1, 1]} : vector<16x128xf32> to vector<16x32xf32>
    %638 = math.tanh %637 : vector<16x32xf32>
    %639 = vector.extract_strided_slice %620 {offsets = [0, 96], sizes = [16, 32], strides = [1, 1]} : vector<16x128xf32> to vector<16x32xf32>
    %640 = arith.negf %639 : vector<16x32xf32>
    %641 = math.exp %640 : vector<16x32xf32>
    %cst_146 = arith.constant 1.000000e+00 : f32
    %642 = vector.broadcast %cst_146 : f32 to vector<16x32xf32>
    %643 = arith.addf %642, %641 : vector<16x32xf32>
    %644 = arith.divf %642, %643 : vector<16x32xf32>
    %645 = arith.mulf %636, %582 : vector<16x32xf32>
    %646 = arith.mulf %630, %638 : vector<16x32xf32>
    %647 = arith.addf %645, %646 : vector<16x32xf32>
    %648 = math.tanh %647 : vector<16x32xf32>
    %649 = arith.mulf %644, %648 : vector<16x32xf32>
    %650 = vector.extract_strided_slice %624 {offsets = [0, 0], sizes = [16, 32], strides = [1, 1]} : vector<16x128xf32> to vector<16x32xf32>
    %651 = arith.negf %650 : vector<16x32xf32>
    %652 = math.exp %651 : vector<16x32xf32>
    %cst_147 = arith.constant 1.000000e+00 : f32
    %653 = vector.broadcast %cst_147 : f32 to vector<16x32xf32>
    %654 = arith.addf %653, %652 : vector<16x32xf32>
    %655 = arith.divf %653, %654 : vector<16x32xf32>
    %656 = vector.extract_strided_slice %624 {offsets = [0, 32], sizes = [16, 32], strides = [1, 1]} : vector<16x128xf32> to vector<16x32xf32>
    %657 = arith.negf %656 : vector<16x32xf32>
    %658 = math.exp %657 : vector<16x32xf32>
    %cst_148 = arith.constant 1.000000e+00 : f32
    %659 = vector.broadcast %cst_148 : f32 to vector<16x32xf32>
    %660 = arith.addf %659, %658 : vector<16x32xf32>
    %661 = arith.divf %659, %660 : vector<16x32xf32>
    %662 = vector.extract_strided_slice %624 {offsets = [0, 64], sizes = [16, 32], strides = [1, 1]} : vector<16x128xf32> to vector<16x32xf32>
    %663 = math.tanh %662 : vector<16x32xf32>
    %664 = vector.extract_strided_slice %624 {offsets = [0, 96], sizes = [16, 32], strides = [1, 1]} : vector<16x128xf32> to vector<16x32xf32>
    %665 = arith.negf %664 : vector<16x32xf32>
    %666 = math.exp %665 : vector<16x32xf32>
    %cst_149 = arith.constant 1.000000e+00 : f32
    %667 = vector.broadcast %cst_149 : f32 to vector<16x32xf32>
    %668 = arith.addf %667, %666 : vector<16x32xf32>
    %669 = arith.divf %667, %668 : vector<16x32xf32>
    %670 = arith.mulf %661, %607 : vector<16x32xf32>
    %671 = arith.mulf %655, %663 : vector<16x32xf32>
    %672 = arith.addf %670, %671 : vector<16x32xf32>
    %673 = math.tanh %672 : vector<16x32xf32>
    %674 = arith.mulf %669, %673 : vector<16x32xf32>
    %c9_i32 = arith.constant 9 : i32
    %675 = arith.addi %25, %c9_i32 : i32
    %676 = vector.broadcast %675 : i32 to vector<16x32xi32>
    %677 = arith.cmpi slt, %676, %23 : vector<16x32xi32>
    %678 = arith.select %677, %649, %24 : vector<16x32xi1>, vector<16x32xf32>
    %679 = arith.maximumf %614, %678 : vector<16x32xf32>
    %680 = arith.select %677, %674, %24 : vector<16x32xi1>, vector<16x32xf32>
    %681 = arith.maximumf %616, %680 : vector<16x32xf32>
    %c160 = arith.constant 160 : index
    %c0_150 = arith.constant 0 : index
    %682 = vector.load %arg15[%c160, %c0_150] : memref<256x128xf32, #tpu.memory_space<vmem>>, vector<16x128xf32>
    %683 = arith.truncf %649 : vector<16x32xf32> to vector<16x32xbf16>
    %cst_151 = arith.constant dense<0.000000e+00> : vector<16x128xf32>
    %684 = tpu.matmul %683, %19, %cst_151 {dimension_numbers = #tpu.dot_dimension_numbers<[1], [0], [0], [1], [0, 0, 1, 1], [], []>} : vector<16x32xbf16>, vector<32x128xbf16>, vector<16x128xf32> -> vector<16x128xf32>
    %685 = arith.addf %682, %684 : vector<16x128xf32>
    %c160_152 = arith.constant 160 : index
    %c0_153 = arith.constant 0 : index
    %686 = vector.load %arg16[%c160_152, %c0_153] : memref<256x128xf32, #tpu.memory_space<vmem>>, vector<16x128xf32>
    %687 = arith.truncf %674 : vector<16x32xf32> to vector<16x32xbf16>
    %cst_154 = arith.constant dense<0.000000e+00> : vector<16x128xf32>
    %688 = tpu.matmul %687, %20, %cst_154 {dimension_numbers = #tpu.dot_dimension_numbers<[1], [0], [0], [1], [0, 0, 1, 1], [], []>} : vector<16x32xbf16>, vector<32x128xbf16>, vector<16x128xf32> -> vector<16x128xf32>
    %689 = arith.addf %686, %688 : vector<16x128xf32>
    %690 = vector.extract_strided_slice %685 {offsets = [0, 0], sizes = [16, 32], strides = [1, 1]} : vector<16x128xf32> to vector<16x32xf32>
    %691 = arith.negf %690 : vector<16x32xf32>
    %692 = math.exp %691 : vector<16x32xf32>
    %cst_155 = arith.constant 1.000000e+00 : f32
    %693 = vector.broadcast %cst_155 : f32 to vector<16x32xf32>
    %694 = arith.addf %693, %692 : vector<16x32xf32>
    %695 = arith.divf %693, %694 : vector<16x32xf32>
    %696 = vector.extract_strided_slice %685 {offsets = [0, 32], sizes = [16, 32], strides = [1, 1]} : vector<16x128xf32> to vector<16x32xf32>
    %697 = arith.negf %696 : vector<16x32xf32>
    %698 = math.exp %697 : vector<16x32xf32>
    %cst_156 = arith.constant 1.000000e+00 : f32
    %699 = vector.broadcast %cst_156 : f32 to vector<16x32xf32>
    %700 = arith.addf %699, %698 : vector<16x32xf32>
    %701 = arith.divf %699, %700 : vector<16x32xf32>
    %702 = vector.extract_strided_slice %685 {offsets = [0, 64], sizes = [16, 32], strides = [1, 1]} : vector<16x128xf32> to vector<16x32xf32>
    %703 = math.tanh %702 : vector<16x32xf32>
    %704 = vector.extract_strided_slice %685 {offsets = [0, 96], sizes = [16, 32], strides = [1, 1]} : vector<16x128xf32> to vector<16x32xf32>
    %705 = arith.negf %704 : vector<16x32xf32>
    %706 = math.exp %705 : vector<16x32xf32>
    %cst_157 = arith.constant 1.000000e+00 : f32
    %707 = vector.broadcast %cst_157 : f32 to vector<16x32xf32>
    %708 = arith.addf %707, %706 : vector<16x32xf32>
    %709 = arith.divf %707, %708 : vector<16x32xf32>
    %710 = arith.mulf %701, %647 : vector<16x32xf32>
    %711 = arith.mulf %695, %703 : vector<16x32xf32>
    %712 = arith.addf %710, %711 : vector<16x32xf32>
    %713 = math.tanh %712 : vector<16x32xf32>
    %714 = arith.mulf %709, %713 : vector<16x32xf32>
    %715 = vector.extract_strided_slice %689 {offsets = [0, 0], sizes = [16, 32], strides = [1, 1]} : vector<16x128xf32> to vector<16x32xf32>
    %716 = arith.negf %715 : vector<16x32xf32>
    %717 = math.exp %716 : vector<16x32xf32>
    %cst_158 = arith.constant 1.000000e+00 : f32
    %718 = vector.broadcast %cst_158 : f32 to vector<16x32xf32>
    %719 = arith.addf %718, %717 : vector<16x32xf32>
    %720 = arith.divf %718, %719 : vector<16x32xf32>
    %721 = vector.extract_strided_slice %689 {offsets = [0, 32], sizes = [16, 32], strides = [1, 1]} : vector<16x128xf32> to vector<16x32xf32>
    %722 = arith.negf %721 : vector<16x32xf32>
    %723 = math.exp %722 : vector<16x32xf32>
    %cst_159 = arith.constant 1.000000e+00 : f32
    %724 = vector.broadcast %cst_159 : f32 to vector<16x32xf32>
    %725 = arith.addf %724, %723 : vector<16x32xf32>
    %726 = arith.divf %724, %725 : vector<16x32xf32>
    %727 = vector.extract_strided_slice %689 {offsets = [0, 64], sizes = [16, 32], strides = [1, 1]} : vector<16x128xf32> to vector<16x32xf32>
    %728 = math.tanh %727 : vector<16x32xf32>
    %729 = vector.extract_strided_slice %689 {offsets = [0, 96], sizes = [16, 32], strides = [1, 1]} : vector<16x128xf32> to vector<16x32xf32>
    %730 = arith.negf %729 : vector<16x32xf32>
    %731 = math.exp %730 : vector<16x32xf32>
    %cst_160 = arith.constant 1.000000e+00 : f32
    %732 = vector.broadcast %cst_160 : f32 to vector<16x32xf32>
    %733 = arith.addf %732, %731 : vector<16x32xf32>
    %734 = arith.divf %732, %733 : vector<16x32xf32>
    %735 = arith.mulf %726, %672 : vector<16x32xf32>
    %736 = arith.mulf %720, %728 : vector<16x32xf32>
    %737 = arith.addf %735, %736 : vector<16x32xf32>
    %738 = math.tanh %737 : vector<16x32xf32>
    %739 = arith.mulf %734, %738 : vector<16x32xf32>
    %c10_i32 = arith.constant 10 : i32
    %740 = arith.addi %25, %c10_i32 : i32
    %741 = vector.broadcast %740 : i32 to vector<16x32xi32>
    %742 = arith.cmpi slt, %741, %23 : vector<16x32xi32>
    %743 = arith.select %742, %714, %24 : vector<16x32xi1>, vector<16x32xf32>
    %744 = arith.maximumf %679, %743 : vector<16x32xf32>
    %745 = arith.select %742, %739, %24 : vector<16x32xi1>, vector<16x32xf32>
    %746 = arith.maximumf %681, %745 : vector<16x32xf32>
    %c176 = arith.constant 176 : index
    %c0_161 = arith.constant 0 : index
    %747 = vector.load %arg15[%c176, %c0_161] : memref<256x128xf32, #tpu.memory_space<vmem>>, vector<16x128xf32>
    %748 = arith.truncf %714 : vector<16x32xf32> to vector<16x32xbf16>
    %cst_162 = arith.constant dense<0.000000e+00> : vector<16x128xf32>
    %749 = tpu.matmul %748, %19, %cst_162 {dimension_numbers = #tpu.dot_dimension_numbers<[1], [0], [0], [1], [0, 0, 1, 1], [], []>} : vector<16x32xbf16>, vector<32x128xbf16>, vector<16x128xf32> -> vector<16x128xf32>
    %750 = arith.addf %747, %749 : vector<16x128xf32>
    %c176_163 = arith.constant 176 : index
    %c0_164 = arith.constant 0 : index
    %751 = vector.load %arg16[%c176_163, %c0_164] : memref<256x128xf32, #tpu.memory_space<vmem>>, vector<16x128xf32>
    %752 = arith.truncf %739 : vector<16x32xf32> to vector<16x32xbf16>
    %cst_165 = arith.constant dense<0.000000e+00> : vector<16x128xf32>
    %753 = tpu.matmul %752, %20, %cst_165 {dimension_numbers = #tpu.dot_dimension_numbers<[1], [0], [0], [1], [0, 0, 1, 1], [], []>} : vector<16x32xbf16>, vector<32x128xbf16>, vector<16x128xf32> -> vector<16x128xf32>
    %754 = arith.addf %751, %753 : vector<16x128xf32>
    %755 = vector.extract_strided_slice %750 {offsets = [0, 0], sizes = [16, 32], strides = [1, 1]} : vector<16x128xf32> to vector<16x32xf32>
    %756 = arith.negf %755 : vector<16x32xf32>
    %757 = math.exp %756 : vector<16x32xf32>
    %cst_166 = arith.constant 1.000000e+00 : f32
    %758 = vector.broadcast %cst_166 : f32 to vector<16x32xf32>
    %759 = arith.addf %758, %757 : vector<16x32xf32>
    %760 = arith.divf %758, %759 : vector<16x32xf32>
    %761 = vector.extract_strided_slice %750 {offsets = [0, 32], sizes = [16, 32], strides = [1, 1]} : vector<16x128xf32> to vector<16x32xf32>
    %762 = arith.negf %761 : vector<16x32xf32>
    %763 = math.exp %762 : vector<16x32xf32>
    %cst_167 = arith.constant 1.000000e+00 : f32
    %764 = vector.broadcast %cst_167 : f32 to vector<16x32xf32>
    %765 = arith.addf %764, %763 : vector<16x32xf32>
    %766 = arith.divf %764, %765 : vector<16x32xf32>
    %767 = vector.extract_strided_slice %750 {offsets = [0, 64], sizes = [16, 32], strides = [1, 1]} : vector<16x128xf32> to vector<16x32xf32>
    %768 = math.tanh %767 : vector<16x32xf32>
    %769 = vector.extract_strided_slice %750 {offsets = [0, 96], sizes = [16, 32], strides = [1, 1]} : vector<16x128xf32> to vector<16x32xf32>
    %770 = arith.negf %769 : vector<16x32xf32>
    %771 = math.exp %770 : vector<16x32xf32>
    %cst_168 = arith.constant 1.000000e+00 : f32
    %772 = vector.broadcast %cst_168 : f32 to vector<16x32xf32>
    %773 = arith.addf %772, %771 : vector<16x32xf32>
    %774 = arith.divf %772, %773 : vector<16x32xf32>
    %775 = arith.mulf %766, %712 : vector<16x32xf32>
    %776 = arith.mulf %760, %768 : vector<16x32xf32>
    %777 = arith.addf %775, %776 : vector<16x32xf32>
    %778 = math.tanh %777 : vector<16x32xf32>
    %779 = arith.mulf %774, %778 : vector<16x32xf32>
    %780 = vector.extract_strided_slice %754 {offsets = [0, 0], sizes = [16, 32], strides = [1, 1]} : vector<16x128xf32> to vector<16x32xf32>
    %781 = arith.negf %780 : vector<16x32xf32>
    %782 = math.exp %781 : vector<16x32xf32>
    %cst_169 = arith.constant 1.000000e+00 : f32
    %783 = vector.broadcast %cst_169 : f32 to vector<16x32xf32>
    %784 = arith.addf %783, %782 : vector<16x32xf32>
    %785 = arith.divf %783, %784 : vector<16x32xf32>
    %786 = vector.extract_strided_slice %754 {offsets = [0, 32], sizes = [16, 32], strides = [1, 1]} : vector<16x128xf32> to vector<16x32xf32>
    %787 = arith.negf %786 : vector<16x32xf32>
    %788 = math.exp %787 : vector<16x32xf32>
    %cst_170 = arith.constant 1.000000e+00 : f32
    %789 = vector.broadcast %cst_170 : f32 to vector<16x32xf32>
    %790 = arith.addf %789, %788 : vector<16x32xf32>
    %791 = arith.divf %789, %790 : vector<16x32xf32>
    %792 = vector.extract_strided_slice %754 {offsets = [0, 64], sizes = [16, 32], strides = [1, 1]} : vector<16x128xf32> to vector<16x32xf32>
    %793 = math.tanh %792 : vector<16x32xf32>
    %794 = vector.extract_strided_slice %754 {offsets = [0, 96], sizes = [16, 32], strides = [1, 1]} : vector<16x128xf32> to vector<16x32xf32>
    %795 = arith.negf %794 : vector<16x32xf32>
    %796 = math.exp %795 : vector<16x32xf32>
    %cst_171 = arith.constant 1.000000e+00 : f32
    %797 = vector.broadcast %cst_171 : f32 to vector<16x32xf32>
    %798 = arith.addf %797, %796 : vector<16x32xf32>
    %799 = arith.divf %797, %798 : vector<16x32xf32>
    %800 = arith.mulf %791, %737 : vector<16x32xf32>
    %801 = arith.mulf %785, %793 : vector<16x32xf32>
    %802 = arith.addf %800, %801 : vector<16x32xf32>
    %803 = math.tanh %802 : vector<16x32xf32>
    %804 = arith.mulf %799, %803 : vector<16x32xf32>
    %c11_i32 = arith.constant 11 : i32
    %805 = arith.addi %25, %c11_i32 : i32
    %806 = vector.broadcast %805 : i32 to vector<16x32xi32>
    %807 = arith.cmpi slt, %806, %23 : vector<16x32xi32>
    %808 = arith.select %807, %779, %24 : vector<16x32xi1>, vector<16x32xf32>
    %809 = arith.maximumf %744, %808 : vector<16x32xf32>
    %810 = arith.select %807, %804, %24 : vector<16x32xi1>, vector<16x32xf32>
    %811 = arith.maximumf %746, %810 : vector<16x32xf32>
    %c192 = arith.constant 192 : index
    %c0_172 = arith.constant 0 : index
    %812 = vector.load %arg15[%c192, %c0_172] : memref<256x128xf32, #tpu.memory_space<vmem>>, vector<16x128xf32>
    %813 = arith.truncf %779 : vector<16x32xf32> to vector<16x32xbf16>
    %cst_173 = arith.constant dense<0.000000e+00> : vector<16x128xf32>
    %814 = tpu.matmul %813, %19, %cst_173 {dimension_numbers = #tpu.dot_dimension_numbers<[1], [0], [0], [1], [0, 0, 1, 1], [], []>} : vector<16x32xbf16>, vector<32x128xbf16>, vector<16x128xf32> -> vector<16x128xf32>
    %815 = arith.addf %812, %814 : vector<16x128xf32>
    %c192_174 = arith.constant 192 : index
    %c0_175 = arith.constant 0 : index
    %816 = vector.load %arg16[%c192_174, %c0_175] : memref<256x128xf32, #tpu.memory_space<vmem>>, vector<16x128xf32>
    %817 = arith.truncf %804 : vector<16x32xf32> to vector<16x32xbf16>
    %cst_176 = arith.constant dense<0.000000e+00> : vector<16x128xf32>
    %818 = tpu.matmul %817, %20, %cst_176 {dimension_numbers = #tpu.dot_dimension_numbers<[1], [0], [0], [1], [0, 0, 1, 1], [], []>} : vector<16x32xbf16>, vector<32x128xbf16>, vector<16x128xf32> -> vector<16x128xf32>
    %819 = arith.addf %816, %818 : vector<16x128xf32>
    %820 = vector.extract_strided_slice %815 {offsets = [0, 0], sizes = [16, 32], strides = [1, 1]} : vector<16x128xf32> to vector<16x32xf32>
    %821 = arith.negf %820 : vector<16x32xf32>
    %822 = math.exp %821 : vector<16x32xf32>
    %cst_177 = arith.constant 1.000000e+00 : f32
    %823 = vector.broadcast %cst_177 : f32 to vector<16x32xf32>
    %824 = arith.addf %823, %822 : vector<16x32xf32>
    %825 = arith.divf %823, %824 : vector<16x32xf32>
    %826 = vector.extract_strided_slice %815 {offsets = [0, 32], sizes = [16, 32], strides = [1, 1]} : vector<16x128xf32> to vector<16x32xf32>
    %827 = arith.negf %826 : vector<16x32xf32>
    %828 = math.exp %827 : vector<16x32xf32>
    %cst_178 = arith.constant 1.000000e+00 : f32
    %829 = vector.broadcast %cst_178 : f32 to vector<16x32xf32>
    %830 = arith.addf %829, %828 : vector<16x32xf32>
    %831 = arith.divf %829, %830 : vector<16x32xf32>
    %832 = vector.extract_strided_slice %815 {offsets = [0, 64], sizes = [16, 32], strides = [1, 1]} : vector<16x128xf32> to vector<16x32xf32>
    %833 = math.tanh %832 : vector<16x32xf32>
    %834 = vector.extract_strided_slice %815 {offsets = [0, 96], sizes = [16, 32], strides = [1, 1]} : vector<16x128xf32> to vector<16x32xf32>
    %835 = arith.negf %834 : vector<16x32xf32>
    %836 = math.exp %835 : vector<16x32xf32>
    %cst_179 = arith.constant 1.000000e+00 : f32
    %837 = vector.broadcast %cst_179 : f32 to vector<16x32xf32>
    %838 = arith.addf %837, %836 : vector<16x32xf32>
    %839 = arith.divf %837, %838 : vector<16x32xf32>
    %840 = arith.mulf %831, %777 : vector<16x32xf32>
    %841 = arith.mulf %825, %833 : vector<16x32xf32>
    %842 = arith.addf %840, %841 : vector<16x32xf32>
    %843 = math.tanh %842 : vector<16x32xf32>
    %844 = arith.mulf %839, %843 : vector<16x32xf32>
    %845 = vector.extract_strided_slice %819 {offsets = [0, 0], sizes = [16, 32], strides = [1, 1]} : vector<16x128xf32> to vector<16x32xf32>
    %846 = arith.negf %845 : vector<16x32xf32>
    %847 = math.exp %846 : vector<16x32xf32>
    %cst_180 = arith.constant 1.000000e+00 : f32
    %848 = vector.broadcast %cst_180 : f32 to vector<16x32xf32>
    %849 = arith.addf %848, %847 : vector<16x32xf32>
    %850 = arith.divf %848, %849 : vector<16x32xf32>
    %851 = vector.extract_strided_slice %819 {offsets = [0, 32], sizes = [16, 32], strides = [1, 1]} : vector<16x128xf32> to vector<16x32xf32>
    %852 = arith.negf %851 : vector<16x32xf32>
    %853 = math.exp %852 : vector<16x32xf32>
    %cst_181 = arith.constant 1.000000e+00 : f32
    %854 = vector.broadcast %cst_181 : f32 to vector<16x32xf32>
    %855 = arith.addf %854, %853 : vector<16x32xf32>
    %856 = arith.divf %854, %855 : vector<16x32xf32>
    %857 = vector.extract_strided_slice %819 {offsets = [0, 64], sizes = [16, 32], strides = [1, 1]} : vector<16x128xf32> to vector<16x32xf32>
    %858 = math.tanh %857 : vector<16x32xf32>
    %859 = vector.extract_strided_slice %819 {offsets = [0, 96], sizes = [16, 32], strides = [1, 1]} : vector<16x128xf32> to vector<16x32xf32>
    %860 = arith.negf %859 : vector<16x32xf32>
    %861 = math.exp %860 : vector<16x32xf32>
    %cst_182 = arith.constant 1.000000e+00 : f32
    %862 = vector.broadcast %cst_182 : f32 to vector<16x32xf32>
    %863 = arith.addf %862, %861 : vector<16x32xf32>
    %864 = arith.divf %862, %863 : vector<16x32xf32>
    %865 = arith.mulf %856, %802 : vector<16x32xf32>
    %866 = arith.mulf %850, %858 : vector<16x32xf32>
    %867 = arith.addf %865, %866 : vector<16x32xf32>
    %868 = math.tanh %867 : vector<16x32xf32>
    %869 = arith.mulf %864, %868 : vector<16x32xf32>
    %c12_i32 = arith.constant 12 : i32
    %870 = arith.addi %25, %c12_i32 : i32
    %871 = vector.broadcast %870 : i32 to vector<16x32xi32>
    %872 = arith.cmpi slt, %871, %23 : vector<16x32xi32>
    %873 = arith.select %872, %844, %24 : vector<16x32xi1>, vector<16x32xf32>
    %874 = arith.maximumf %809, %873 : vector<16x32xf32>
    %875 = arith.select %872, %869, %24 : vector<16x32xi1>, vector<16x32xf32>
    %876 = arith.maximumf %811, %875 : vector<16x32xf32>
    %c208 = arith.constant 208 : index
    %c0_183 = arith.constant 0 : index
    %877 = vector.load %arg15[%c208, %c0_183] : memref<256x128xf32, #tpu.memory_space<vmem>>, vector<16x128xf32>
    %878 = arith.truncf %844 : vector<16x32xf32> to vector<16x32xbf16>
    %cst_184 = arith.constant dense<0.000000e+00> : vector<16x128xf32>
    %879 = tpu.matmul %878, %19, %cst_184 {dimension_numbers = #tpu.dot_dimension_numbers<[1], [0], [0], [1], [0, 0, 1, 1], [], []>} : vector<16x32xbf16>, vector<32x128xbf16>, vector<16x128xf32> -> vector<16x128xf32>
    %880 = arith.addf %877, %879 : vector<16x128xf32>
    %c208_185 = arith.constant 208 : index
    %c0_186 = arith.constant 0 : index
    %881 = vector.load %arg16[%c208_185, %c0_186] : memref<256x128xf32, #tpu.memory_space<vmem>>, vector<16x128xf32>
    %882 = arith.truncf %869 : vector<16x32xf32> to vector<16x32xbf16>
    %cst_187 = arith.constant dense<0.000000e+00> : vector<16x128xf32>
    %883 = tpu.matmul %882, %20, %cst_187 {dimension_numbers = #tpu.dot_dimension_numbers<[1], [0], [0], [1], [0, 0, 1, 1], [], []>} : vector<16x32xbf16>, vector<32x128xbf16>, vector<16x128xf32> -> vector<16x128xf32>
    %884 = arith.addf %881, %883 : vector<16x128xf32>
    %885 = vector.extract_strided_slice %880 {offsets = [0, 0], sizes = [16, 32], strides = [1, 1]} : vector<16x128xf32> to vector<16x32xf32>
    %886 = arith.negf %885 : vector<16x32xf32>
    %887 = math.exp %886 : vector<16x32xf32>
    %cst_188 = arith.constant 1.000000e+00 : f32
    %888 = vector.broadcast %cst_188 : f32 to vector<16x32xf32>
    %889 = arith.addf %888, %887 : vector<16x32xf32>
    %890 = arith.divf %888, %889 : vector<16x32xf32>
    %891 = vector.extract_strided_slice %880 {offsets = [0, 32], sizes = [16, 32], strides = [1, 1]} : vector<16x128xf32> to vector<16x32xf32>
    %892 = arith.negf %891 : vector<16x32xf32>
    %893 = math.exp %892 : vector<16x32xf32>
    %cst_189 = arith.constant 1.000000e+00 : f32
    %894 = vector.broadcast %cst_189 : f32 to vector<16x32xf32>
    %895 = arith.addf %894, %893 : vector<16x32xf32>
    %896 = arith.divf %894, %895 : vector<16x32xf32>
    %897 = vector.extract_strided_slice %880 {offsets = [0, 64], sizes = [16, 32], strides = [1, 1]} : vector<16x128xf32> to vector<16x32xf32>
    %898 = math.tanh %897 : vector<16x32xf32>
    %899 = vector.extract_strided_slice %880 {offsets = [0, 96], sizes = [16, 32], strides = [1, 1]} : vector<16x128xf32> to vector<16x32xf32>
    %900 = arith.negf %899 : vector<16x32xf32>
    %901 = math.exp %900 : vector<16x32xf32>
    %cst_190 = arith.constant 1.000000e+00 : f32
    %902 = vector.broadcast %cst_190 : f32 to vector<16x32xf32>
    %903 = arith.addf %902, %901 : vector<16x32xf32>
    %904 = arith.divf %902, %903 : vector<16x32xf32>
    %905 = arith.mulf %896, %842 : vector<16x32xf32>
    %906 = arith.mulf %890, %898 : vector<16x32xf32>
    %907 = arith.addf %905, %906 : vector<16x32xf32>
    %908 = math.tanh %907 : vector<16x32xf32>
    %909 = arith.mulf %904, %908 : vector<16x32xf32>
    %910 = vector.extract_strided_slice %884 {offsets = [0, 0], sizes = [16, 32], strides = [1, 1]} : vector<16x128xf32> to vector<16x32xf32>
    %911 = arith.negf %910 : vector<16x32xf32>
    %912 = math.exp %911 : vector<16x32xf32>
    %cst_191 = arith.constant 1.000000e+00 : f32
    %913 = vector.broadcast %cst_191 : f32 to vector<16x32xf32>
    %914 = arith.addf %913, %912 : vector<16x32xf32>
    %915 = arith.divf %913, %914 : vector<16x32xf32>
    %916 = vector.extract_strided_slice %884 {offsets = [0, 32], sizes = [16, 32], strides = [1, 1]} : vector<16x128xf32> to vector<16x32xf32>
    %917 = arith.negf %916 : vector<16x32xf32>
    %918 = math.exp %917 : vector<16x32xf32>
    %cst_192 = arith.constant 1.000000e+00 : f32
    %919 = vector.broadcast %cst_192 : f32 to vector<16x32xf32>
    %920 = arith.addf %919, %918 : vector<16x32xf32>
    %921 = arith.divf %919, %920 : vector<16x32xf32>
    %922 = vector.extract_strided_slice %884 {offsets = [0, 64], sizes = [16, 32], strides = [1, 1]} : vector<16x128xf32> to vector<16x32xf32>
    %923 = math.tanh %922 : vector<16x32xf32>
    %924 = vector.extract_strided_slice %884 {offsets = [0, 96], sizes = [16, 32], strides = [1, 1]} : vector<16x128xf32> to vector<16x32xf32>
    %925 = arith.negf %924 : vector<16x32xf32>
    %926 = math.exp %925 : vector<16x32xf32>
    %cst_193 = arith.constant 1.000000e+00 : f32
    %927 = vector.broadcast %cst_193 : f32 to vector<16x32xf32>
    %928 = arith.addf %927, %926 : vector<16x32xf32>
    %929 = arith.divf %927, %928 : vector<16x32xf32>
    %930 = arith.mulf %921, %867 : vector<16x32xf32>
    %931 = arith.mulf %915, %923 : vector<16x32xf32>
    %932 = arith.addf %930, %931 : vector<16x32xf32>
    %933 = math.tanh %932 : vector<16x32xf32>
    %934 = arith.mulf %929, %933 : vector<16x32xf32>
    %c13_i32 = arith.constant 13 : i32
    %935 = arith.addi %25, %c13_i32 : i32
    %936 = vector.broadcast %935 : i32 to vector<16x32xi32>
    %937 = arith.cmpi slt, %936, %23 : vector<16x32xi32>
    %938 = arith.select %937, %909, %24 : vector<16x32xi1>, vector<16x32xf32>
    %939 = arith.maximumf %874, %938 : vector<16x32xf32>
    %940 = arith.select %937, %934, %24 : vector<16x32xi1>, vector<16x32xf32>
    %941 = arith.maximumf %876, %940 : vector<16x32xf32>
    %c224 = arith.constant 224 : index
    %c0_194 = arith.constant 0 : index
    %942 = vector.load %arg15[%c224, %c0_194] : memref<256x128xf32, #tpu.memory_space<vmem>>, vector<16x128xf32>
    %943 = arith.truncf %909 : vector<16x32xf32> to vector<16x32xbf16>
    %cst_195 = arith.constant dense<0.000000e+00> : vector<16x128xf32>
    %944 = tpu.matmul %943, %19, %cst_195 {dimension_numbers = #tpu.dot_dimension_numbers<[1], [0], [0], [1], [0, 0, 1, 1], [], []>} : vector<16x32xbf16>, vector<32x128xbf16>, vector<16x128xf32> -> vector<16x128xf32>
    %945 = arith.addf %942, %944 : vector<16x128xf32>
    %c224_196 = arith.constant 224 : index
    %c0_197 = arith.constant 0 : index
    %946 = vector.load %arg16[%c224_196, %c0_197] : memref<256x128xf32, #tpu.memory_space<vmem>>, vector<16x128xf32>
    %947 = arith.truncf %934 : vector<16x32xf32> to vector<16x32xbf16>
    %cst_198 = arith.constant dense<0.000000e+00> : vector<16x128xf32>
    %948 = tpu.matmul %947, %20, %cst_198 {dimension_numbers = #tpu.dot_dimension_numbers<[1], [0], [0], [1], [0, 0, 1, 1], [], []>} : vector<16x32xbf16>, vector<32x128xbf16>, vector<16x128xf32> -> vector<16x128xf32>
    %949 = arith.addf %946, %948 : vector<16x128xf32>
    %950 = vector.extract_strided_slice %945 {offsets = [0, 0], sizes = [16, 32], strides = [1, 1]} : vector<16x128xf32> to vector<16x32xf32>
    %951 = arith.negf %950 : vector<16x32xf32>
    %952 = math.exp %951 : vector<16x32xf32>
    %cst_199 = arith.constant 1.000000e+00 : f32
    %953 = vector.broadcast %cst_199 : f32 to vector<16x32xf32>
    %954 = arith.addf %953, %952 : vector<16x32xf32>
    %955 = arith.divf %953, %954 : vector<16x32xf32>
    %956 = vector.extract_strided_slice %945 {offsets = [0, 32], sizes = [16, 32], strides = [1, 1]} : vector<16x128xf32> to vector<16x32xf32>
    %957 = arith.negf %956 : vector<16x32xf32>
    %958 = math.exp %957 : vector<16x32xf32>
    %cst_200 = arith.constant 1.000000e+00 : f32
    %959 = vector.broadcast %cst_200 : f32 to vector<16x32xf32>
    %960 = arith.addf %959, %958 : vector<16x32xf32>
    %961 = arith.divf %959, %960 : vector<16x32xf32>
    %962 = vector.extract_strided_slice %945 {offsets = [0, 64], sizes = [16, 32], strides = [1, 1]} : vector<16x128xf32> to vector<16x32xf32>
    %963 = math.tanh %962 : vector<16x32xf32>
    %964 = vector.extract_strided_slice %945 {offsets = [0, 96], sizes = [16, 32], strides = [1, 1]} : vector<16x128xf32> to vector<16x32xf32>
    %965 = arith.negf %964 : vector<16x32xf32>
    %966 = math.exp %965 : vector<16x32xf32>
    %cst_201 = arith.constant 1.000000e+00 : f32
    %967 = vector.broadcast %cst_201 : f32 to vector<16x32xf32>
    %968 = arith.addf %967, %966 : vector<16x32xf32>
    %969 = arith.divf %967, %968 : vector<16x32xf32>
    %970 = arith.mulf %961, %907 : vector<16x32xf32>
    %971 = arith.mulf %955, %963 : vector<16x32xf32>
    %972 = arith.addf %970, %971 : vector<16x32xf32>
    %973 = math.tanh %972 : vector<16x32xf32>
    %974 = arith.mulf %969, %973 : vector<16x32xf32>
    %975 = vector.extract_strided_slice %949 {offsets = [0, 0], sizes = [16, 32], strides = [1, 1]} : vector<16x128xf32> to vector<16x32xf32>
    %976 = arith.negf %975 : vector<16x32xf32>
    %977 = math.exp %976 : vector<16x32xf32>
    %cst_202 = arith.constant 1.000000e+00 : f32
    %978 = vector.broadcast %cst_202 : f32 to vector<16x32xf32>
    %979 = arith.addf %978, %977 : vector<16x32xf32>
    %980 = arith.divf %978, %979 : vector<16x32xf32>
    %981 = vector.extract_strided_slice %949 {offsets = [0, 32], sizes = [16, 32], strides = [1, 1]} : vector<16x128xf32> to vector<16x32xf32>
    %982 = arith.negf %981 : vector<16x32xf32>
    %983 = math.exp %982 : vector<16x32xf32>
    %cst_203 = arith.constant 1.000000e+00 : f32
    %984 = vector.broadcast %cst_203 : f32 to vector<16x32xf32>
    %985 = arith.addf %984, %983 : vector<16x32xf32>
    %986 = arith.divf %984, %985 : vector<16x32xf32>
    %987 = vector.extract_strided_slice %949 {offsets = [0, 64], sizes = [16, 32], strides = [1, 1]} : vector<16x128xf32> to vector<16x32xf32>
    %988 = math.tanh %987 : vector<16x32xf32>
    %989 = vector.extract_strided_slice %949 {offsets = [0, 96], sizes = [16, 32], strides = [1, 1]} : vector<16x128xf32> to vector<16x32xf32>
    %990 = arith.negf %989 : vector<16x32xf32>
    %991 = math.exp %990 : vector<16x32xf32>
    %cst_204 = arith.constant 1.000000e+00 : f32
    %992 = vector.broadcast %cst_204 : f32 to vector<16x32xf32>
    %993 = arith.addf %992, %991 : vector<16x32xf32>
    %994 = arith.divf %992, %993 : vector<16x32xf32>
    %995 = arith.mulf %986, %932 : vector<16x32xf32>
    %996 = arith.mulf %980, %988 : vector<16x32xf32>
    %997 = arith.addf %995, %996 : vector<16x32xf32>
    %998 = math.tanh %997 : vector<16x32xf32>
    %999 = arith.mulf %994, %998 : vector<16x32xf32>
    %c14_i32 = arith.constant 14 : i32
    %1000 = arith.addi %25, %c14_i32 : i32
    %1001 = vector.broadcast %1000 : i32 to vector<16x32xi32>
    %1002 = arith.cmpi slt, %1001, %23 : vector<16x32xi32>
    %1003 = arith.select %1002, %974, %24 : vector<16x32xi1>, vector<16x32xf32>
    %1004 = arith.maximumf %939, %1003 : vector<16x32xf32>
    %1005 = arith.select %1002, %999, %24 : vector<16x32xi1>, vector<16x32xf32>
    %1006 = arith.maximumf %941, %1005 : vector<16x32xf32>
    %c240 = arith.constant 240 : index
    %c0_205 = arith.constant 0 : index
    %1007 = vector.load %arg15[%c240, %c0_205] : memref<256x128xf32, #tpu.memory_space<vmem>>, vector<16x128xf32>
    %1008 = arith.truncf %974 : vector<16x32xf32> to vector<16x32xbf16>
    %cst_206 = arith.constant dense<0.000000e+00> : vector<16x128xf32>
    %1009 = tpu.matmul %1008, %19, %cst_206 {dimension_numbers = #tpu.dot_dimension_numbers<[1], [0], [0], [1], [0, 0, 1, 1], [], []>} : vector<16x32xbf16>, vector<32x128xbf16>, vector<16x128xf32> -> vector<16x128xf32>
    %1010 = arith.addf %1007, %1009 : vector<16x128xf32>
    %c240_207 = arith.constant 240 : index
    %c0_208 = arith.constant 0 : index
    %1011 = vector.load %arg16[%c240_207, %c0_208] : memref<256x128xf32, #tpu.memory_space<vmem>>, vector<16x128xf32>
    %1012 = arith.truncf %999 : vector<16x32xf32> to vector<16x32xbf16>
    %cst_209 = arith.constant dense<0.000000e+00> : vector<16x128xf32>
    %1013 = tpu.matmul %1012, %20, %cst_209 {dimension_numbers = #tpu.dot_dimension_numbers<[1], [0], [0], [1], [0, 0, 1, 1], [], []>} : vector<16x32xbf16>, vector<32x128xbf16>, vector<16x128xf32> -> vector<16x128xf32>
    %1014 = arith.addf %1011, %1013 : vector<16x128xf32>
    %1015 = vector.extract_strided_slice %1010 {offsets = [0, 0], sizes = [16, 32], strides = [1, 1]} : vector<16x128xf32> to vector<16x32xf32>
    %1016 = arith.negf %1015 : vector<16x32xf32>
    %1017 = math.exp %1016 : vector<16x32xf32>
    %cst_210 = arith.constant 1.000000e+00 : f32
    %1018 = vector.broadcast %cst_210 : f32 to vector<16x32xf32>
    %1019 = arith.addf %1018, %1017 : vector<16x32xf32>
    %1020 = arith.divf %1018, %1019 : vector<16x32xf32>
    %1021 = vector.extract_strided_slice %1010 {offsets = [0, 32], sizes = [16, 32], strides = [1, 1]} : vector<16x128xf32> to vector<16x32xf32>
    %1022 = arith.negf %1021 : vector<16x32xf32>
    %1023 = math.exp %1022 : vector<16x32xf32>
    %cst_211 = arith.constant 1.000000e+00 : f32
    %1024 = vector.broadcast %cst_211 : f32 to vector<16x32xf32>
    %1025 = arith.addf %1024, %1023 : vector<16x32xf32>
    %1026 = arith.divf %1024, %1025 : vector<16x32xf32>
    %1027 = vector.extract_strided_slice %1010 {offsets = [0, 64], sizes = [16, 32], strides = [1, 1]} : vector<16x128xf32> to vector<16x32xf32>
    %1028 = math.tanh %1027 : vector<16x32xf32>
    %1029 = vector.extract_strided_slice %1010 {offsets = [0, 96], sizes = [16, 32], strides = [1, 1]} : vector<16x128xf32> to vector<16x32xf32>
    %1030 = arith.negf %1029 : vector<16x32xf32>
    %1031 = math.exp %1030 : vector<16x32xf32>
    %cst_212 = arith.constant 1.000000e+00 : f32
    %1032 = vector.broadcast %cst_212 : f32 to vector<16x32xf32>
    %1033 = arith.addf %1032, %1031 : vector<16x32xf32>
    %1034 = arith.divf %1032, %1033 : vector<16x32xf32>
    %1035 = arith.mulf %1026, %972 : vector<16x32xf32>
    %1036 = arith.mulf %1020, %1028 : vector<16x32xf32>
    %1037 = arith.addf %1035, %1036 : vector<16x32xf32>
    %1038 = math.tanh %1037 : vector<16x32xf32>
    %1039 = arith.mulf %1034, %1038 : vector<16x32xf32>
    %1040 = vector.extract_strided_slice %1014 {offsets = [0, 0], sizes = [16, 32], strides = [1, 1]} : vector<16x128xf32> to vector<16x32xf32>
    %1041 = arith.negf %1040 : vector<16x32xf32>
    %1042 = math.exp %1041 : vector<16x32xf32>
    %cst_213 = arith.constant 1.000000e+00 : f32
    %1043 = vector.broadcast %cst_213 : f32 to vector<16x32xf32>
    %1044 = arith.addf %1043, %1042 : vector<16x32xf32>
    %1045 = arith.divf %1043, %1044 : vector<16x32xf32>
    %1046 = vector.extract_strided_slice %1014 {offsets = [0, 32], sizes = [16, 32], strides = [1, 1]} : vector<16x128xf32> to vector<16x32xf32>
    %1047 = arith.negf %1046 : vector<16x32xf32>
    %1048 = math.exp %1047 : vector<16x32xf32>
    %cst_214 = arith.constant 1.000000e+00 : f32
    %1049 = vector.broadcast %cst_214 : f32 to vector<16x32xf32>
    %1050 = arith.addf %1049, %1048 : vector<16x32xf32>
    %1051 = arith.divf %1049, %1050 : vector<16x32xf32>
    %1052 = vector.extract_strided_slice %1014 {offsets = [0, 64], sizes = [16, 32], strides = [1, 1]} : vector<16x128xf32> to vector<16x32xf32>
    %1053 = math.tanh %1052 : vector<16x32xf32>
    %1054 = vector.extract_strided_slice %1014 {offsets = [0, 96], sizes = [16, 32], strides = [1, 1]} : vector<16x128xf32> to vector<16x32xf32>
    %1055 = arith.negf %1054 : vector<16x32xf32>
    %1056 = math.exp %1055 : vector<16x32xf32>
    %cst_215 = arith.constant 1.000000e+00 : f32
    %1057 = vector.broadcast %cst_215 : f32 to vector<16x32xf32>
    %1058 = arith.addf %1057, %1056 : vector<16x32xf32>
    %1059 = arith.divf %1057, %1058 : vector<16x32xf32>
    %1060 = arith.mulf %1051, %997 : vector<16x32xf32>
    %1061 = arith.mulf %1045, %1053 : vector<16x32xf32>
    %1062 = arith.addf %1060, %1061 : vector<16x32xf32>
    %1063 = math.tanh %1062 : vector<16x32xf32>
    %1064 = arith.mulf %1059, %1063 : vector<16x32xf32>
    %c15_i32 = arith.constant 15 : i32
    %1065 = arith.addi %25, %c15_i32 : i32
    %1066 = vector.broadcast %1065 : i32 to vector<16x32xi32>
    %1067 = arith.cmpi slt, %1066, %23 : vector<16x32xi32>
    %1068 = arith.select %1067, %1039, %24 : vector<16x32xi1>, vector<16x32xf32>
    %1069 = arith.maximumf %1004, %1068 : vector<16x32xf32>
    %1070 = arith.select %1067, %1064, %24 : vector<16x32xi1>, vector<16x32xf32>
    %1071 = arith.maximumf %1006, %1070 : vector<16x32xf32>
    %c0_216 = arith.constant 0 : index
    %c0_217 = arith.constant 0 : index
    %1072 = vector.load %arg17[%c0_216, %c0_217] : memref<16x32xf32, #tpu.memory_space<vmem>>, vector<16x32xf32>
    tpu.vector_store %arg17[%c0_216, %c0_217], %1039 {strides = array<i32>} : memref<16x32xf32, #tpu.memory_space<vmem>>, vector<16x32xf32>,
    %c0_218 = arith.constant 0 : index
    %c0_219 = arith.constant 0 : index
    %1073 = vector.load %arg18[%c0_218, %c0_219] : memref<16x32xf32, #tpu.memory_space<vmem>>, vector<16x32xf32>
    tpu.vector_store %arg18[%c0_218, %c0_219], %1037 {strides = array<i32>} : memref<16x32xf32, #tpu.memory_space<vmem>>, vector<16x32xf32>,
    %c0_220 = arith.constant 0 : index
    %c0_221 = arith.constant 0 : index
    %1074 = vector.load %arg19[%c0_220, %c0_221] : memref<16x32xf32, #tpu.memory_space<vmem>>, vector<16x32xf32>
    tpu.vector_store %arg19[%c0_220, %c0_221], %1064 {strides = array<i32>} : memref<16x32xf32, #tpu.memory_space<vmem>>, vector<16x32xf32>,
    %c0_222 = arith.constant 0 : index
    %c0_223 = arith.constant 0 : index
    %1075 = vector.load %arg20[%c0_222, %c0_223] : memref<16x32xf32, #tpu.memory_space<vmem>>, vector<16x32xf32>
    tpu.vector_store %arg20[%c0_222, %c0_223], %1062 {strides = array<i32>} : memref<16x32xf32, #tpu.memory_space<vmem>>, vector<16x32xf32>,
    %c0_224 = arith.constant 0 : index
    %c0_225 = arith.constant 0 : index
    %1076 = vector.load %arg21[%c0_224, %c0_225] : memref<16x32xf32, #tpu.memory_space<vmem>>, vector<16x32xf32>
    tpu.vector_store %arg21[%c0_224, %c0_225], %1069 {strides = array<i32>} : memref<16x32xf32, #tpu.memory_space<vmem>>, vector<16x32xf32>,
    %c0_226 = arith.constant 0 : index
    %c0_227 = arith.constant 0 : index
    %1077 = vector.load %arg22[%c0_226, %c0_227] : memref<16x32xf32, #tpu.memory_space<vmem>>, vector<16x32xf32>
    tpu.vector_store %arg22[%c0_226, %c0_227], %1071 {strides = array<i32>} : memref<16x32xf32, #tpu.memory_space<vmem>>, vector<16x32xf32>,
    %c2_i32_228 = arith.constant 2 : i32
    %1078 = arith.cmpi eq, %arg1, %c2_i32_228 : i32
    %1079 = arith.extui %1078 : i1 to i32
    %c0_i32_229 = arith.constant 0 : i32
    %1080 = arith.cmpi ne, %1079, %c0_i32_229 : i32
    scf.if %1080 {
      %1081 = arith.truncf %1069 : vector<16x32xf32> to vector<16x32xbf16>
      %c0_230 = arith.constant 0 : index
      %c0_231 = arith.constant 0 : index
      %1082 = vector.load %arg11[%c0_230, %c0_231] : memref<32x128xbf16, #tpu.memory_space<vmem>>, vector<32x128xbf16>
      %cst_232 = arith.constant dense<0.000000e+00> : vector<16x128xf32>
      %1083 = tpu.matmul %1081, %1082, %cst_232 {dimension_numbers = #tpu.dot_dimension_numbers<[1], [0], [0], [1], [0, 0, 1, 1], [], []>} : vector<16x32xbf16>, vector<32x128xbf16>, vector<16x128xf32> -> vector<16x128xf32>
      %1084 = arith.truncf %1071 : vector<16x32xf32> to vector<16x32xbf16>
      %c0_233 = arith.constant 0 : index
      %c0_234 = arith.constant 0 : index
      %1085 = vector.load %arg12[%c0_233, %c0_234] : memref<32x128xbf16, #tpu.memory_space<vmem>>, vector<32x128xbf16>
      %cst_235 = arith.constant dense<0.000000e+00> : vector<16x128xf32>
      %1086 = tpu.matmul %1084, %1085, %cst_235 {dimension_numbers = #tpu.dot_dimension_numbers<[1], [0], [0], [1], [0, 0, 1, 1], [], []>} : vector<16x32xbf16>, vector<32x128xbf16>, vector<16x128xf32> -> vector<16x128xf32>
      %1087 = arith.addf %1083, %1086 : vector<16x128xf32>
      %c0_236 = arith.constant 0 : index
      %c0_237 = arith.constant 0 : index
      %1088 = vector.load %arg13[%c0_236, %c0_237] : memref<1x128xf32, #tpu.memory_space<vmem>>, vector<1x128xf32>
      %1089 = vector.broadcast %1088 : vector<1x128xf32> to vector<16x128xf32>
      %1090 = arith.addf %1087, %1089 : vector<16x128xf32>
      %c0_238 = arith.constant 0 : index
      %c0_239 = arith.constant 0 : index
      %1091 = vector.load %arg14[%c0_238, %c0_239] : memref<16x128xf32, #tpu.memory_space<vmem>>, vector<16x128xf32>
      tpu.vector_store %arg14[%c0_238, %c0_239], %1090 {strides = array<i32>} : memref<16x128xf32, #tpu.memory_space<vmem>>, vector<16x128xf32>,
    } else {
    }
    return
  }
  func.func @transform_0(%arg0: i32, %arg1: i32) -> (i32, i32, i32) {
    %c0_i32 = arith.constant 0 : i32
    %c0_i32_0 = arith.constant 0 : i32
    return %arg0, %arg1, %c0_i32 : i32, i32, i32
  }
  func.func @transform_1(%arg0: i32, %arg1: i32) -> (i32, i32, i32) {
    %c0_i32 = arith.constant 0 : i32
    %c0_i32_0 = arith.constant 0 : i32
    return %arg0, %arg1, %c0_i32 : i32, i32, i32
  }
  func.func @transform_2(%arg0: i32, %arg1: i32) -> (i32, i32) {
    %c0_i32 = arith.constant 0 : i32
    %c0_i32_0 = arith.constant 0 : i32
    return %arg0, %c0_i32 : i32, i32
  }
  func.func @transform_3(%arg0: i32, %arg1: i32) -> (i32, i32) {
    %c0_i32 = arith.constant 0 : i32
    %c0_i32_0 = arith.constant 0 : i32
    %c0_i32_1 = arith.constant 0 : i32
    return %c0_i32, %c0_i32_0 : i32, i32
  }
  func.func @transform_4(%arg0: i32, %arg1: i32) -> (i32, i32) {
    %c0_i32 = arith.constant 0 : i32
    %c0_i32_0 = arith.constant 0 : i32
    %c0_i32_1 = arith.constant 0 : i32
    return %c0_i32, %c0_i32_0 : i32, i32
  }
  func.func @transform_5(%arg0: i32, %arg1: i32) -> (i32, i32) {
    %c0_i32 = arith.constant 0 : i32
    %c0_i32_0 = arith.constant 0 : i32
    %c0_i32_1 = arith.constant 0 : i32
    return %c0_i32, %c0_i32_0 : i32, i32
  }
  func.func @transform_6(%arg0: i32, %arg1: i32) -> (i32, i32) {
    %c0_i32 = arith.constant 0 : i32
    %c0_i32_0 = arith.constant 0 : i32
    %c0_i32_1 = arith.constant 0 : i32
    return %c0_i32, %c0_i32_0 : i32, i32
  }
  func.func @transform_7(%arg0: i32, %arg1: i32) -> (i32, i32) {
    %c0_i32 = arith.constant 0 : i32
    %c0_i32_0 = arith.constant 0 : i32
    %c0_i32_1 = arith.constant 0 : i32
    return %c0_i32, %c0_i32_0 : i32, i32
  }
  func.func @transform_8(%arg0: i32, %arg1: i32) -> (i32, i32) {
    %c0_i32 = arith.constant 0 : i32
    %c0_i32_0 = arith.constant 0 : i32
    %c0_i32_1 = arith.constant 0 : i32
    return %c0_i32, %c0_i32_0 : i32, i32
  }
  func.func @transform_9(%arg0: i32, %arg1: i32) -> (i32, i32) {
    %c0_i32 = arith.constant 0 : i32
    %c0_i32_0 = arith.constant 0 : i32
    %c0_i32_1 = arith.constant 0 : i32
    return %c0_i32, %c0_i32_0 : i32, i32
  }
  func.func @transform_10(%arg0: i32, %arg1: i32) -> (i32, i32) {
    %c0_i32 = arith.constant 0 : i32
    %c0_i32_0 = arith.constant 0 : i32
    %c0_i32_1 = arith.constant 0 : i32
    return %c0_i32, %c0_i32_0 : i32, i32
  }
  func.func @transform_11(%arg0: i32, %arg1: i32) -> (i32, i32) {
    %c0_i32 = arith.constant 0 : i32
    %c0_i32_0 = arith.constant 0 : i32
    %c0_i32_1 = arith.constant 0 : i32
    return %c0_i32, %c0_i32_0 : i32, i32
  }
  func.func @transform_12(%arg0: i32, %arg1: i32) -> (i32, i32) {
    %c0_i32 = arith.constant 0 : i32
    %c0_i32_0 = arith.constant 0 : i32
    return %arg0, %c0_i32 : i32, i32
  }
}

</mosaic_0001>

<bundles_post_ra>
// kernel: text_single_model_forward.1
= control target key start
LH: loop header
LB: loop body
LE: loop exit
PB: predicated region body
PF: predicated region fallthrough
CT: control target
= control target key end

     0   :  { %s6680_s21 = smov 0   ;;  %s6682_s22 = smov 0   ;;  %s8338_s0 = inlined_call_operand.vmem [shape: bf16[2,768,32], index: 0, kind: input, shape index: {}]   ;;  %s8339_s1 = inlined_call_operand.vmem [shape: bf16[2,768,32], index: 1, kind: input, shape index: {}]   ;;  %s8340_s2 = inlined_call_operand.vmem [shape: s32[32,1], index: 2, kind: input, shape index: {}]   ;;  %s8341_s3 = inlined_call_operand.vmem [shape: bf16[32,128], index: 3, kind: input, shape index: {}]   ;;  %s8342_s4 = inlined_call_operand.vmem [shape: bf16[32,128], index: 4, kind: input, shape index: {}]   ;;  %s8343_s5 = inlined_call_operand.vmem [shape: f32[1,128], index: 5, kind: input, shape index: {}]   ;;  %s8344_s6 = inlined_call_operand.vmem [shape: bf16[32,128], index: 6, kind: input, shape index: {}]   ;;  %s8345_s7 = inlined_call_operand.vmem [shape: bf16[32,128], index: 7, kind: input, shape index: {}]   ;;  %s8346_s8 = inlined_call_operand.vmem [shape: f32[1,128], index: 8, kind: input, shape index: {}]   ;;  %s8347_s9 = inlined_call_operand.vmem [shape: bf16[32,128], index: 9, kind: input, shape index: {}]   ;;  %s8348_s10 = inlined_call_operand.vmem [shape: bf16[32,128], index: 10, kind: input, shape index: {}]   ;;  %s8349_s11 = inlined_call_operand.vmem [shape: f32[1,128], index: 11, kind: input, shape index: {}]   ;;  %s8350_s12 = inlined_call_operand.vmem [shape: f32[32,128], index: 12, kind: output, shape index: {}]  }
   0x1   :  { %s6684_s23 = smov 0   ;;  %s6686_s24 = smov 0  }
   0x2   :  { %s6688_s25 = smov 0  }
   0x3 LB: > { %8373 = sst [smem:[#allocation10_spill]] %s6595_s23  ;;  %s31_s26 = sadd.s32 1, %s6595_s23  ;;  %s6603_s25 = sphi %s6688_s25, %s22_s25   ;;  %s6599_s24 = sphi %s6686_s24, %s8461_s24   ;;  %s6595_s23 = sphi %s6684_s23, %s8460_s23   ;;  %s6591_s22 = sphi %s6682_s22, %s8459_s22   ;;  %s6587_s21 = sphi %s6680_s21, %s8458_s21  }
   0x4   : > { %8374 = sst [smem:[#allocation11_spill]] %s6599_s24  ;;  %s34_s27 = sadd.s32 1, %s6599_s24 }
   0x5   : > { %p32_p0 = scmp.ge.s32.totalorder %s31_s26, 3  ;;  %p5271_p1 = scmp.ge.s32.totalorder %s6603_s25, 1 }
   0x6   : > { %p409_p2 = scmp.lt.s32.totalorder %s6603_s25, 7 }
   0x7   : > { %s8463_s26 = smov (%p32_p0, %s31_s26), 0  ;;  %s8465_s27 = smov (!%p32_p0, %s34_s27), %s6599_s24 }
   0x8   : > { %8375 = sst [smem:[#allocation12_spill]] %s8463_s26  ;;  %p410_p3 = pnand %p5271_p1, %p409_p2 }
   0x9   : > { %p36_p4 = scmp.ge.s32.totalorder %s8465_s27, 2 }
   0xa   : > { %413 = sbr.rel (%p410_p3) target bundleno = 11674 (0x2d9a), region = 68 }
   0xb   : > { %s8467_s27 = smov (%p36_p4, %s8465_s27), 0 }
   0xc   : > { %8376 = sst [smem:[#allocation13_spill]] %s8467_s27 }
  0x11   : > { %s5272_s28 = sshll.u32 %s6587_s21, 5  ;;  %p470_p5 = scmp.lt.s32.totalorder %s6591_s22, 1 }
  0x12   : > { %p472_p6 = scmp.lt.s32.totalorder %s5272_s28, 95  ;;  %s5276_s29 = sshll.u32 %s6591_s22, 1 }
  0x13   : > { %s8469_s22 = smov (!%p470_p5, %s6591_s22), 1  ;;  %p490_p7 = scmp.lt.s32.totalorder %s5276_s29, 3 }
  0x14   : > { %s8471_s28 = smov (!%p472_p6, %s5272_s28), 95  ;;  %s5944_s30 = smul.u32 96, %s8469_s22 }
  0x15   : > { %s8473_s29 = smov (!%p490_p7, %s5276_s29), 3  ;;  %p5280_p8 = scmp.ne.s32.totalorder %s6587_s21, 0 }
  0x16   : > { %s475_s13 = sadd.s32 %s5944_s30, %s8471_s28  ;;  %s5277_s27 = sshll.u32 %s8473_s29, 3  ;;  %vm506_vm0 = vcmask (!%p5280_p8), 261120   ;;  %v6605_v0 = vmov (!%p5280_p8), 0.0   ;;  %v6606_v1 = vmov (!%p5280_p8), -10000.0  }
  0x17   : > { %s5273_s14 = sshll.u32 %s475_s13, 2  ;;  %s6726_s23 = scalar_lea.vmem %s8340_s2, %s5277_s27  ;;  %507 = vst.msk [vmem:[#allocation4] sm:$0xff] (!%p5280_p8), %vm506_vm0, %v6605_v0  ;;  %508 = vst.msk [vmem:[#allocation4 + $0x8] sm:$0xff] (!%p5280_p8), %vm506_vm0, %v6605_v0 }
  0x18   : > { %s6716_s17 = scalar_lea.vmem %s8338_s0, %s5273_s14  ;;  %s6721_s20 = scalar_lea.vmem %s8339_s1, %s5273_s14  ;;  %509 = vst.msk [vmem:[#allocation5] sm:$0xff] (!%p5280_p8), %vm506_vm0, %v6605_v0  ;;  %510 = vst.msk [vmem:[#allocation5 + $0x8] sm:$0xff] (!%p5280_p8), %vm506_vm0, %v6605_v0 }
  0x19   : > { %s6731_s30 = scalar_lea.vmem %s8350_s12, %s5277_s27  ;;  %505 = sbr.rel (%p5280_p8) target bundleno = 32 (0x20), region = 72  ;;  %511 = vst.msk [vmem:[#allocation6] sm:$0xff] (!%p5280_p8), %vm506_vm0, %v6605_v0  ;;  %512 = vst.msk [vmem:[#allocation6 + $0x8] sm:$0xff] (!%p5280_p8), %vm506_vm0, %v6605_v0 }
  0x1a   : > { %513 = vst.msk [vmem:[#allocation7] sm:$0xff] (!%p5280_p8), %vm506_vm0, %v6605_v0  ;;  %514 = vst.msk [vmem:[#allocation7 + $0x8] sm:$0xff] (!%p5280_p8), %vm506_vm0, %v6605_v0 }
  0x1b   : > { %515 = vst.msk [vmem:[#allocation8] sm:$0xff] (!%p5280_p8), %vm506_vm0, %v6606_v1  ;;  %516 = vst.msk [vmem:[#allocation8 + $0x8] sm:$0xff] (!%p5280_p8), %vm506_vm0, %v6606_v1 }
  0x1c   : > { %517 = vst.msk [vmem:[#allocation9] sm:$0xff] (!%p5280_p8), %vm506_vm0, %v6606_v1  ;;  %518 = vst.msk [vmem:[#allocation9 + $0x8] sm:$0xff] (!%p5280_p8), %vm506_vm0, %v6606_v1 }
  0x20 PF: > { %v5997_v2 = vld [vmem:[%s8341_s3] sm:$0xff]   ;;  %v5999_v4 = vld [vmem:[%s8341_s3 + $0x8] sm:$0xff]   ;;  %vm654_vm1 = vcmask 261120   ;;  %v8353_v10 = vmov 0.0   ;;  %v6007_v13 = vld [vmem:[%s6716_s17 + $0x10] sm:$0xff]   ;;  %vm6608_vm2 = vmmov 0  }
  0x21   : > { %v5998_v3 = vld [vmem:[%s8344_s6] sm:$0xff]   ;;  %5600 = vmatprep.subr.bf16.mxu0 %v5997_v2  ;;  %v6000_v5 = vld [vmem:[%s8344_s6 + $0x8] sm:$0xff]   ;;  %v6008_v14 = vld [vmem:[%s6721_s20 + $0x10] sm:$0xff]   ;;  %s6609_s15 = smov 64   ;;  %s6610_s16 = smov 32  }
  0x22   : > { %5636 = vmatprep.subr.bf16.mxu1 %v5998_v3  ;;  %5601 = vmatpush3.bf16.msra.mxu0 %v5997_v2  ;;  %v6001_v6 = vld [vmem:[%s6716_s17] sm:$0xff]   ;;  %v6003_v8 = vld [vmem:[%s6716_s17 + $0x8] sm:$0xff]   ;;  %v6009_v15 = vld [vmem:[%s6716_s17 + $0x18] sm:$0xff]   ;;  %s8017_s18 = sshll.u32 %s6587_s21, 4  ;;  %p5452_p9 = scmp.ne.s32.totalorder %s6587_s21, 2 }
  0x23   : > { %5637 = vmatpush3.bf16.msra.mxu1 %v5998_v3  ;;  %5602 = vmatprep.subr.bf16.mxu0 %v5999_v4  ;;  %v6002_v7 = vld [vmem:[%s6721_s20] sm:$0xff]   ;;  %v6004_v9 = vld [vmem:[%s6721_s20 + $0x8] sm:$0xff]   ;;  %v6010_v16 = vld [vmem:[%s6721_s20 + $0x18] sm:$0xff]   ;;  %s1990_s19 = sadd.s32 2, %s8017_s18  ;;  %s2218_s22 = sadd.s32 3, %s8017_s18 }
  0x24   : > { %5638 = vmatprep.subr.bf16.mxu1 %v6000_v5  ;;  %5604 = vmatprep.mubr.msk.bf16.mxu0 %vm654_vm1, %v6001_v6  ;;  %v6756_v11 = vld [vmem:[%s8342_s4] sm:$0xff]   ;;  %v6013_v19 = vld [vmem:[%s6716_s17 + $0x28] sm:$0xff]   ;;  %v6015_v21 = vld [vmem:[%s6716_s17 + $0x30] sm:$0xff]   ;;  %s2446_s28 = sadd.s32 4, %s8017_s18  ;;  %s2674_s24 = sadd.s32 5, %s8017_s18 }
  0x25   : > { %5640 = vmatprep.mubr.msk.bf16.mxu1 %vm654_vm1, %v6002_v7  ;;  %v6762_v12 = vld [vmem:[%s8345_s7] sm:$0xff]   ;;  %v6014_v20 = vld [vmem:[%s6721_s20 + $0x28] sm:$0xff]   ;;  %v6016_v22 = vld [vmem:[%s6721_s20 + $0x30] sm:$0xff]   ;;  %s2902_s26 = sadd.s32 6, %s8017_s18  ;;  %s3130_s27 = sadd.s32 7, %s8017_s18 }
  0x26   : > { %5603 = vmatpush3.bf16.msra.mxu0 %v5999_v4  ;;  %v6011_v17 = vld [vmem:[%s6716_s17 + $0x20] sm:$0xff]   ;;  %v6790_v23 = vld [vmem:[%s8342_s4 + $0x8] sm:$0xff]   ;;  %v6017_v25 = vld [vmem:[%s6716_s17 + $0x38] sm:$0xff]   ;;  %s3358_s29 = sadd.s32 8, %s8017_s18  ;;  %s4042_s13 = sadd.s32 11, %s8017_s18 }
  0x27   : > { %5639 = vmatpush3.bf16.msra.mxu1 %v6000_v5  ;;  %5672 = vmatprep.subr.bf16.mxu0 %v8353_v10  ;;  %v6012_v18 = vld [vmem:[%s6721_s20 + $0x20] sm:$0xff]   ;;  %v6797_v24 = vld [vmem:[%s8345_s7 + $0x8] sm:$0xff]   ;;  %v6018_v26 = vld [vmem:[%s6721_s20 + $0x38] sm:$0xff]   ;;  %s4498_s14 = sadd.s32 13, %s8017_s18 }
  0x28   : > { %5680 = vmatprep.subr.bf16.mxu1 %v8353_v10  ;;  %v6019_v27 = vld [vmem:[%s6716_s17 + $0x40] sm:$0xff]   ;;  %v6021_v29 = vld [vmem:[%s6716_s17 + $0x48] sm:$0xff]   ;;  %v6025_v31 = vld [vmem:[%s6716_s17 + $0x50] sm:$0xff]  }
  0x29   : > { %5605 = vmatmul.mubr.msk.bf16.vlgmr.msra.gmra.mrb[0].mxu0 %vm654_vm1, %v6003_v8  ;;  %v6020_v28 = vld [vmem:[%s6721_s20 + $0x40] sm:$0xff]   ;;  %v6022_v30 = vld [vmem:[%s6721_s20 + $0x48] sm:$0xff]   ;;  %v6026_v32 = vld [vmem:[%s6721_s20 + $0x50] sm:$0xff]  }
  0x2a   : > { %5641 = vmatmul.mubr.msk.bf16.vlgmr.msra.gmra.mrb[0].mxu1 %vm654_vm1, %v6004_v9  ;;  %5673 = vmatpush3.bf16.msra.mxu0 %v6756_v11  ;;  %v6027_v33 = vld [vmem:[%s6716_s17 + $0x58] sm:$0xff]   ;;  %v6029_v35 = vld [vmem:[%s6716_s17 + $0x60] sm:$0xff]   ;;  %v6031_v37 = vld [vmem:[%s6716_s17 + $0x68] sm:$0xff]  }
  0x2b   : > { %5681 = vmatpush3.bf16.msra.mxu1 %v6762_v12  ;;  %5608 = vmatprep.mubr.msk.bf16.mxu0 %vm654_vm1, %v6007_v13  ;;  %v6028_v34 = vld [vmem:[%s6721_s20 + $0x58] sm:$0xff]   ;;  %v6030_v36 = vld [vmem:[%s6721_s20 + $0x60] sm:$0xff]   ;;  %v6032_v38 = vld [vmem:[%s6721_s20 + $0x68] sm:$0xff]  }
  0x2c   : > { %5644 = vmatprep.mubr.msk.bf16.mxu1 %vm654_vm1, %v6008_v14  ;;  %5674 = vmatprep.subr.bf16.mxu0 %v8353_v10  ;;  %v6033_v39 = vld [vmem:[%s6716_s17 + $0x70] sm:$0xff]   ;;  %v6035_v41 = vld [vmem:[%s6716_s17 + $0x78] sm:$0xff]   ;;  %v1289_v43 = vld [vmem:[#allocation4] sm:$0xff]  ;;  %s3586_s17 = sadd.s32 9, %s8017_s18 }
  0x2d   : > { %5682 = vmatprep.subr.bf16.mxu1 %v8353_v10  ;;  %v6034_v40 = vld [vmem:[%s6721_s20 + $0x70] sm:$0xff]   ;;  %v6036_v42 = vld [vmem:[%s6721_s20 + $0x78] sm:$0xff]   ;;  %v1290_v44 = vld [vmem:[#allocation4 + $0x8] sm:$0xff]  ;;  %s3814_s20 = sadd.s32 10, %s8017_s18 }
  0x2e   : > { %5675 = vmatpush3.bf16.msra.mxu0 %v6790_v23  ;;  %v1293_v45 = vld [vmem:[#allocation6] sm:$0xff]  ;;  %v1294_v46 = vld [vmem:[#allocation6 + $0x8] sm:$0xff]  ;;  %v1303_v47 = vpack.c.bf16 %v1290_v44, %v1289_v43 }
  0x2f   : > { %5683 = vmatpush3.bf16.msra.mxu1 %v6797_v24  ;;  %5688 = vmatprep.subr.bf16.mxu0 %v8353_v10  ;;  %v1364_v48 = vpack.c.bf16 %v1294_v46, %v1293_v45  ;;  %v6861_v49 = vld [vmem:[%s8343_s5] ss:$0 sm:$0xff] }
  0x30   : > { %5696 = vmatprep.subr.bf16.mxu1 %v8353_v10  ;;  %v6866_v50 = vld [vmem:[%s8346_s8] ss:$0 sm:$0xff] }
  0x31   : > { %5609 = vmatmul.mubr.msk.bf16.gmra.mrb[4].mxu0 %vm654_vm1, %v6009_v15 }
  0x32   : > { %5645 = vmatmul.mubr.msk.bf16.gmra.mrb[4].mxu1 %vm654_vm1, %v6010_v16  ;;  %5612 = vmatprep.mubr.msk.bf16.mxu0 %vm654_vm1, %v6011_v17 }
  0x33   : > { %5648 = vmatprep.mubr.msk.bf16.mxu1 %vm654_vm1, %v6012_v18 }
  0x39   : > { %5613 = vmatmul.mubr.msk.bf16.gmra.mrb[8].mxu0 %vm654_vm1, %v6013_v19 }
  0x3a   : > { %5649 = vmatmul.mubr.msk.bf16.gmra.mrb[8].mxu1 %vm654_vm1, %v6014_v20  ;;  %5616 = vmatprep.mubr.msk.bf16.mxu0 %vm654_vm1, %v6015_v21 }
  0x3b   : > { %5652 = vmatprep.mubr.msk.bf16.mxu1 %vm654_vm1, %v6016_v22 }
  0x41   : > { %5617 = vmatmul.mubr.msk.bf16.gmra.mrb[12].mxu0 %vm654_vm1, %v6017_v25 }
  0x42   : > { %5653 = vmatmul.mubr.msk.bf16.gmra.mrb[12].mxu1 %vm654_vm1, %v6018_v26  ;;  %5620 = vmatprep.mubr.msk.bf16.mxu0 %vm654_vm1, %v6019_v27 }
  0x43   : > { %5656 = vmatprep.mubr.msk.bf16.mxu1 %vm654_vm1, %v6020_v28 }
  0x49   : > { %5621 = vmatmul.mubr.msk.bf16.gmra.mrb[16].mxu0 %vm654_vm1, %v6021_v29 }
  0x4a   : > { %5657 = vmatmul.mubr.msk.bf16.gmra.mrb[16].mxu1 %vm654_vm1, %v6022_v30  ;;  %5624 = vmatprep.mubr.msk.bf16.mxu0 %vm654_vm1, %v6025_v31 }
  0x4b   : > { %5660 = vmatprep.mubr.msk.bf16.mxu1 %vm654_vm1, %v6026_v32 }
  0x51   : > { %5625 = vmatmul.mubr.msk.bf16.gmra.mrb[20].mxu0 %vm654_vm1, %v6027_v33 }
  0x52   : > { %5661 = vmatmul.mubr.msk.bf16.gmra.mrb[20].mxu1 %vm654_vm1, %v6028_v34  ;;  %5628 = vmatprep.mubr.msk.bf16.mxu0 %vm654_vm1, %v6029_v35 }
  0x53   : > { %5664 = vmatprep.mubr.msk.bf16.mxu1 %vm654_vm1, %v6030_v36 }
  0x59   : > { %5629 = vmatmul.mubr.msk.bf16.gmra.mrb[24].mxu0 %vm654_vm1, %v6031_v37 }
  0x5a   : > { %5665 = vmatmul.mubr.msk.bf16.gmra.mrb[24].mxu1 %vm654_vm1, %v6032_v38  ;;  %5632 = vmatprep.mubr.msk.bf16.mxu0 %vm654_vm1, %v6033_v39 }
  0x5b   : > { %5668 = vmatprep.mubr.msk.bf16.mxu1 %vm654_vm1, %v6034_v40 }
  0x61   : > { %5633 = vmatmul.mubr.msk.bf16.gmra.mrb[28].mxu0 %vm654_vm1, %v6035_v41 }
  0x62   : > { %5669 = vmatmul.mubr.msk.bf16.gmra.mrb[28].mxu1 %vm654_vm1, %v6036_v42  ;;  %5676 = vmatprep.mubr.msk.bf16.mxu0 %vm6608_vm2, %v8353_v10 }
  0x63   : > { %5684 = vmatprep.mubr.msk.bf16.mxu1 %vm6608_vm2, %v8353_v10 }
  0x69   : > { %5677 = vmatmul.mubr.msk.bf16.vlgmr.msra.gmra.mrb[32].mxu0 %vm654_vm1, %v1303_v47 }
  0x6a   : > { %5685 = vmatmul.mubr.msk.bf16.vlgmr.msra.gmra.mrb[32].mxu1 %vm654_vm1, %v1364_v48  ;;  %5689 = vmatpush3.bf16.msra.mxu0 %v6756_v11 }
  0x6b   : > { %5690 = vmatprep.subr.bf16.mxu0 %v8353_v10  ;;  %5697 = vmatpush3.bf16.msra.mxu1 %v6762_v12 }
  0x6c   : > { %5692 = vmatprep.mubr.msk.bf16.mxu0 %vm6608_vm2, %v8353_v10  ;;  %5698 = vmatprep.subr.bf16.mxu1 %v8353_v10 }
  0x6d   : > { %5700 = vmatprep.mubr.msk.bf16.mxu1 %vm6608_vm2, %v8353_v10 }
  0x6e   : > { %5691 = vmatpush3.bf16.msra.mxu0 %v6790_v23 }
  0x6f   : > { %5699 = vmatpush3.bf16.msra.mxu1 %v6797_v24  ;;  %5704 = vmatprep.subr.bf16.mxu0 %v8353_v10 }
  0x70   : > { %5712 = vmatprep.subr.bf16.mxu1 %v8353_v10 }
  0xfc   : > { %v5606_v51 = vpop.f32.mrb[0].mxu0 }
  0xfd   : > { %v6869_v52 = vadd.f32 %v5606_v51, %v6861_v49  ;;  %v6871_v53 = vpop.f32.mrb[1].mxu0  ;;  %v5642_v54 = vpop.f32.mrb[0].mxu1 }
  0xfe   : > { %v5607_v55 = vpop.f32.mrb[2].mxu0  ;;  %v6874_v56 = vadd.f32 %v5642_v54, %v6866_v50  ;;  %v6876_v57 = vpop.f32.mrb[1].mxu1 }
  0xff   : > { %v6879_v58 = vadd.f32 %v5607_v55, %v6861_v49  ;;  %v6881_v59 = vpop.f32.mrb[3].mxu0  ;;  %v5643_v60 = vpop.f32.mrb[2].mxu1 }
 0x100   : > { %v6884_v61 = vadd.f32 %v5643_v60, %v6866_v50  ;;  %v6886_v62 = vpop.f32.mrb[3].mxu1 }
 0x104   : > { %v5610_v63 = vpop.f32.mrb[4].mxu0 }
 0x105   : > { %v6889_v0 = vadd.f32 %v5610_v63, %v6861_v49  ;;  %v753_v1 = vpop.f32.mrb[5].mxu0  ;;  %v5646_v2 = vpop.f32.mrb[4].mxu1 }
 0x106   : > { %v6892_v3 = vadd.f32 %v6861_v49, %v753_v1  ;;  %v5611_v4 = vpop.f32.mrb[6].mxu0  ;;  %v6895_v5 = vadd.f32 %v5646_v2, %v6866_v50  ;;  %v1129_v6 = vpop.f32.mrb[5].mxu1 }
 0x107   : > { %v6898_v7 = vadd.f32 %v5611_v4, %v6861_v49  ;;  %v756_v8 = vpop.f32.mrb[7].mxu0  ;;  %v6901_v9 = vadd.f32 %v6866_v50, %v1129_v6  ;;  %v5647_v13 = vpop.f32.mrb[6].mxu1 }
 0x108   : > { %v6904_v14 = vadd.f32 %v6861_v49, %v756_v8  ;;  %v6907_v15 = vadd.f32 %v5647_v13, %v6866_v50  ;;  %v1132_v16 = vpop.f32.mrb[7].mxu1 }
 0x109   : > { %v6910_v17 = vadd.f32 %v6866_v50, %v1132_v16 }
 0x10c   : > { %v5614_v18 = vpop.f32.mrb[8].mxu0 }
 0x10d   : > { %v6913_v19 = vadd.f32 %v5614_v18, %v6861_v49  ;;  %v769_v20 = vpop.f32.mrb[9].mxu0  ;;  %v5650_v21 = vpop.f32.mrb[8].mxu1 }
 0x10e   : > { %v6916_v22 = vadd.f32 %v6861_v49, %v769_v20  ;;  %v5615_v25 = vpop.f32.mrb[10].mxu0  ;;  %v6919_v26 = vadd.f32 %v5650_v21, %v6866_v50  ;;  %v1145_v27 = vpop.f32.mrb[9].mxu1 }
 0x10f   : > { %v6922_v28 = vadd.f32 %v5615_v25, %v6861_v49  ;;  %v772_v29 = vpop.f32.mrb[11].mxu0  ;;  %v6925_v30 = vadd.f32 %v6866_v50, %v1145_v27  ;;  %v5651_v31 = vpop.f32.mrb[10].mxu1 }
 0x110   : > { %v6928_v32 = vadd.f32 %v6861_v49, %v772_v29  ;;  %v6931_v33 = vadd.f32 %v5651_v31, %v6866_v50  ;;  %v1148_v34 = vpop.f32.mrb[11].mxu1 }
 0x111   : > { %v6934_v35 = vadd.f32 %v6866_v50, %v1148_v34 }
 0x114   : > { %v5618_v36 = vpop.f32.mrb[12].mxu0 }
 0x115   : > { %v6937_v37 = vadd.f32 %v5618_v36, %v6861_v49  ;;  %v785_v38 = vpop.f32.mrb[13].mxu0  ;;  %v5654_v39 = vpop.f32.mrb[12].mxu1 }
 0x116   : > { %v6940_v40 = vadd.f32 %v6861_v49, %v785_v38  ;;  %v5619_v41 = vpop.f32.mrb[14].mxu0  ;;  %v6943_v42 = vadd.f32 %v5654_v39, %v6866_v50  ;;  %v1161_v43 = vpop.f32.mrb[13].mxu1 }
 0x117   : > { %v6946_v44 = vadd.f32 %v5619_v41, %v6861_v49  ;;  %v788_v45 = vpop.f32.mrb[15].mxu0  ;;  %v6949_v46 = vadd.f32 %v6866_v50, %v1161_v43  ;;  %v5655_v47 = vpop.f32.mrb[14].mxu1 }
 0x118   : > { %v6952_v48 = vadd.f32 %v6861_v49, %v788_v45  ;;  %v6955_v51 = vadd.f32 %v5655_v47, %v6866_v50  ;;  %v1164_v54 = vpop.f32.mrb[15].mxu1 }
 0x119   : > { %v6958_v55 = vadd.f32 %v6866_v50, %v1164_v54 }
 0x11c   : > { %v5622_v60 = vpop.f32.mrb[16].mxu0 }
 0x11d   : > { %v6961_v63 = vadd.f32 %v5622_v60, %v6861_v49  ;;  %v801_v1 = vpop.f32.mrb[17].mxu0  ;;  %v5658_v2 = vpop.f32.mrb[16].mxu1 }
 0x11e   : > { %v6964_v4 = vadd.f32 %v6861_v49, %v801_v1  ;;  %v5623_v6 = vpop.f32.mrb[18].mxu0  ;;  %v6967_v8 = vadd.f32 %v5658_v2, %v6866_v50  ;;  %v1177_v13 = vpop.f32.mrb[17].mxu1 }
 0x11f   : > { %v6970_v16 = vadd.f32 %v5623_v6, %v6861_v49  ;;  %v804_v18 = vpop.f32.mrb[19].mxu0  ;;  %v6973_v20 = vadd.f32 %v6866_v50, %v1177_v13  ;;  %v5659_v21 = vpop.f32.mrb[18].mxu1 }
 0x120   : > { %v6976_v25 = vadd.f32 %v6861_v49, %v804_v18  ;;  %v6979_v27 = vadd.f32 %v5659_v21, %v6866_v50  ;;  %v1180_v29 = vpop.f32.mrb[19].mxu1 }
 0x121   : > { %v6982_v31 = vadd.f32 %v6866_v50, %v1180_v29 }
 0x124   : > { %v5626_v34 = vpop.f32.mrb[20].mxu0 }
 0x125   : > { %v6985_v36 = vadd.f32 %v5626_v34, %v6861_v49  ;;  %v817_v38 = vpop.f32.mrb[21].mxu0  ;;  %v5662_v39 = vpop.f32.mrb[20].mxu1 }
 0x126   : > { %v6988_v41 = vadd.f32 %v6861_v49, %v817_v38  ;;  %v5627_v43 = vpop.f32.mrb[22].mxu0  ;;  %v6991_v45 = vadd.f32 %v5662_v39, %v6866_v50  ;;  %v1193_v47 = vpop.f32.mrb[21].mxu1 }
 0x127   : > { %8377 = vst [vmem:[#allocation14_spill] sm:$0xff] %v6985_v36  ;;  %v6994_v54 = vadd.f32 %v5627_v43, %v6861_v49  ;;  %v820_v60 = vpop.f32.mrb[23].mxu0  ;;  %v6997_v1 = vadd.f32 %v6866_v50, %v1193_v47  ;;  %v5663_v2 = vpop.f32.mrb[22].mxu1 }
 0x128   : > { %8378 = vst [vmem:[#allocation15_spill] sm:$0xff] %v6991_v45  ;;  %v7000_v6 = vadd.f32 %v6861_v49, %v820_v60  ;;  %v7003_v13 = vadd.f32 %v5663_v2, %v6866_v50  ;;  %v1196_v18 = vpop.f32.mrb[23].mxu1 }
 0x129   : > { %8379 = vst [vmem:[#allocation16_spill] sm:$0xff] %v6994_v54  ;;  %v7006_v21 = vadd.f32 %v6866_v50, %v1196_v18 }
 0x12a   : > { %8380 = vst [vmem:[#allocation17_spill] sm:$0xff] %v7003_v13 }
 0x12b   : > { %8381 = vst [vmem:[#allocation18_spill] sm:$0xff] %v7006_v21 }
 0x12c   : > { %v5630_v29 = vpop.f32.mrb[24].mxu0 }
 0x12d   : > { %v7009_v34 = vadd.f32 %v5630_v29, %v6861_v49  ;;  %v833_v38 = vpop.f32.mrb[25].mxu0  ;;  %v5666_v39 = vpop.f32.mrb[24].mxu1 }
 0x12e   : > { %v7012_v43 = vadd.f32 %v6861_v49, %v833_v38  ;;  %v5631_v47 = vpop.f32.mrb[26].mxu0  ;;  %v7015_v60 = vadd.f32 %v5666_v39, %v6866_v50  ;;  %v1209_v10 = vpop.f32.mrb[25].mxu1 }
 0x12f   : > { %8382 = vst [vmem:[#allocation19_spill] sm:$0xff] %v7009_v34  ;;  %v7018_v2 = vadd.f32 %v5631_v47, %v6861_v49  ;;  %v836_v13 = vpop.f32.mrb[27].mxu0  ;;  %v7021_v18 = vadd.f32 %v6866_v50, %v1209_v10  ;;  %v5667_v45 = vpop.f32.mrb[26].mxu1 }
 0x130   : > { %8383 = vst [vmem:[#allocation20_spill] sm:$0xff] %v7012_v43  ;;  %8384 = vst [vmem:[#allocation21_spill] sm:$0xff] %v7015_v60  ;;  %v7024_v29 = vadd.f32 %v6861_v49, %v836_v13  ;;  %v7027_v34 = vadd.f32 %v5667_v45, %v6866_v50  ;;  %v1212_v38 = vpop.f32.mrb[27].mxu1 }
 0x131   : > { %8385 = vst [vmem:[#allocation22_spill] sm:$0xff] %v7018_v2  ;;  %8386 = vst [vmem:[#allocation23_spill] sm:$0xff] %v7021_v18  ;;  %v7030_v43 = vadd.f32 %v6866_v50, %v1212_v38 }
 0x132   : > { %8387 = vst [vmem:[#allocation24_spill] sm:$0xff] %v7024_v29  ;;  %8388 = vst [vmem:[#allocation25_spill] sm:$0xff] %v7027_v34 }
 0x133   : > { %8389 = vst [vmem:[#allocation26_spill] sm:$0xff] %v7030_v43 }
 0x134   : > { %v5634_v39 = vpop.f32.mrb[28].mxu0 }
 0x135   : > { %v7033_v60 = vadd.f32 %v5634_v39, %v6861_v49  ;;  %v849_v47 = vpop.f32.mrb[29].mxu0  ;;  %v5670_v2 = vpop.f32.mrb[28].mxu1 }
 0x136   : > { %v7036_v10 = vadd.f32 %v6861_v49, %v849_v47  ;;  %v5635_v18 = vpop.f32.mrb[30].mxu0  ;;  %v7039_v13 = vadd.f32 %v5670_v2, %v6866_v50  ;;  %v1225_v29 = vpop.f32.mrb[29].mxu1  ;;  %v738_v2 = vadd.f32 %v6861_v49, %v6871_v53 }
 0x137   : > { %8390 = vst [vmem:[#allocation27_spill] sm:$0xff] %v7033_v60  ;;  %v7042_v45 = vadd.f32 %v5635_v18, %v6861_v49  ;;  %v852_v34 = vpop.f32.mrb[31].mxu0  ;;  %v7045_v38 = vadd.f32 %v6866_v50, %v1225_v29  ;;  %v5671_v43 = vpop.f32.mrb[30].mxu1  ;;  %v1114_v18 = vadd.f32 %v6866_v50, %v6876_v57  ;;  %v741_v29 = vadd.f32 %v6861_v49, %v6881_v59 }
 0x138   : > { %8391 = vst [vmem:[#allocation28_spill] sm:$0xff] %v7036_v10  ;;  %8392 = vst [vmem:[#allocation29_spill] sm:$0xff] %v7039_v13  ;;  %v7048_v39 = vadd.f32 %v6861_v49, %v852_v34  ;;  %v7051_v60 = vadd.f32 %v5671_v43, %v6866_v50  ;;  %v1228_v47 = vpop.f32.mrb[31].mxu1  ;;  %v1117_v43 = vadd.f32 %v6866_v50, %v6886_v62  ;;  %v1291_v62 = vld [vmem:[#allocation5] sm:$0xff] }
 0x139   : > { %8393 = vst [vmem:[#allocation30_spill] sm:$0xff] %v7042_v45  ;;  %8394 = vst [vmem:[#allocation31_spill] sm:$0xff] %v7045_v38  ;;  %v7054_v10 = vadd.f32 %v6866_v50, %v1228_v47 }
 0x13a   : > { %8395 = vst [vmem:[#allocation32_spill] sm:$0xff] %v7048_v39  ;;  %8396 = vst [vmem:[#allocation33_spill] sm:$0xff] %v7051_v60 }
 0x13b   : > { %8397 = vst [vmem:[#allocation34_spill] sm:$0xff] %v7054_v10 }
 0x13c   : > { %v1353_v13 = vpop.f32.mrb[32].mxu0 }
 0x13d   : > { %v1360_v45 = vadd.f32 %v1353_v13, %v738_v2  ;;  %v1414_v34 = vpop.f32.mrb[32].mxu1  ;;  %v5678_v38 = vpop.f32.mrb[33].mxu0  ;;  %v1292_v13 = vld [vmem:[#allocation5 + $0x8] sm:$0xff] }
 0x13e   : > { %v1421_v60 = vadd.f32 %v1414_v34, %v1114_v18  ;;  %v5686_v39 = vpop.f32.mrb[33].mxu1  ;;  %v1356_v47 = vpop.f32.mrb[34].mxu0  ;;  %v1296_v38 = vld [vmem:[#allocation7 + $0x8] sm:$0xff] }
 0x13f   : > { %6037 = vtanh.f32 %v1360_v45  ;;  %v1361_v10 = vadd.f32 %v1356_v47, %v741_v29  ;;  %v1417_v54 = vpop.f32.mrb[34].mxu1  ;;  %v5679_v53 = vpop.f32.mrb[35].mxu0 }
 0x140   : > { %6039 = vtanh.f32 %v1421_v60  ;;  %v1422_v36 = vadd.f32 %v1417_v54, %v1117_v43  ;;  %v5687_v57 = vpop.f32.mrb[35].mxu1  ;;  %v1295_v54 = vld [vmem:[#allocation7] sm:$0xff]  ;;  %v5360_v39 = vmul.f32 -1.442695, %v1421_v60 }
 0x141   : > { %6041 = vtanh.f32 %v1361_v10  ;;  %v5359_v2 = vmul.f32 -1.442695, %v1361_v10 }
 0x142   : > { %6043 = vtanh.f32 %v1422_v36  ;;  %v5361_v18 = vmul.f32 -1.442695, %v1422_v36 }
 0x149   : > { %v6038_v21 = vpop.eup %6037 }
 0x14a   : > { %v6040_v49 = vpop.eup %6039  ;;  %1449 = vrot.lane.b32.xlu0 %v6038_v21, %s6609_s15  ;;  %v5358_v21 = vmul.f32 -1.442695, %v1360_v45 }
 0x14b   : > { %1505 = vrot.lane.b32.xlu1 %v6040_v49, %s6609_s15  ;;  %v6042_v50 = vpop.eup %6041 }
 0x14c   : > { %v6044_v59 = vpop.eup %6043  ;;  %6045 = vpow2.f32 %v5358_v21 }
 0x14d   : > { %6047 = vpow2.f32 %v5360_v39 }
 0x14e   : > { %1451 = vrot.lane.b32.xlu0 %v6042_v50, %s6609_s15  ;;  %6049 = vpow2.f32 %v5359_v2 }
 0x14f   : > { %1507 = vrot.lane.b32.xlu1 %v6044_v59, %s6609_s15  ;;  %6051 = vpow2.f32 %v5361_v18 }
 0x152   : > { %1439 = vrot.lane.b32.xlu0 %v1291_v62, %s6610_s16 }
 0x153   : > { %1441 = vrot.lane.b32.xlu1 %v1292_v13, %s6610_s16 }
 0x156   : > { %1495 = vrot.lane.b32.xlu0 %v1295_v54, %s6610_s16  ;;  %v6046_v29 = vpop.eup %6045 }
 0x157   : > { %1497 = vrot.lane.b32.xlu1 %v1296_v38, %s6610_s16  ;;  %v1429_v34 = vadd.f32 1.0, %v6046_v29  ;;  %v6048_v43 = vpop.eup %6047 }
 0x158   : > { %v6050_v47 = vpop.eup %6049  ;;  %v1485_v53 = vadd.f32 1.0, %v6048_v43 }
 0x159   : > { %6053 = vrcp.f32 %v1429_v34  ;;  %v1430_v57 = vadd.f32 1.0, %v6050_v47  ;;  %v6052_v49 = vpop.eup %6051 }
 0x15a   : > { %6055 = vrcp.f32 %v1485_v53  ;;  %v1486_v50 = vadd.f32 1.0, %v6052_v49 }
 0x15b   : > { %6057 = vrcp.f32 %v1430_v57 }
 0x15c   : > { %6059 = vrcp.f32 %v1486_v50 }
 0x163   : > { %v6054_v45 = vpop.eup %6053 }
 0x164   : > { %v6056_v36 = vpop.eup %6055 }
 0x165   : > { %v6058_v62 = vpop.eup %6057 }
 0x166   : > { %v6060_v39 = vpop.eup %6059 }
 0x1bc   : > { %v1450_v59 = vpop.permute.xlu0 %1449 }
 0x1bd   : > { %v1506_v60 = vpop.permute.xlu1 %1505  ;;  %v1455_v10 = vmul.f32 %v6054_v45, %v1450_v59 }
 0x1be   : > { %v1511_v13 = vmul.f32 %v6056_v36, %v1506_v60 }
 0x1bf   : > { %1459 = vrot.lane.b32.xlu0 %v1455_v10, %s6610_s16 }
 0x1c0   : > { %v1452_v54 = vpop.permute.xlu0 %1451 }
 0x1c1   : > { %v1456_v38 = vmul.f32 %v6058_v62, %v1452_v54  ;;  %v1508_v21 = vpop.permute.xlu1 %1507 }
 0x1c2   : > { %v1512_v2 = vmul.f32 %v6060_v39, %v1508_v21 }
 0x1c3   : > { %1515 = vrot.lane.b32.xlu0 %v1511_v13, %s6610_s16  ;;  %1461 = vrot.lane.b32.xlu1 %v1456_v38, %s6610_s16 }
 0x1c4   : > { %v1440_v18 = vpop.permute.xlu0 %1439 }
 0x1c5   : > { %v1442_v29 = vpop.permute.xlu1 %1441  ;;  %v1445_v43 = vmul.f32 %v6054_v45, %v1440_v18 }
 0x1c6   : > { %v1446_v50 = vmul.f32 %v6058_v62, %v1442_v29 }
 0x1c7   : > { %1517 = vrot.lane.b32.xlu1 %v1512_v2, %s6610_s16 }
 0x1c8   : > { %v1496_v34 = vpop.permute.xlu0 %1495 }
 0x1c9   : > { %v1498_v53 = vpop.permute.xlu1 %1497  ;;  %v1501_v49 = vmul.f32 %v6056_v36, %v1496_v34 }
 0x1ca   : > { %v1502_v54 = vmul.f32 %v6060_v39, %v1498_v53 }
 0x231   : > { %v1460_v47 = vpop.permute.xlu0 %1459 }
 0x232   : > { %v7076_v57 = vadd.f32 %v1460_v47, %v1445_v43 }
 0x234   : > { %6061 = vtanh.f32 %v7076_v57 }
 0x235   : > { %v1516_v59 = vpop.permute.xlu0 %1515  ;;  %v1462_v60 = vpop.permute.xlu1 %1461 }
 0x236   : > { %v7079_v10 = vadd.f32 %v1516_v59, %v1501_v49  ;;  %v7081_v13 = vadd.f32 %v1462_v60, %v1446_v50 }
 0x238   : > { %6063 = vtanh.f32 %v7079_v10 }
 0x239   : > { %6065 = vtanh.f32 %v7081_v13  ;;  %v1518_v38 = vpop.permute.xlu1 %1517 }
 0x23a   : > { %v7085_v21 = vadd.f32 %v1518_v38, %v1502_v54 }
 0x23c   : > { %6067 = vtanh.f32 %v7085_v21 }
 0x23e   : > { %v6062_v2 = vpop.eup %6061 }
 0x23f   : > { %1471 = vrot.lane.b32.xlu0 %v6062_v2, %s6609_s15 }
 0x242   : > { %v6064_v18 = vpop.eup %6063 }
 0x243   : > { %v6066_v29 = vpop.eup %6065  ;;  %1527 = vrot.lane.b32.xlu0 %v6064_v18, %s6609_s15 }
 0x244   : > { %1473 = vrot.lane.b32.xlu1 %v6066_v29, %s6609_s15 }
 0x246   : > { %v6068_v34 = vpop.eup %6067 }
 0x248   : > { %1529 = vrot.lane.b32.xlu1 %v6068_v34, %s6609_s15 }
 0x2b1   : > { %v1472_v43 = vpop.permute.xlu0 %1471 }
 0x2b2   : > { %v7092_v53 = vmul.f32 %v6054_v45, %v1472_v43 }
 0x2b5   : > { %v1528_v50 = vpop.permute.xlu0 %1527 }
 0x2b6   : > { %v1474_v47 = vpop.permute.xlu1 %1473  ;;  %v7098_v54 = vmul.f32 %v6056_v36, %v1528_v50 }
 0x2b7   : > { %v7094_v49 = vmul.f32 %v6058_v62, %v1474_v47  ;;  %v8399_v62 = vmov 0.0  }
 0x2b9   : > { %v1564_v59 = vpack.c.bf16 %v7094_v49, %v7092_v53 }
 0x2ba   : > { %v1530_v60 = vpop.permute.xlu1 %1529 }
 0x2bb   : > { %v7100_v38 = vmul.f32 %v6060_v39, %v1530_v60  ;;  %1566 = vrot.lane.b32.xlu0 %v1564_v59, %s6610_s16 }
 0x2bd   : > { %8398 = vst [vmem:[#allocation35_spill] sm:$0xff] %v7100_v38  ;;  %v1616_v2 = vpack.c.bf16 %v7100_v38, %v7098_v54 }
 0x2bf   : > { %1618 = vrot.lane.b32.xlu1 %v1616_v2, %s6610_s16 }
 0x32d   : > { %v1567_v45 = vpop.permute.xlu0 %1566 }
 0x32e   : > { %5693 = vmatmul.mubr.msk.bf16.vlgmr.msra.gmra.mrb[36].mxu0 %vm654_vm1, %v1567_v45 }
 0x32f   : > { %5705 = vmatpush3.bf16.msra.mxu0 %v6756_v11  ;;  %5708 = vmatprep.mubr.msk.bf16.mxu0 %vm6608_vm2, %v8399_v62 }
 0x330   : > { %5706 = vmatprep.subr.bf16.mxu0 %v8399_v62 }
 0x331   : > { %v1619_v36 = vpop.permute.xlu1 %1618 }
 0x332   : > { %5701 = vmatmul.mubr.msk.bf16.vlgmr.msra.gmra.mrb[36].mxu1 %vm654_vm1, %v1619_v36 }
 0x333   : > { %5707 = vmatpush3.bf16.msra.mxu0 %v6790_v23  ;;  %5713 = vmatpush3.bf16.msra.mxu1 %v6762_v12 }
 0x334   : > { %5714 = vmatprep.subr.bf16.mxu1 %v8399_v62  ;;  %5716 = vmatprep.mubr.msk.bf16.mxu1 %vm6608_vm2, %v8399_v62 }
 0x335   : > { %5720 = vmatprep.subr.bf16.mxu0 %v8399_v62 }
 0x337   : > { %5715 = vmatpush3.bf16.msra.mxu1 %v6797_v24 }
 0x338   : > { %5728 = vmatprep.subr.bf16.mxu1 %v8399_v62 }
 0x401   : > { %v1605_v39 = vpop.f32.mrb[36].mxu0 }
 0x402   : > { %v1612_v18 = vadd.f32 %v1605_v39, %v6869_v52  ;;  %v5694_v29 = vpop.f32.mrb[37].mxu0 }
 0x403   : > { %v1608_v34 = vpop.f32.mrb[38].mxu0 }
 0x404   : > { %6069 = vtanh.f32 %v1612_v18  ;;  %v1613_v43 = vadd.f32 %v1608_v34, %v6879_v58  ;;  %v5695_v47 = vpop.f32.mrb[39].mxu0 }
 0x405   : > { %v1657_v50 = vpop.f32.mrb[36].mxu1 }
 0x406   : > { %v1664_v59 = vadd.f32 %v1657_v50, %v6874_v56  ;;  %v5702_v60 = vpop.f32.mrb[37].mxu1  ;;  %6071 = vtanh.f32 %v1613_v43  ;;  %v5364_v56 = vmul.f32 -1.442695, %v1612_v18  ;;  %v5365_v29 = vmul.f32 -1.442695, %v1613_v43 }
 0x407   : > { %v1660_v2 = vpop.f32.mrb[38].mxu1 }
 0x408   : > { %v1665_v45 = vadd.f32 %v1660_v2, %v6884_v61  ;;  %v5703_v36 = vpop.f32.mrb[39].mxu1  ;;  %6073 = vtanh.f32 %v1664_v59  ;;  %v5366_v34 = vmul.f32 -1.442695, %v1664_v59 }
 0x40a   : > { %6075 = vtanh.f32 %v1665_v45  ;;  %v5367_v61 = vmul.f32 -1.442695, %v1665_v45 }
 0x40b   : > { %6077 = vpow2.f32 %v5364_v56 }
 0x40c   : > { %6079 = vpow2.f32 %v5365_v29 }
 0x40d   : > { %6081 = vpow2.f32 %v5366_v34 }
 0x40e   : > { %v6070_v38 = vpop.eup %6069  ;;  %6083 = vpow2.f32 %v5367_v61 }
 0x40f   : > { %1684 = vrot.lane.b32.xlu0 %v6070_v38, %s6609_s15 }
 0x410   : > { %v6072_v52 = vpop.eup %6071 }
 0x411   : > { %1686 = vrot.lane.b32.xlu1 %v6072_v52, %s6609_s15 }
 0x412   : > { %v6074_v39 = vpop.eup %6073 }
 0x413   : > { %1732 = vrot.lane.b32.xlu0 %v6074_v39, %s6609_s15 }
 0x414   : > { %v6076_v58 = vpop.eup %6075 }
 0x415   : > { %1734 = vrot.lane.b32.xlu1 %v6076_v58, %s6609_s15  ;;  %v6078_v47 = vpop.eup %6077 }
 0x416   : > { %v6080_v50 = vpop.eup %6079  ;;  %v1672_v38 = vadd.f32 1.0, %v6078_v47 }
 0x417   : > { %v6082_v60 = vpop.eup %6081  ;;  %v1673_v2 = vadd.f32 1.0, %v6080_v50 }
 0x418   : > { %v6084_v36 = vpop.eup %6083  ;;  %6085 = vrcp.f32 %v1672_v38  ;;  %v1720_v52 = vadd.f32 1.0, %v6082_v60 }
 0x419   : > { %6087 = vrcp.f32 %v1673_v2  ;;  %v1721_v39 = vadd.f32 1.0, %v6084_v36 }
 0x41a   : > { %6089 = vrcp.f32 %v1720_v52 }
 0x41b   : > { %6091 = vrcp.f32 %v1721_v39 }
 0x422   : > { %v6086_v18 = vpop.eup %6085 }
 0x423   : > { %v6088_v59 = vpop.eup %6087  ;;  %v1680_v60 = vmul.f32 %v6086_v18, %v7076_v57 }
 0x424   : > { %v6090_v29 = vpop.eup %6089  ;;  %v1681_v52 = vmul.f32 %v6088_v59, %v7081_v13 }
 0x425   : > { %v6092_v47 = vpop.eup %6091 }
 0x481   : > { %v1685_v43 = vpop.permute.xlu0 %1684 }
 0x482   : > { %v1690_v58 = vmul.f32 %v6086_v18, %v1685_v43 }
 0x483   : > { %v1687_v56 = vpop.permute.xlu1 %1686 }
 0x484   : > { %1694 = vrot.lane.b32.xlu0 %v1690_v58, %s6610_s16  ;;  %v1691_v45 = vmul.f32 %v6088_v59, %v1687_v56  ;;  %v1728_v58 = vmul.f32 %v6090_v29, %v7079_v10 }
 0x485   : > { %v1733_v34 = vpop.permute.xlu0 %1732 }
 0x486   : > { %v1738_v61 = vmul.f32 %v6090_v29, %v1733_v34  ;;  %1696 = vrot.lane.b32.xlu1 %v1691_v45, %s6610_s16  ;;  %v1729_v34 = vmul.f32 %v6092_v47, %v7085_v21 }
 0x487   : > { %v1735_v50 = vpop.permute.xlu1 %1734 }
 0x488   : > { %v1739_v38 = vmul.f32 %v6092_v47, %v1735_v50  ;;  %1742 = vrot.lane.b32.xlu0 %v1738_v61, %s6610_s16 }
 0x48a   : > { %1744 = vrot.lane.b32.xlu1 %v1739_v38, %s6610_s16 }
 0x4f6   : > { %v1695_v2 = vpop.permute.xlu0 %1694 }
 0x4f7   : > { %v7133_v36 = vadd.f32 %v1695_v2, %v1680_v60 }
 0x4f8   : > { %v1697_v39 = vpop.permute.xlu1 %1696 }
 0x4f9   : > { %6093 = vtanh.f32 %v7133_v36  ;;  %v7137_v43 = vadd.f32 %v1697_v39, %v1681_v52 }
 0x4fa   : > { %v1743_v56 = vpop.permute.xlu0 %1742 }
 0x4fb   : > { %6095 = vtanh.f32 %v7137_v43  ;;  %v7141_v45 = vadd.f32 %v1743_v56, %v1728_v58 }
 0x4fc   : > { %v1745_v57 = vpop.permute.xlu1 %1744 }
 0x4fd   : > { %6097 = vtanh.f32 %v7141_v45  ;;  %v7145_v61 = vadd.f32 %v1745_v57, %v1729_v34 }
 0x4ff   : > { %6099 = vtanh.f32 %v7145_v61 }
 0x503   : > { %v6094_v13 = vpop.eup %6093 }
 0x504   : > { %1706 = vrot.lane.b32.xlu0 %v6094_v13, %s6609_s15 }
 0x505   : > { %v6096_v50 = vpop.eup %6095 }
 0x506   : > { %1708 = vrot.lane.b32.xlu1 %v6096_v50, %s6609_s15 }
 0x507   : > { %v6098_v10 = vpop.eup %6097 }
 0x508   : > { %1754 = vrot.lane.b32.xlu0 %v6098_v10, %s6609_s15 }
 0x509   : > { %v6100_v38 = vpop.eup %6099 }
 0x50a   : > { %1756 = vrot.lane.b32.xlu1 %v6100_v38, %s6609_s15 }
 0x576   : > { %v1707_v21 = vpop.permute.xlu0 %1706 }
 0x577   : > { %v7152_v2 = vmul.f32 %v6086_v18, %v1707_v21 }
 0x578   : > { %v1709_v60 = vpop.permute.xlu1 %1708 }
 0x579   : > { %v7154_v52 = vmul.f32 %v6088_v59, %v1709_v60 }
 0x57a   : > { %v1755_v39 = vpop.permute.xlu0 %1754 }
 0x57b   : > { %v1792_v58 = vpack.c.bf16 %v7154_v52, %v7152_v2  ;;  %v7158_v34 = vmul.f32 %v6090_v29, %v1755_v39 }
 0x57c   : > { %v1757_v56 = vpop.permute.xlu1 %1756 }
 0x57d   : > { %v7160_v57 = vmul.f32 %v6092_v47, %v1757_v56  ;;  %1794 = vrot.lane.b32.xlu0 %v1792_v58, %s6610_s16 }
 0x57f   : > { %v1844_v13 = vpack.c.bf16 %v7160_v57, %v7158_v34 }
 0x581   : > { %1846 = vrot.lane.b32.xlu1 %v1844_v13, %s6610_s16 }
 0x5ef   : > { %v1795_v18 = vpop.permute.xlu0 %1794 }
 0x5f0   : > { %5709 = vmatmul.mubr.msk.bf16.vlgmr.msra.gmra.mrb[40].mxu0 %vm654_vm1, %v1795_v18 }
 0x5f1   : > { %5721 = vmatpush3.bf16.msra.mxu0 %v6756_v11  ;;  %5724 = vmatprep.mubr.msk.bf16.mxu0 %vm6608_vm2, %v8399_v62 }
 0x5f2   : > { %5722 = vmatprep.subr.bf16.mxu0 %v8399_v62 }
 0x5f3   : > { %v1847_v59 = vpop.permute.xlu1 %1846 }
 0x5f4   : > { %5717 = vmatmul.mubr.msk.bf16.vlgmr.msra.gmra.mrb[40].mxu1 %vm654_vm1, %v1847_v59 }
 0x5f5   : > { %5723 = vmatpush3.bf16.msra.mxu0 %v6790_v23  ;;  %5729 = vmatpush3.bf16.msra.mxu1 %v6762_v12 }
 0x5f6   : > { %5730 = vmatprep.subr.bf16.mxu1 %v8399_v62  ;;  %5732 = vmatprep.mubr.msk.bf16.mxu1 %vm6608_vm2, %v8399_v62 }
 0x5f7   : > { %5736 = vmatprep.subr.bf16.mxu0 %v8399_v62 }
 0x5f9   : > { %5731 = vmatpush3.bf16.msra.mxu1 %v6797_v24 }
 0x5fa   : > { %5744 = vmatprep.subr.bf16.mxu1 %v8399_v62 }
 0x6c3   : > { %v1833_v11 = vpop.f32.mrb[40].mxu0 }
 0x6c4   : > { %v1840_v29 = vadd.f32 %v1833_v11, %v6892_v3  ;;  %v5710_v47 = vpop.f32.mrb[41].mxu0 }
 0x6c5   : > { %v1836_v50 = vpop.f32.mrb[42].mxu0 }
 0x6c6   : > { %6101 = vtanh.f32 %v1840_v29  ;;  %v1841_v23 = vadd.f32 %v1836_v50, %v6904_v14  ;;  %v5711_v12 = vpop.f32.mrb[43].mxu0 }
 0x6c7   : > { %v1885_v10 = vpop.f32.mrb[40].mxu1 }
 0x6c8   : > { %v1892_v38 = vadd.f32 %v1885_v10, %v6901_v9  ;;  %v5718_v21 = vpop.f32.mrb[41].mxu1  ;;  %6103 = vtanh.f32 %v1841_v23  ;;  %v5370_v9 = vmul.f32 -1.442695, %v1840_v29  ;;  %v5371_v13 = vmul.f32 -1.442695, %v1841_v23 }
 0x6c9   : > { %v1888_v60 = vpop.f32.mrb[42].mxu1 }
 0x6ca   : > { %v1893_v39 = vadd.f32 %v1888_v60, %v6910_v17  ;;  %v5719_v24 = vpop.f32.mrb[43].mxu1  ;;  %6105 = vtanh.f32 %v1892_v38  ;;  %v5372_v18 = vmul.f32 -1.442695, %v1892_v38 }
 0x6cc   : > { %6107 = vtanh.f32 %v1893_v39  ;;  %v5373_v17 = vmul.f32 -1.442695, %v1893_v39 }
 0x6cd   : > { %6109 = vpow2.f32 %v5370_v9 }
 0x6ce   : > { %6111 = vpow2.f32 %v5371_v13 }
 0x6cf   : > { %6113 = vpow2.f32 %v5372_v18 }
 0x6d0   : > { %v6102_v58 = vpop.eup %6101  ;;  %6115 = vpow2.f32 %v5373_v17 }
 0x6d1   : > { %1912 = vrot.lane.b32.xlu0 %v6102_v58, %s6609_s15 }
 0x6d2   : > { %v6104_v3 = vpop.eup %6103 }
 0x6d3   : > { %1914 = vrot.lane.b32.xlu1 %v6104_v3, %s6609_s15 }
 0x6d4   : > { %v6106_v56 = vpop.eup %6105 }
 0x6d5   : > { %1960 = vrot.lane.b32.xlu0 %v6106_v56, %s6609_s15 }
 0x6d6   : > { %v6108_v14 = vpop.eup %6107 }
 0x6d7   : > { %1962 = vrot.lane.b32.xlu1 %v6108_v14, %s6609_s15  ;;  %v6110_v59 = vpop.eup %6109 }
 0x6d8   : > { %v6112_v11 = vpop.eup %6111  ;;  %v1900_v47 = vadd.f32 1.0, %v6110_v59 }
 0x6d9   : > { %v6114_v50 = vpop.eup %6113  ;;  %v1901_v12 = vadd.f32 1.0, %v6112_v11 }
 0x6da   : > { %v6116_v10 = vpop.eup %6115  ;;  %6117 = vrcp.f32 %v1900_v47  ;;  %v1948_v21 = vadd.f32 1.0, %v6114_v50 }
 0x6db   : > { %6119 = vrcp.f32 %v1901_v12  ;;  %v1949_v60 = vadd.f32 1.0, %v6116_v10 }
 0x6dc   : > { %6121 = vrcp.f32 %v1948_v21 }
 0x6dd   : > { %6123 = vrcp.f32 %v1949_v60 }
 0x6e4   : > { %v6118_v29 = vpop.eup %6117 }
 0x6e5   : > { %v6120_v38 = vpop.eup %6119  ;;  %v1908_v17 = vmul.f32 %v6118_v29, %v7133_v36 }
 0x6e6   : > { %v6122_v3 = vpop.eup %6121  ;;  %v1909_v47 = vmul.f32 %v6120_v38, %v7137_v43 }
 0x6e7   : > { %v6124_v9 = vpop.eup %6123  ;;  %v1956_v10 = vmul.f32 %v6122_v3, %v7141_v45 }
 0x743   : > { %v1913_v23 = vpop.permute.xlu0 %1912 }
 0x744   : > { %v1918_v24 = vmul.f32 %v6118_v29, %v1913_v23  ;;  %v1957_v23 = vmul.f32 %v6124_v9, %v7145_v61 }
 0x745   : > { %v1915_v58 = vpop.permute.xlu1 %1914 }
 0x746   : > { %1922 = vrot.lane.b32.xlu0 %v1918_v24, %s6610_s16  ;;  %v1919_v39 = vmul.f32 %v6120_v38, %v1915_v58 }
 0x747   : > { %v1961_v56 = vpop.permute.xlu0 %1960 }
 0x748   : > { %v1966_v14 = vmul.f32 %v6122_v3, %v1961_v56  ;;  %1924 = vrot.lane.b32.xlu1 %v1919_v39, %s6610_s16 }
 0x749   : > { %v1963_v13 = vpop.permute.xlu1 %1962 }
 0x74a   : > { %v1967_v18 = vmul.f32 %v6124_v9, %v1963_v13  ;;  %1970 = vrot.lane.b32.xlu0 %v1966_v14, %s6610_s16 }
 0x74c   : > { %1972 = vrot.lane.b32.xlu1 %v1967_v18, %s6610_s16 }
 0x7b8   : > { %v1923_v59 = vpop.permute.xlu0 %1922 }
 0x7b9   : > { %v7193_v11 = vadd.f32 %v1923_v59, %v1908_v17 }
 0x7ba   : > { %v1925_v50 = vpop.permute.xlu1 %1924 }
 0x7bb   : > { %6125 = vtanh.f32 %v7193_v11  ;;  %v7197_v12 = vadd.f32 %v1925_v50, %v1909_v47 }
 0x7bc   : > { %v1971_v21 = vpop.permute.xlu0 %1970 }
 0x7bd   : > { %6127 = vtanh.f32 %v7197_v12  ;;  %v7201_v60 = vadd.f32 %v1971_v21, %v1956_v10  ;;  %v7246_v21 = vld [vmem:[%s8345_s7] sm:$0xff]  }
 0x7be   : > { %v1973_v36 = vpop.permute.xlu1 %1972 }
 0x7bf   : > { %6129 = vtanh.f32 %v7201_v60  ;;  %v7205_v24 = vadd.f32 %v1973_v36, %v1957_v23  ;;  %v7256_v23 = vld [vmem:[%s8345_s7 + $0x8] sm:$0xff]  }
 0x7c1   : > { %6131 = vtanh.f32 %v7205_v24 }
 0x7c5   : > { %v6126_v43 = vpop.eup %6125 }
 0x7c6   : > { %1934 = vrot.lane.b32.xlu0 %v6126_v43, %s6609_s15 }
 0x7c7   : > { %v6128_v58 = vpop.eup %6127 }
 0x7c8   : > { %1936 = vrot.lane.b32.xlu1 %v6128_v58, %s6609_s15 }
 0x7c9   : > { %v6130_v45 = vpop.eup %6129 }
 0x7ca   : > { %1982 = vrot.lane.b32.xlu0 %v6130_v45, %s6609_s15 }
 0x7cb   : > { %v6132_v39 = vpop.eup %6131 }
 0x7cc   : > { %1984 = vrot.lane.b32.xlu1 %v6132_v39, %s6609_s15 }
 0x838   : > { %v1935_v61 = vpop.permute.xlu0 %1934 }
 0x839   : > { %v7212_v14 = vmul.f32 %v6118_v29, %v1935_v61 }
 0x83a   : > { %v1937_v56 = vpop.permute.xlu1 %1936 }
 0x83b   : > { %v7214_v13 = vmul.f32 %v6120_v38, %v1937_v56  ;;  %v7230_v38 = vld [vmem:[%s8342_s4] sm:$0xff]  }
 0x83c   : > { %v1983_v18 = vpop.permute.xlu0 %1982 }
 0x83d   : > { %v2020_v17 = vpack.c.bf16 %v7214_v13, %v7212_v14  ;;  %v7218_v47 = vmul.f32 %v6122_v3, %v1983_v18 }
 0x83e   : > { %v1985_v59 = vpop.permute.xlu1 %1984 }
 0x83f   : > { %v7220_v50 = vmul.f32 %v6124_v9, %v1985_v59  ;;  %2022 = vrot.lane.b32.xlu0 %v2020_v17, %s6610_s16  ;;  %v7240_v9 = vld [vmem:[%s8342_s4 + $0x8] sm:$0xff]  }
 0x841   : > { %v2072_v10 = vpack.c.bf16 %v7220_v50, %v7218_v47 }
 0x843   : > { %2074 = vrot.lane.b32.xlu1 %v2072_v10, %s6610_s16 }
 0x8b1   : > { %v2023_v29 = vpop.permute.xlu0 %2022 }
 0x8b2   : > { %5725 = vmatmul.mubr.msk.bf16.vlgmr.msra.gmra.mrb[44].mxu0 %vm654_vm1, %v2023_v29 }
 0x8b3   : > { %5737 = vmatpush3.bf16.msra.mxu0 %v7230_v38  ;;  %5740 = vmatprep.mubr.msk.bf16.mxu0 %vm6608_vm2, %v8399_v62 }
 0x8b4   : > { %5738 = vmatprep.subr.bf16.mxu0 %v8399_v62 }
 0x8b5   : > { %v2075_v3 = vpop.permute.xlu1 %2074 }
 0x8b6   : > { %5733 = vmatmul.mubr.msk.bf16.vlgmr.msra.gmra.mrb[44].mxu1 %vm654_vm1, %v2075_v3 }
 0x8b7   : > { %5739 = vmatpush3.bf16.msra.mxu0 %v7240_v9  ;;  %5745 = vmatpush3.bf16.msra.mxu1 %v7246_v21 }
 0x8b8   : > { %5746 = vmatprep.subr.bf16.mxu1 %v8399_v62  ;;  %5748 = vmatprep.mubr.msk.bf16.mxu1 %vm6608_vm2, %v8399_v62 }
 0x8b9   : > { %5752 = vmatprep.subr.bf16.mxu0 %v8399_v62 }
 0x8bb   : > { %5747 = vmatpush3.bf16.msra.mxu1 %v7256_v23 }
 0x8bc   : > { %5760 = vmatprep.subr.bf16.mxu1 %v8399_v62 }
 0x985   : > { %v2061_v36 = vpop.f32.mrb[44].mxu0 }
 0x986   : > { %v2068_v43 = vadd.f32 %v2061_v36, %v6889_v0  ;;  %v5726_v58 = vpop.f32.mrb[45].mxu0 }
 0x987   : > { %v2064_v45 = vpop.f32.mrb[46].mxu0 }
 0x988   : > { %6133 = vtanh.f32 %v2068_v43  ;;  %v2069_v39 = vadd.f32 %v2064_v45, %v6898_v7  ;;  %v5727_v61 = vpop.f32.mrb[47].mxu0 }
 0x989   : > { %v2113_v56 = vpop.f32.mrb[44].mxu1 }
 0x98a   : > { %v2120_v18 = vadd.f32 %v2113_v56, %v6895_v5  ;;  %v5734_v17 = vpop.f32.mrb[45].mxu1  ;;  %6135 = vtanh.f32 %v2069_v39  ;;  %v5376_v5 = vmul.f32 -1.442695, %v2068_v43  ;;  %v5377_v58 = vmul.f32 -1.442695, %v2069_v39 }
 0x98b   : > { %v2116_v59 = vpop.f32.mrb[46].mxu1 }
 0x98c   : > { %v2121_v10 = vadd.f32 %v2116_v59, %v6907_v15  ;;  %v5735_v29 = vpop.f32.mrb[47].mxu1  ;;  %6137 = vtanh.f32 %v2120_v18  ;;  %v5378_v45 = vmul.f32 -1.442695, %v2120_v18 }
 0x98e   : > { %6139 = vtanh.f32 %v2121_v10  ;;  %v5379_v15 = vmul.f32 -1.442695, %v2121_v10 }
 0x98f   : > { %6141 = vpow2.f32 %v5376_v5 }
 0x990   : > { %6143 = vpow2.f32 %v5377_v58 }
 0x991   : > { %6145 = vpow2.f32 %v5378_v45 }
 0x992   : > { %v6134_v3 = vpop.eup %6133  ;;  %6147 = vpow2.f32 %v5379_v15 }
 0x993   : > { %2140 = vrot.lane.b32.xlu0 %v6134_v3, %s6609_s15 }
 0x994   : > { %v6136_v0 = vpop.eup %6135 }
 0x995   : > { %2142 = vrot.lane.b32.xlu1 %v6136_v0, %s6609_s15 }
 0x996   : > { %v6138_v36 = vpop.eup %6137 }
 0x997   : > { %2188 = vrot.lane.b32.xlu0 %v6138_v36, %s6609_s15 }
 0x998   : > { %v6140_v7 = vpop.eup %6139 }
 0x999   : > { %2190 = vrot.lane.b32.xlu1 %v6140_v7, %s6609_s15  ;;  %v6142_v61 = vpop.eup %6141 }
 0x99a   : > { %v6144_v56 = vpop.eup %6143  ;;  %v2128_v17 = vadd.f32 1.0, %v6142_v61 }
 0x99b   : > { %v6146_v59 = vpop.eup %6145  ;;  %v2129_v29 = vadd.f32 1.0, %v6144_v56 }
 0x99c   : > { %v6148_v3 = vpop.eup %6147  ;;  %6149 = vrcp.f32 %v2128_v17  ;;  %v2176_v0 = vadd.f32 1.0, %v6146_v59 }
 0x99d   : > { %6151 = vrcp.f32 %v2129_v29  ;;  %v2177_v36 = vadd.f32 1.0, %v6148_v3 }
 0x99e   : > { %6153 = vrcp.f32 %v2176_v0 }
 0x99f   : > { %6155 = vrcp.f32 %v2177_v36 }
 0x9a6   : > { %v6150_v43 = vpop.eup %6149 }
 0x9a7   : > { %v6152_v18 = vpop.eup %6151  ;;  %v2136_v59 = vmul.f32 %v6150_v43, %v7193_v11 }
 0x9a8   : > { %v6154_v58 = vpop.eup %6153  ;;  %v2137_v0 = vmul.f32 %v6152_v18, %v7197_v12 }
 0x9a9   : > { %v6156_v61 = vpop.eup %6155 }
 0xa05   : > { %v2141_v39 = vpop.permute.xlu0 %2140 }
 0xa06   : > { %v2146_v7 = vmul.f32 %v6150_v43, %v2141_v39 }
 0xa07   : > { %v2143_v5 = vpop.permute.xlu1 %2142 }
 0xa08   : > { %2150 = vrot.lane.b32.xlu0 %v2146_v7, %s6610_s16  ;;  %v2147_v10 = vmul.f32 %v6152_v18, %v2143_v5  ;;  %v2184_v7 = vmul.f32 %v6154_v58, %v7201_v60 }
 0xa09   : > { %v2189_v45 = vpop.permute.xlu0 %2188 }
 0xa0a   : > { %v2194_v15 = vmul.f32 %v6154_v58, %v2189_v45  ;;  %2152 = vrot.lane.b32.xlu1 %v2147_v10, %s6610_s16  ;;  %v2185_v45 = vmul.f32 %v6156_v61, %v7205_v24 }
 0xa0b   : > { %v2191_v56 = vpop.permute.xlu1 %2190 }
 0xa0c   : > { %v2195_v17 = vmul.f32 %v6156_v61, %v2191_v56  ;;  %2198 = vrot.lane.b32.xlu0 %v2194_v15, %s6610_s16 }
 0xa0e   : > { %2200 = vrot.lane.b32.xlu1 %v2195_v17, %s6610_s16 }
 0xa7a   : > { %v2151_v29 = vpop.permute.xlu0 %2150 }
 0xa7b   : > { %v7273_v3 = vadd.f32 %v2151_v29, %v2136_v59 }
 0xa7c   : > { %v2153_v36 = vpop.permute.xlu1 %2152 }
 0xa7d   : > { %6157 = vtanh.f32 %v7273_v3  ;;  %v7277_v39 = vadd.f32 %v2153_v36, %v2137_v0 }
 0xa7e   : > { %v2199_v5 = vpop.permute.xlu0 %2198 }
 0xa7f   : > { %6159 = vtanh.f32 %v7277_v39  ;;  %v7281_v10 = vadd.f32 %v2199_v5, %v2184_v7 }
 0xa80   : > { %v2201_v11 = vpop.permute.xlu1 %2200 }
 0xa81   : > { %6161 = vtanh.f32 %v7281_v10  ;;  %v7285_v15 = vadd.f32 %v2201_v11, %v2185_v45 }
 0xa83   : > { %6163 = vtanh.f32 %v7285_v15 }
 0xa87   : > { %v6158_v12 = vpop.eup %6157 }
 0xa88   : > { %2162 = vrot.lane.b32.xlu0 %v6158_v12, %s6609_s15 }
 0xa89   : > { %v6160_v56 = vpop.eup %6159 }
 0xa8a   : > { %2164 = vrot.lane.b32.xlu1 %v6160_v56, %s6609_s15 }
 0xa8b   : > { %v6162_v60 = vpop.eup %6161 }
 0xa8c   : > { %2210 = vrot.lane.b32.xlu0 %v6162_v60, %s6609_s15 }
 0xa8d   : > { %v6164_v17 = vpop.eup %6163 }
 0xa8e   : > { %2212 = vrot.lane.b32.xlu1 %v6164_v17, %s6609_s15 }
 0xafa   : > { %v2163_v24 = vpop.permute.xlu0 %2162 }
 0xafb   : > { %v7292_v29 = vmul.f32 %v6150_v43, %v2163_v24 }
 0xafc   : > { %v2165_v59 = vpop.permute.xlu1 %2164 }
 0xafd   : > { %v7294_v0 = vmul.f32 %v6152_v18, %v2165_v59 }
 0xafe   : > { %v2211_v36 = vpop.permute.xlu0 %2210 }
 0xaff   : > { %v2248_v7 = vpack.c.bf16 %v7294_v0, %v7292_v29  ;;  %v7298_v45 = vmul.f32 %v6154_v58, %v2211_v36 }
 0xb00   : > { %v2213_v5 = vpop.permute.xlu1 %2212 }
 0xb01   : > { %v7300_v11 = vmul.f32 %v6156_v61, %v2213_v5  ;;  %2250 = vrot.lane.b32.xlu0 %v2248_v7, %s6610_s16 }
 0xb03   : > { %v2300_v12 = vpack.c.bf16 %v7300_v11, %v7298_v45 }
 0xb05   : > { %2302 = vrot.lane.b32.xlu1 %v2300_v12, %s6610_s16 }
 0xb73   : > { %v2251_v43 = vpop.permute.xlu0 %2250 }
 0xb74   : > { %5741 = vmatmul.mubr.msk.bf16.vlgmr.msra.gmra.mrb[48].mxu0 %vm654_vm1, %v2251_v43 }
 0xb75   : > { %5753 = vmatpush3.bf16.msra.mxu0 %v7230_v38  ;;  %5756 = vmatprep.mubr.msk.bf16.mxu0 %vm6608_vm2, %v8399_v62 }
 0xb76   : > { %5754 = vmatprep.subr.bf16.mxu0 %v8399_v62 }
 0xb77   : > { %v2303_v18 = vpop.permute.xlu1 %2302 }
 0xb78   : > { %5749 = vmatmul.mubr.msk.bf16.vlgmr.msra.gmra.mrb[48].mxu1 %vm654_vm1, %v2303_v18 }
 0xb79   : > { %5755 = vmatpush3.bf16.msra.mxu0 %v7240_v9  ;;  %5761 = vmatpush3.bf16.msra.mxu1 %v7246_v21 }
 0xb7a   : > { %5762 = vmatprep.subr.bf16.mxu1 %v8399_v62  ;;  %5764 = vmatprep.mubr.msk.bf16.mxu1 %vm6608_vm2, %v8399_v62 }
 0xb7b   : > { %5768 = vmatprep.subr.bf16.mxu0 %v8399_v62 }
 0xb7d   : > { %5763 = vmatpush3.bf16.msra.mxu1 %v7256_v23 }
 0xb7e   : > { %5776 = vmatprep.subr.bf16.mxu1 %v8399_v62 }
 0xc47   : > { %v2289_v58 = vpop.f32.mrb[48].mxu0 }
 0xc48   : > { %v2296_v61 = vadd.f32 %v2289_v58, %v6916_v22  ;;  %v5742_v56 = vpop.f32.mrb[49].mxu0 }
 0xc49   : > { %v2292_v60 = vpop.f32.mrb[50].mxu0 }
 0xc4a   : > { %6165 = vtanh.f32 %v2296_v61  ;;  %v2297_v17 = vadd.f32 %v2292_v60, %v6928_v32  ;;  %v5743_v24 = vpop.f32.mrb[51].mxu0 }
 0xc4b   : > { %v2341_v59 = vpop.f32.mrb[48].mxu1 }
 0xc4c   : > { %v2348_v36 = vadd.f32 %v2341_v59, %v6925_v30  ;;  %v5750_v7 = vpop.f32.mrb[49].mxu1  ;;  %6167 = vtanh.f32 %v2297_v17  ;;  %v5382_v30 = vmul.f32 -1.442695, %v2296_v61  ;;  %v5383_v56 = vmul.f32 -1.442695, %v2297_v17 }
 0xc4d   : > { %v2344_v5 = vpop.f32.mrb[50].mxu1 }
 0xc4e   : > { %v2349_v12 = vadd.f32 %v2344_v5, %v6934_v35  ;;  %v5751_v43 = vpop.f32.mrb[51].mxu1  ;;  %6169 = vtanh.f32 %v2348_v36  ;;  %v5384_v60 = vmul.f32 -1.442695, %v2348_v36 }
 0xc50   : > { %6171 = vtanh.f32 %v2349_v12  ;;  %v5385_v35 = vmul.f32 -1.442695, %v2349_v12 }
 0xc51   : > { %6173 = vpow2.f32 %v5382_v30 }
 0xc52   : > { %6175 = vpow2.f32 %v5383_v56 }
 0xc53   : > { %6177 = vpow2.f32 %v5384_v60 }
 0xc54   : > { %v6166_v18 = vpop.eup %6165  ;;  %6179 = vpow2.f32 %v5385_v35 }
 0xc55   : > { %2368 = vrot.lane.b32.xlu0 %v6166_v18, %s6609_s15 }
 0xc56   : > { %v6168_v22 = vpop.eup %6167 }
 0xc57   : > { %2370 = vrot.lane.b32.xlu1 %v6168_v22, %s6609_s15 }
 0xc58   : > { %v6170_v58 = vpop.eup %6169 }
 0xc59   : > { %2416 = vrot.lane.b32.xlu0 %v6170_v58, %s6609_s15 }
 0xc5a   : > { %v6172_v32 = vpop.eup %6171 }
 0xc5b   : > { %2418 = vrot.lane.b32.xlu1 %v6172_v32, %s6609_s15  ;;  %v6174_v24 = vpop.eup %6173 }
 0xc5c   : > { %v6176_v59 = vpop.eup %6175  ;;  %v2356_v7 = vadd.f32 1.0, %v6174_v24 }
 0xc5d   : > { %v6178_v5 = vpop.eup %6177  ;;  %v2357_v43 = vadd.f32 1.0, %v6176_v59 }
 0xc5e   : > { %v6180_v18 = vpop.eup %6179  ;;  %6181 = vrcp.f32 %v2356_v7  ;;  %v2404_v22 = vadd.f32 1.0, %v6178_v5 }
 0xc5f   : > { %6183 = vrcp.f32 %v2357_v43  ;;  %v2405_v58 = vadd.f32 1.0, %v6180_v18 }
 0xc60   : > { %6185 = vrcp.f32 %v2404_v22 }
 0xc61   : > { %6187 = vrcp.f32 %v2405_v58 }
 0xc68   : > { %v6182_v61 = vpop.eup %6181 }
 0xc69   : > { %v6184_v36 = vpop.eup %6183  ;;  %v2364_v5 = vmul.f32 %v6182_v61, %v7273_v3 }
 0xc6a   : > { %v6186_v56 = vpop.eup %6185  ;;  %v2365_v22 = vmul.f32 %v6184_v36, %v7277_v39 }
 0xc6b   : > { %v6188_v24 = vpop.eup %6187 }
 0xcc7   : > { %v2369_v17 = vpop.permute.xlu0 %2368 }
 0xcc8   : > { %v2374_v32 = vmul.f32 %v6182_v61, %v2369_v17 }
 0xcc9   : > { %v2371_v30 = vpop.permute.xlu1 %2370 }
 0xcca   : > { %2378 = vrot.lane.b32.xlu0 %v2374_v32, %s6610_s16  ;;  %v2375_v12 = vmul.f32 %v6184_v36, %v2371_v30  ;;  %v2412_v32 = vmul.f32 %v6186_v56, %v7281_v10 }
 0xccb   : > { %v2417_v60 = vpop.permute.xlu0 %2416 }
 0xccc   : > { %v2422_v35 = vmul.f32 %v6186_v56, %v2417_v60  ;;  %2380 = vrot.lane.b32.xlu1 %v2375_v12, %s6610_s16  ;;  %v2413_v60 = vmul.f32 %v6188_v24, %v7285_v15 }
 0xccd   : > { %v2419_v59 = vpop.permute.xlu1 %2418 }
 0xcce   : > { %v2423_v7 = vmul.f32 %v6188_v24, %v2419_v59  ;;  %2426 = vrot.lane.b32.xlu0 %v2422_v35, %s6610_s16 }
 0xcd0   : > { %2428 = vrot.lane.b32.xlu1 %v2423_v7, %s6610_s16 }
 0xd3c   : > { %v2379_v43 = vpop.permute.xlu0 %2378 }
 0xd3d   : > { %v7333_v18 = vadd.f32 %v2379_v43, %v2364_v5 }
 0xd3e   : > { %v2381_v58 = vpop.permute.xlu1 %2380 }
 0xd3f   : > { %6189 = vtanh.f32 %v7333_v18  ;;  %v7337_v17 = vadd.f32 %v2381_v58, %v2365_v22 }
 0xd40   : > { %v2427_v30 = vpop.permute.xlu0 %2426 }
 0xd41   : > { %6191 = vtanh.f32 %v7337_v17  ;;  %v7341_v12 = vadd.f32 %v2427_v30, %v2412_v32 }
 0xd42   : > { %v2429_v3 = vpop.permute.xlu1 %2428 }
 0xd43   : > { %6193 = vtanh.f32 %v7341_v12  ;;  %v7345_v35 = vadd.f32 %v2429_v3, %v2413_v60 }
 0xd45   : > { %6195 = vtanh.f32 %v7345_v35 }
 0xd49   : > { %v6190_v39 = vpop.eup %6189 }
 0xd4a   : > { %2390 = vrot.lane.b32.xlu0 %v6190_v39, %s6609_s15 }
 0xd4b   : > { %v6192_v59 = vpop.eup %6191 }
 0xd4c   : > { %2392 = vrot.lane.b32.xlu1 %v6192_v59, %s6609_s15 }
 0xd4d   : > { %v6194_v10 = vpop.eup %6193 }
 0xd4e   : > { %2438 = vrot.lane.b32.xlu0 %v6194_v10, %s6609_s15 }
 0xd4f   : > { %v6196_v7 = vpop.eup %6195 }
 0xd50   : > { %2440 = vrot.lane.b32.xlu1 %v6196_v7, %s6609_s15 }
 0xdbc   : > { %v2391_v15 = vpop.permute.xlu0 %2390 }
 0xdbd   : > { %v7352_v43 = vmul.f32 %v6182_v61, %v2391_v15 }
 0xdbe   : > { %v2393_v5 = vpop.permute.xlu1 %2392 }
 0xdbf   : > { %v7354_v22 = vmul.f32 %v6184_v36, %v2393_v5 }
 0xdc0   : > { %v2439_v58 = vpop.permute.xlu0 %2438 }
 0xdc1   : > { %v2476_v32 = vpack.c.bf16 %v7354_v22, %v7352_v43  ;;  %v7358_v60 = vmul.f32 %v6186_v56, %v2439_v58 }
 0xdc2   : > { %v2441_v30 = vpop.permute.xlu1 %2440 }
 0xdc3   : > { %v7360_v3 = vmul.f32 %v6188_v24, %v2441_v30  ;;  %2478 = vrot.lane.b32.xlu0 %v2476_v32, %s6610_s16 }
 0xdc5   : > { %v2528_v39 = vpack.c.bf16 %v7360_v3, %v7358_v60 }
 0xdc7   : > { %2530 = vrot.lane.b32.xlu1 %v2528_v39, %s6610_s16 }
 0xe35   : > { %v2479_v61 = vpop.permute.xlu0 %2478 }
 0xe36   : > { %5757 = vmatmul.mubr.msk.bf16.vlgmr.msra.gmra.mrb[52].mxu0 %vm654_vm1, %v2479_v61 }
 0xe37   : > { %5769 = vmatpush3.bf16.msra.mxu0 %v7230_v38  ;;  %5772 = vmatprep.mubr.msk.bf16.mxu0 %vm6608_vm2, %v8399_v62 }
 0xe38   : > { %5770 = vmatprep.subr.bf16.mxu0 %v8399_v62 }
 0xe39   : > { %v2531_v36 = vpop.permute.xlu1 %2530 }
 0xe3a   : > { %5765 = vmatmul.mubr.msk.bf16.vlgmr.msra.gmra.mrb[52].mxu1 %vm654_vm1, %v2531_v36 }
 0xe3b   : > { %5771 = vmatpush3.bf16.msra.mxu0 %v7240_v9  ;;  %5777 = vmatpush3.bf16.msra.mxu1 %v7246_v21 }
 0xe3c   : > { %5778 = vmatprep.subr.bf16.mxu1 %v8399_v62  ;;  %5780 = vmatprep.mubr.msk.bf16.mxu1 %vm6608_vm2, %v8399_v62 }
 0xe3d   : > { %5784 = vmatprep.subr.bf16.mxu0 %v8399_v62 }
 0xe3f   : > { %5779 = vmatpush3.bf16.msra.mxu1 %v7256_v23 }
 0xe40   : > { %5792 = vmatprep.subr.bf16.mxu1 %v8399_v62 }
 0xf09   : > { %v2517_v56 = vpop.f32.mrb[52].mxu0 }
 0xf0a   : > { %v2524_v24 = vadd.f32 %v2517_v56, %v6913_v19  ;;  %v5758_v59 = vpop.f32.mrb[53].mxu0 }
 0xf0b   : > { %v2520_v10 = vpop.f32.mrb[54].mxu0 }
 0xf0c   : > { %6197 = vtanh.f32 %v2524_v24  ;;  %v2525_v7 = vadd.f32 %v2520_v10, %v6922_v28  ;;  %v5759_v15 = vpop.f32.mrb[55].mxu0 }
 0xf0d   : > { %v2569_v5 = vpop.f32.mrb[52].mxu1 }
 0xf0e   : > { %v2576_v58 = vadd.f32 %v2569_v5, %v6919_v26  ;;  %v5766_v32 = vpop.f32.mrb[53].mxu1  ;;  %6199 = vtanh.f32 %v2525_v7  ;;  %v5388_v26 = vmul.f32 -1.442695, %v2524_v24  ;;  %v5389_v59 = vmul.f32 -1.442695, %v2525_v7 }
 0xf0f   : > { %v2572_v30 = vpop.f32.mrb[54].mxu1 }
 0xf10   : > { %v2577_v39 = vadd.f32 %v2572_v30, %v6931_v33  ;;  %v5767_v61 = vpop.f32.mrb[55].mxu1  ;;  %6201 = vtanh.f32 %v2576_v58  ;;  %v5390_v10 = vmul.f32 -1.442695, %v2576_v58 }
 0xf12   : > { %6203 = vtanh.f32 %v2577_v39  ;;  %v5391_v33 = vmul.f32 -1.442695, %v2577_v39 }
 0xf13   : > { %6205 = vpow2.f32 %v5388_v26 }
 0xf14   : > { %6207 = vpow2.f32 %v5389_v59 }
 0xf15   : > { %6209 = vpow2.f32 %v5390_v10 }
 0xf16   : > { %v6198_v36 = vpop.eup %6197  ;;  %6211 = vpow2.f32 %v5391_v33 }
 0xf17   : > { %2596 = vrot.lane.b32.xlu0 %v6198_v36, %s6609_s15 }
 0xf18   : > { %v6200_v19 = vpop.eup %6199 }
 0xf19   : > { %2598 = vrot.lane.b32.xlu1 %v6200_v19, %s6609_s15 }
 0xf1a   : > { %v6202_v56 = vpop.eup %6201 }
 0xf1b   : > { %2644 = vrot.lane.b32.xlu0 %v6202_v56, %s6609_s15 }
 0xf1c   : > { %v6204_v28 = vpop.eup %6203 }
 0xf1d   : > { %2646 = vrot.lane.b32.xlu1 %v6204_v28, %s6609_s15  ;;  %v6206_v15 = vpop.eup %6205 }
 0xf1e   : > { %v6208_v5 = vpop.eup %6207  ;;  %v2584_v32 = vadd.f32 1.0, %v6206_v15 }
 0xf1f   : > { %v6210_v30 = vpop.eup %6209  ;;  %v2585_v61 = vadd.f32 1.0, %v6208_v5 }
 0xf20   : > { %v6212_v36 = vpop.eup %6211  ;;  %6213 = vrcp.f32 %v2584_v32  ;;  %v2632_v19 = vadd.f32 1.0, %v6210_v30 }
 0xf21   : > { %6215 = vrcp.f32 %v2585_v61  ;;  %v2633_v56 = vadd.f32 1.0, %v6212_v36 }
 0xf22   : > { %6217 = vrcp.f32 %v2632_v19 }
 0xf23   : > { %6219 = vrcp.f32 %v2633_v56 }
 0xf2a   : > { %v6214_v24 = vpop.eup %6213 }
 0xf2b   : > { %v6216_v58 = vpop.eup %6215  ;;  %v2592_v30 = vmul.f32 %v6214_v24, %v7333_v18 }
 0xf2c   : > { %v6218_v59 = vpop.eup %6217  ;;  %v2593_v19 = vmul.f32 %v6216_v58, %v7337_v17 }
 0xf2d   : > { %v6220_v15 = vpop.eup %6219 }
 0xf89   : > { %v2597_v7 = vpop.permute.xlu0 %2596 }
 0xf8a   : > { %v2602_v28 = vmul.f32 %v6214_v24, %v2597_v7 }
 0xf8b   : > { %v2599_v26 = vpop.permute.xlu1 %2598 }
 0xf8c   : > { %2606 = vrot.lane.b32.xlu0 %v2602_v28, %s6610_s16  ;;  %v2603_v39 = vmul.f32 %v6216_v58, %v2599_v26  ;;  %v2640_v28 = vmul.f32 %v6218_v59, %v7341_v12 }
 0xf8d   : > { %v2645_v10 = vpop.permute.xlu0 %2644 }
 0xf8e   : > { %v2650_v33 = vmul.f32 %v6218_v59, %v2645_v10  ;;  %2608 = vrot.lane.b32.xlu1 %v2603_v39, %s6610_s16  ;;  %v2641_v10 = vmul.f32 %v6220_v15, %v7345_v35 }
 0xf8f   : > { %v2647_v5 = vpop.permute.xlu1 %2646 }
 0xf90   : > { %v2651_v32 = vmul.f32 %v6220_v15, %v2647_v5  ;;  %2654 = vrot.lane.b32.xlu0 %v2650_v33, %s6610_s16 }
 0xf92   : > { %2656 = vrot.lane.b32.xlu1 %v2651_v32, %s6610_s16 }
 0xffe   : > { %v2607_v61 = vpop.permute.xlu0 %2606 }
 0xfff   : > { %v7393_v36 = vadd.f32 %v2607_v61, %v2592_v30 }
0x1000   : > { %v2609_v56 = vpop.permute.xlu1 %2608 }
0x1001   : > { %6221 = vtanh.f32 %v7393_v36  ;;  %v7397_v7 = vadd.f32 %v2609_v56, %v2593_v19 }
0x1002   : > { %v2655_v26 = vpop.permute.xlu0 %2654 }
0x1003   : > { %6223 = vtanh.f32 %v7397_v7  ;;  %v7401_v39 = vadd.f32 %v2655_v26, %v2640_v28 }
0x1004   : > { %v2657_v18 = vpop.permute.xlu1 %2656 }
0x1005   : > { %6225 = vtanh.f32 %v7401_v39  ;;  %v7405_v33 = vadd.f32 %v2657_v18, %v2641_v10 }
0x1007   : > { %6227 = vtanh.f32 %v7405_v33 }
0x100b   : > { %v6222_v17 = vpop.eup %6221 }
0x100c   : > { %2618 = vrot.lane.b32.xlu0 %v6222_v17, %s6609_s15 }
0x100d   : > { %v6224_v5 = vpop.eup %6223 }
0x100e   : > { %2620 = vrot.lane.b32.xlu1 %v6224_v5, %s6609_s15 }
0x100f   : > { %v6226_v12 = vpop.eup %6225 }
0x1010   : > { %2666 = vrot.lane.b32.xlu0 %v6226_v12, %s6609_s15 }
0x1011   : > { %v6228_v32 = vpop.eup %6227 }
0x1012   : > { %2668 = vrot.lane.b32.xlu1 %v6228_v32, %s6609_s15 }
0x107e   : > { %v2619_v35 = vpop.permute.xlu0 %2618 }
0x107f   : > { %v7412_v61 = vmul.f32 %v6214_v24, %v2619_v35 }
0x1080   : > { %v2621_v30 = vpop.permute.xlu1 %2620 }
0x1081   : > { %v7414_v19 = vmul.f32 %v6216_v58, %v2621_v30 }
0x1082   : > { %v2667_v56 = vpop.permute.xlu0 %2666 }
0x1083   : > { %v2704_v28 = vpack.c.bf16 %v7414_v19, %v7412_v61  ;;  %v7418_v10 = vmul.f32 %v6218_v59, %v2667_v56 }
0x1084   : > { %v2669_v26 = vpop.permute.xlu1 %2668 }
0x1085   : > { %v7420_v18 = vmul.f32 %v6220_v15, %v2669_v26  ;;  %2706 = vrot.lane.b32.xlu0 %v2704_v28, %s6610_s16 }
0x1087   : > { %v2756_v17 = vpack.c.bf16 %v7420_v18, %v7418_v10 }
0x1089   : > { %2758 = vrot.lane.b32.xlu1 %v2756_v17, %s6610_s16 }
0x10f7   : > { %v2707_v24 = vpop.permute.xlu0 %2706 }
0x10f8   : > { %5773 = vmatmul.mubr.msk.bf16.vlgmr.msra.gmra.mrb[56].mxu0 %vm654_vm1, %v2707_v24 }
0x10f9   : > { %5785 = vmatpush3.bf16.msra.mxu0 %v7230_v38  ;;  %5788 = vmatprep.mubr.msk.bf16.mxu0 %vm6608_vm2, %v8399_v62 }
0x10fa   : > { %5786 = vmatprep.subr.bf16.mxu0 %v8399_v62 }
0x10fb   : > { %v2759_v58 = vpop.permute.xlu1 %2758 }
0x10fc   : > { %5781 = vmatmul.mubr.msk.bf16.vlgmr.msra.gmra.mrb[56].mxu1 %vm654_vm1, %v2759_v58 }
0x10fd   : > { %5787 = vmatpush3.bf16.msra.mxu0 %v7240_v9  ;;  %5793 = vmatpush3.bf16.msra.mxu1 %v7246_v21 }
0x10fe   : > { %5794 = vmatprep.subr.bf16.mxu1 %v8399_v62  ;;  %5796 = vmatprep.mubr.msk.bf16.mxu1 %vm6608_vm2, %v8399_v62 }
0x10ff   : > { %5800 = vmatprep.subr.bf16.mxu0 %v8399_v62 }
0x1101   : > { %5795 = vmatpush3.bf16.msra.mxu1 %v7256_v23 }
0x1102   : > { %5808 = vmatprep.subr.bf16.mxu1 %v8399_v62 }
0x11cb   : > { %v2745_v59 = vpop.f32.mrb[56].mxu0 }
0x11cc   : > { %v2752_v15 = vadd.f32 %v2745_v59, %v6940_v40  ;;  %v5774_v5 = vpop.f32.mrb[57].mxu0 }
0x11cd   : > { %v2748_v12 = vpop.f32.mrb[58].mxu0 }
0x11ce   : > { %6229 = vtanh.f32 %v2752_v15  ;;  %v2753_v32 = vadd.f32 %v2748_v12, %v6952_v48  ;;  %v5775_v35 = vpop.f32.mrb[59].mxu0 }
0x11cf   : > { %v2797_v30 = vpop.f32.mrb[56].mxu1 }
0x11d0   : > { %v2804_v56 = vadd.f32 %v2797_v30, %v6949_v46  ;;  %v5782_v28 = vpop.f32.mrb[57].mxu1  ;;  %6231 = vtanh.f32 %v2753_v32  ;;  %v5394_v46 = vmul.f32 -1.442695, %v2752_v15  ;;  %v5395_v5 = vmul.f32 -1.442695, %v2753_v32 }
0x11d1   : > { %v2800_v26 = vpop.f32.mrb[58].mxu1 }
0x11d2   : > { %v2805_v17 = vadd.f32 %v2800_v26, %v6958_v55  ;;  %v5783_v24 = vpop.f32.mrb[59].mxu1  ;;  %6233 = vtanh.f32 %v2804_v56  ;;  %v5396_v12 = vmul.f32 -1.442695, %v2804_v56 }
0x11d4   : > { %6235 = vtanh.f32 %v2805_v17  ;;  %v5397_v55 = vmul.f32 -1.442695, %v2805_v17 }
0x11d5   : > { %6237 = vpow2.f32 %v5394_v46 }
0x11d6   : > { %6239 = vpow2.f32 %v5395_v5 }
0x11d7   : > { %6241 = vpow2.f32 %v5396_v12 }
0x11d8   : > { %v6230_v58 = vpop.eup %6229  ;;  %6243 = vpow2.f32 %v5397_v55 }
0x11d9   : > { %2824 = vrot.lane.b32.xlu0 %v6230_v58, %s6609_s15 }
0x11da   : > { %v6232_v40 = vpop.eup %6231 }
0x11db   : > { %2826 = vrot.lane.b32.xlu1 %v6232_v40, %s6609_s15 }
0x11dc   : > { %v6234_v59 = vpop.eup %6233 }
0x11dd   : > { %2872 = vrot.lane.b32.xlu0 %v6234_v59, %s6609_s15 }
0x11de   : > { %v6236_v48 = vpop.eup %6235 }
0x11df   : > { %2874 = vrot.lane.b32.xlu1 %v6236_v48, %s6609_s15  ;;  %v6238_v35 = vpop.eup %6237 }
0x11e0   : > { %v6240_v30 = vpop.eup %6239  ;;  %v2812_v28 = vadd.f32 1.0, %v6238_v35 }
0x11e1   : > { %v6242_v26 = vpop.eup %6241  ;;  %v2813_v24 = vadd.f32 1.0, %v6240_v30 }
0x11e2   : > { %v6244_v58 = vpop.eup %6243  ;;  %6245 = vrcp.f32 %v2812_v28  ;;  %v2860_v40 = vadd.f32 1.0, %v6242_v26 }
0x11e3   : > { %6247 = vrcp.f32 %v2813_v24  ;;  %v2861_v59 = vadd.f32 1.0, %v6244_v58 }
0x11e4   : > { %6249 = vrcp.f32 %v2860_v40 }
0x11e5   : > { %6251 = vrcp.f32 %v2861_v59 }
0x11ec   : > { %v6246_v15 = vpop.eup %6245 }
0x11ed   : > { %v6248_v56 = vpop.eup %6247  ;;  %v2820_v26 = vmul.f32 %v6246_v15, %v7393_v36 }
0x11ee   : > { %v6250_v5 = vpop.eup %6249  ;;  %v2821_v40 = vmul.f32 %v6248_v56, %v7397_v7 }
0x11ef   : > { %v6252_v35 = vpop.eup %6251 }
0x124b   : > { %v2825_v32 = vpop.permute.xlu0 %2824 }
0x124c   : > { %v2830_v48 = vmul.f32 %v6246_v15, %v2825_v32 }
0x124d   : > { %v2827_v46 = vpop.permute.xlu1 %2826 }
0x124e   : > { %2834 = vrot.lane.b32.xlu0 %v2830_v48, %s6610_s16  ;;  %v2831_v17 = vmul.f32 %v6248_v56, %v2827_v46  ;;  %v2868_v48 = vmul.f32 %v6250_v5, %v7401_v39 }
0x124f   : > { %v2873_v12 = vpop.permute.xlu0 %2872 }
0x1250   : > { %v2878_v55 = vmul.f32 %v6250_v5, %v2873_v12  ;;  %2836 = vrot.lane.b32.xlu1 %v2831_v17, %s6610_s16  ;;  %v2869_v12 = vmul.f32 %v6252_v35, %v7405_v33 }
0x1251   : > { %v2875_v30 = vpop.permute.xlu1 %2874 }
0x1252   : > { %v2879_v28 = vmul.f32 %v6252_v35, %v2875_v30  ;;  %2882 = vrot.lane.b32.xlu0 %v2878_v55, %s6610_s16 }
0x1254   : > { %2884 = vrot.lane.b32.xlu1 %v2879_v28, %s6610_s16 }
0x12c0   : > { %v2835_v24 = vpop.permute.xlu0 %2834 }
0x12c1   : > { %v7453_v58 = vadd.f32 %v2835_v24, %v2820_v26 }
0x12c2   : > { %v2837_v59 = vpop.permute.xlu1 %2836 }
0x12c3   : > { %6253 = vtanh.f32 %v7453_v58  ;;  %v7457_v32 = vadd.f32 %v2837_v59, %v2821_v40 }
0x12c4   : > { %v2883_v46 = vpop.permute.xlu0 %2882 }
0x12c5   : > { %6255 = vtanh.f32 %v7457_v32  ;;  %v7461_v17 = vadd.f32 %v2883_v46, %v2868_v48 }
0x12c6   : > { %v2885_v36 = vpop.permute.xlu1 %2884 }
0x12c7   : > { %6257 = vtanh.f32 %v7461_v17  ;;  %v7465_v55 = vadd.f32 %v2885_v36, %v2869_v12 }
0x12c9   : > { %6259 = vtanh.f32 %v7465_v55 }
0x12cd   : > { %v6254_v7 = vpop.eup %6253 }
0x12ce   : > { %2846 = vrot.lane.b32.xlu0 %v6254_v7, %s6609_s15 }
0x12cf   : > { %v6256_v30 = vpop.eup %6255 }
0x12d0   : > { %2848 = vrot.lane.b32.xlu1 %v6256_v30, %s6609_s15 }
0x12d1   : > { %v6258_v39 = vpop.eup %6257 }
0x12d2   : > { %2894 = vrot.lane.b32.xlu0 %v6258_v39, %s6609_s15 }
0x12d3   : > { %v6260_v28 = vpop.eup %6259 }
0x12d4   : > { %2896 = vrot.lane.b32.xlu1 %v6260_v28, %s6609_s15 }
0x1340   : > { %v2847_v33 = vpop.permute.xlu0 %2846 }
0x1341   : > { %v7472_v24 = vmul.f32 %v6246_v15, %v2847_v33 }
0x1342   : > { %v2849_v26 = vpop.permute.xlu1 %2848 }
0x1343   : > { %v7474_v40 = vmul.f32 %v6248_v56, %v2849_v26 }
0x1344   : > { %v2895_v59 = vpop.permute.xlu0 %2894 }
0x1345   : > { %v2932_v48 = vpack.c.bf16 %v7474_v40, %v7472_v24  ;;  %v7478_v12 = vmul.f32 %v6250_v5, %v2895_v59 }
0x1346   : > { %v2897_v46 = vpop.permute.xlu1 %2896 }
0x1347   : > { %v7480_v36 = vmul.f32 %v6252_v35, %v2897_v46  ;;  %2934 = vrot.lane.b32.xlu0 %v2932_v48, %s6610_s16 }
0x1349   : > { %v2984_v7 = vpack.c.bf16 %v7480_v36, %v7478_v12 }
0x134b   : > { %2986 = vrot.lane.b32.xlu1 %v2984_v7, %s6610_s16 }
0x13b9   : > { %v2935_v15 = vpop.permute.xlu0 %2934 }
0x13ba   : > { %5789 = vmatmul.mubr.msk.bf16.vlgmr.msra.gmra.mrb[60].mxu0 %vm654_vm1, %v2935_v15 }
0x13bb   : > { %5801 = vmatpush3.bf16.msra.mxu0 %v7230_v38  ;;  %5804 = vmatprep.mubr.msk.bf16.mxu0 %vm6608_vm2, %v8399_v62 }
0x13bc   : > { %5802 = vmatprep.subr.bf16.mxu0 %v8399_v62 }
0x13bd   : > { %v2987_v56 = vpop.permute.xlu1 %2986 }
0x13be   : > { %5797 = vmatmul.mubr.msk.bf16.vlgmr.msra.gmra.mrb[60].mxu1 %vm654_vm1, %v2987_v56 }
0x13bf   : > { %5803 = vmatpush3.bf16.msra.mxu0 %v7240_v9  ;;  %5809 = vmatpush3.bf16.msra.mxu1 %v7246_v21 }
0x13c0   : > { %5810 = vmatprep.subr.bf16.mxu1 %v8399_v62  ;;  %5812 = vmatprep.mubr.msk.bf16.mxu1 %vm6608_vm2, %v8399_v62 }
0x13c1   : > { %5816 = vmatprep.subr.bf16.mxu0 %v8399_v62 }
0x13c3   : > { %5811 = vmatpush3.bf16.msra.mxu1 %v7256_v23 }
0x13c4   : > { %5824 = vmatprep.subr.bf16.mxu1 %v8399_v62 }
0x148d   : > { %v2973_v38 = vpop.f32.mrb[60].mxu0 }
0x148e   : > { %v2980_v5 = vadd.f32 %v2973_v38, %v6937_v37  ;;  %v5790_v35 = vpop.f32.mrb[61].mxu0 }
0x148f   : > { %v2976_v30 = vpop.f32.mrb[62].mxu0 }
0x1490   : > { %6261 = vtanh.f32 %v2980_v5  ;;  %v2981_v9 = vadd.f32 %v2976_v30, %v6946_v44  ;;  %v5791_v21 = vpop.f32.mrb[63].mxu0 }
0x1491   : > { %v3025_v39 = vpop.f32.mrb[60].mxu1 }
0x1492   : > { %v3032_v28 = vadd.f32 %v3025_v39, %v6943_v42  ;;  %v5798_v33 = vpop.f32.mrb[61].mxu1  ;;  %6263 = vtanh.f32 %v2981_v9  ;;  %v5400_v42 = vmul.f32 -1.442695, %v2980_v5  ;;  %v5401_v7 = vmul.f32 -1.442695, %v2981_v9 }
0x1493   : > { %v3028_v26 = vpop.f32.mrb[62].mxu1 }
0x1494   : > { %v3033_v59 = vadd.f32 %v3028_v26, %v6955_v51  ;;  %v5799_v23 = vpop.f32.mrb[63].mxu1  ;;  %6265 = vtanh.f32 %v3032_v28  ;;  %v5402_v15 = vmul.f32 -1.442695, %v3032_v28 }
0x1496   : > { %6267 = vtanh.f32 %v3033_v59  ;;  %v5403_v51 = vmul.f32 -1.442695, %v3033_v59 }
0x1497   : > { %6269 = vpow2.f32 %v5400_v42 }
0x1498   : > { %6271 = vpow2.f32 %v5401_v7 }
0x1499   : > { %6273 = vpow2.f32 %v5402_v15 }
0x149a   : > { %v6262_v48 = vpop.eup %6261  ;;  %6275 = vpow2.f32 %v5403_v51 }
0x149b   : > { %3052 = vrot.lane.b32.xlu0 %v6262_v48, %s6609_s15 }
0x149c   : > { %v6264_v37 = vpop.eup %6263 }
0x149d   : > { %3054 = vrot.lane.b32.xlu1 %v6264_v37, %s6609_s15 }
0x149e   : > { %v6266_v46 = vpop.eup %6265 }
0x149f   : > { %3100 = vrot.lane.b32.xlu0 %v6266_v46, %s6609_s15 }
0x14a0   : > { %v6268_v44 = vpop.eup %6267 }
0x14a1   : > { %3102 = vrot.lane.b32.xlu1 %v6268_v44, %s6609_s15  ;;  %v6270_v56 = vpop.eup %6269 }
0x14a2   : > { %v6272_v38 = vpop.eup %6271  ;;  %v3040_v35 = vadd.f32 1.0, %v6270_v56 }
0x14a3   : > { %v6274_v30 = vpop.eup %6273  ;;  %v3041_v21 = vadd.f32 1.0, %v6272_v38 }
0x14a4   : > { %v6276_v39 = vpop.eup %6275  ;;  %6277 = vrcp.f32 %v3040_v35  ;;  %v3088_v33 = vadd.f32 1.0, %v6274_v30 }
0x14a5   : > { %6279 = vrcp.f32 %v3041_v21  ;;  %v3089_v26 = vadd.f32 1.0, %v6276_v39 }
0x14a6   : > { %6281 = vrcp.f32 %v3088_v33 }
0x14a7   : > { %6283 = vrcp.f32 %v3089_v26 }
0x14ae   : > { %v6278_v5 = vpop.eup %6277 }
0x14af   : > { %v6280_v28 = vpop.eup %6279  ;;  %v3048_v51 = vmul.f32 %v6278_v5, %v7453_v58 }
0x14b0   : > { %v6282_v37 = vpop.eup %6281  ;;  %v3049_v35 = vmul.f32 %v6280_v28, %v7457_v32 }
0x14b1   : > { %v6284_v42 = vpop.eup %6283  ;;  %v3096_v39 = vmul.f32 %v6282_v37, %v7461_v17 }
0x150d   : > { %v3053_v9 = vpop.permute.xlu0 %3052 }
0x150e   : > { %v3058_v23 = vmul.f32 %v6278_v5, %v3053_v9  ;;  %v3097_v9 = vmul.f32 %v6284_v42, %v7465_v55 }
0x150f   : > { %v3055_v48 = vpop.permute.xlu1 %3054 }
0x1510   : > { %3062 = vrot.lane.b32.xlu0 %v3058_v23, %s6610_s16  ;;  %v3059_v59 = vmul.f32 %v6280_v28, %v3055_v48 }
0x1511   : > { %v3101_v46 = vpop.permute.xlu0 %3100 }
0x1512   : > { %v3106_v44 = vmul.f32 %v6282_v37, %v3101_v46  ;;  %3064 = vrot.lane.b32.xlu1 %v3059_v59, %s6610_s16 }
0x1513   : > { %v3103_v7 = vpop.permute.xlu1 %3102 }
0x1514   : > { %v3107_v15 = vmul.f32 %v6284_v42, %v3103_v7  ;;  %3110 = vrot.lane.b32.xlu0 %v3106_v44, %s6610_s16 }
0x1516   : > { %3112 = vrot.lane.b32.xlu1 %v3107_v15, %s6610_s16 }
0x1582   : > { %v3063_v56 = vpop.permute.xlu0 %3062 }
0x1583   : > { %v7513_v38 = vadd.f32 %v3063_v56, %v3048_v51 }
0x1584   : > { %v3065_v30 = vpop.permute.xlu1 %3064 }
0x1585   : > { %6285 = vtanh.f32 %v7513_v38  ;;  %v7517_v21 = vadd.f32 %v3065_v30, %v3049_v35 }
0x1586   : > { %v3111_v33 = vpop.permute.xlu0 %3110 }
0x1587   : > { %6287 = vtanh.f32 %v7517_v21  ;;  %v7521_v26 = vadd.f32 %v3111_v33, %v3096_v39  ;;  %v7566_v33 = vld [vmem:[%s8345_s7] sm:$0xff]  }
0x1588   : > { %v3113_v58 = vpop.permute.xlu1 %3112 }
0x1589   : > { %6289 = vtanh.f32 %v7521_v26  ;;  %v7525_v23 = vadd.f32 %v3113_v58, %v3097_v9  ;;  %v7576_v9 = vld [vmem:[%s8345_s7 + $0x8] sm:$0xff]  }
0x158b   : > { %6291 = vtanh.f32 %v7525_v23 }
0x158f   : > { %v6286_v32 = vpop.eup %6285 }
0x1590   : > { %3074 = vrot.lane.b32.xlu0 %v6286_v32, %s6609_s15 }
0x1591   : > { %v6288_v48 = vpop.eup %6287 }
0x1592   : > { %3076 = vrot.lane.b32.xlu1 %v6288_v48, %s6609_s15 }
0x1593   : > { %v6290_v17 = vpop.eup %6289 }
0x1594   : > { %3122 = vrot.lane.b32.xlu0 %v6290_v17, %s6609_s15 }
0x1595   : > { %v6292_v59 = vpop.eup %6291 }
0x1596   : > { %3124 = vrot.lane.b32.xlu1 %v6292_v59, %s6609_s15 }
0x1602   : > { %v3075_v55 = vpop.permute.xlu0 %3074 }
0x1603   : > { %v7532_v44 = vmul.f32 %v6278_v5, %v3075_v55 }
0x1604   : > { %v3077_v46 = vpop.permute.xlu1 %3076 }
0x1605   : > { %v7534_v7 = vmul.f32 %v6280_v28, %v3077_v46  ;;  %v7550_v28 = vld [vmem:[%s8342_s4] sm:$0xff]  }
0x1606   : > { %v3123_v15 = vpop.permute.xlu0 %3122 }
0x1607   : > { %v3160_v51 = vpack.c.bf16 %v7534_v7, %v7532_v44  ;;  %v7538_v35 = vmul.f32 %v6282_v37, %v3123_v15 }
0x1608   : > { %v3125_v56 = vpop.permute.xlu1 %3124 }
0x1609   : > { %v7540_v30 = vmul.f32 %v6284_v42, %v3125_v56  ;;  %3162 = vrot.lane.b32.xlu0 %v3160_v51, %s6610_s16  ;;  %v7560_v42 = vld [vmem:[%s8342_s4 + $0x8] sm:$0xff]  }
0x160b   : > { %v3212_v39 = vpack.c.bf16 %v7540_v30, %v7538_v35 }
0x160d   : > { %3214 = vrot.lane.b32.xlu1 %v3212_v39, %s6610_s16 }
0x167b   : > { %v3163_v5 = vpop.permute.xlu0 %3162 }
0x167c   : > { %5805 = vmatmul.mubr.msk.bf16.vlgmr.msra.gmra.mrb[64].mxu0 %vm654_vm1, %v3163_v5 }
0x167d   : > { %5817 = vmatpush3.bf16.msra.mxu0 %v7550_v28  ;;  %5820 = vmatprep.mubr.msk.bf16.mxu0 %vm6608_vm2, %v8399_v62 }
0x167e   : > { %5818 = vmatprep.subr.bf16.mxu0 %v8399_v62 }
0x167f   : > { %v3215_v37 = vpop.permute.xlu1 %3214 }
0x1680   : > { %5813 = vmatmul.mubr.msk.bf16.vlgmr.msra.gmra.mrb[64].mxu1 %vm654_vm1, %v3215_v37 }
0x1681   : > { %5819 = vmatpush3.bf16.msra.mxu0 %v7560_v42  ;;  %5825 = vmatpush3.bf16.msra.mxu1 %v7566_v33 }
0x1682   : > { %5826 = vmatprep.subr.bf16.mxu1 %v8399_v62  ;;  %5828 = vmatprep.mubr.msk.bf16.mxu1 %vm6608_vm2, %v8399_v62 }
0x1683   : > { %5832 = vmatprep.subr.bf16.mxu0 %v8399_v62 }
0x1685   : > { %5827 = vmatpush3.bf16.msra.mxu1 %v7576_v9 }
0x1686   : > { %5840 = vmatprep.subr.bf16.mxu1 %v8399_v62 }
0x174f   : > { %v3201_v58 = vpop.f32.mrb[64].mxu0 }
0x1750   : > { %v3208_v32 = vadd.f32 %v3201_v58, %v6964_v4  ;;  %v5806_v48 = vpop.f32.mrb[65].mxu0 }
0x1751   : > { %v3204_v17 = vpop.f32.mrb[66].mxu0 }
0x1752   : > { %6293 = vtanh.f32 %v3208_v32  ;;  %v3209_v59 = vadd.f32 %v3204_v17, %v6976_v25  ;;  %v5807_v55 = vpop.f32.mrb[67].mxu0 }
0x1753   : > { %v3253_v46 = vpop.f32.mrb[64].mxu1 }
0x1754   : > { %v3260_v15 = vadd.f32 %v3253_v46, %v6973_v20  ;;  %v5814_v51 = vpop.f32.mrb[65].mxu1  ;;  %6295 = vtanh.f32 %v3209_v59  ;;  %v5406_v20 = vmul.f32 -1.442695, %v3208_v32  ;;  %v5407_v48 = vmul.f32 -1.442695, %v3209_v59 }
0x1755   : > { %v3256_v56 = vpop.f32.mrb[66].mxu1 }
0x1756   : > { %v3261_v39 = vadd.f32 %v3256_v56, %v6982_v31  ;;  %v5815_v5 = vpop.f32.mrb[67].mxu1  ;;  %6297 = vtanh.f32 %v3260_v15  ;;  %v5408_v17 = vmul.f32 -1.442695, %v3260_v15 }
0x1758   : > { %6299 = vtanh.f32 %v3261_v39  ;;  %v5409_v31 = vmul.f32 -1.442695, %v3261_v39 }
0x1759   : > { %6301 = vpow2.f32 %v5406_v20 }
0x175a   : > { %6303 = vpow2.f32 %v5407_v48 }
0x175b   : > { %6305 = vpow2.f32 %v5408_v17 }
0x175c   : > { %v6294_v37 = vpop.eup %6293  ;;  %6307 = vpow2.f32 %v5409_v31 }
0x175d   : > { %3280 = vrot.lane.b32.xlu0 %v6294_v37, %s6609_s15 }
0x175e   : > { %v6296_v4 = vpop.eup %6295 }
0x175f   : > { %3282 = vrot.lane.b32.xlu1 %v6296_v4, %s6609_s15 }
0x1760   : > { %v6298_v58 = vpop.eup %6297 }
0x1761   : > { %3328 = vrot.lane.b32.xlu0 %v6298_v58, %s6609_s15 }
0x1762   : > { %v6300_v25 = vpop.eup %6299 }
0x1763   : > { %3330 = vrot.lane.b32.xlu1 %v6300_v25, %s6609_s15  ;;  %v6302_v55 = vpop.eup %6301 }
0x1764   : > { %v6304_v46 = vpop.eup %6303  ;;  %v3268_v51 = vadd.f32 1.0, %v6302_v55 }
0x1765   : > { %v6306_v56 = vpop.eup %6305  ;;  %v3269_v5 = vadd.f32 1.0, %v6304_v46 }
0x1766   : > { %v6308_v37 = vpop.eup %6307  ;;  %6309 = vrcp.f32 %v3268_v51  ;;  %v3316_v4 = vadd.f32 1.0, %v6306_v56 }
0x1767   : > { %6311 = vrcp.f32 %v3269_v5  ;;  %v3317_v58 = vadd.f32 1.0, %v6308_v37 }
0x1768   : > { %6313 = vrcp.f32 %v3316_v4 }
0x1769   : > { %6315 = vrcp.f32 %v3317_v58 }
0x1770   : > { %v6310_v32 = vpop.eup %6309 }
0x1771   : > { %v6312_v15 = vpop.eup %6311  ;;  %v3276_v56 = vmul.f32 %v6310_v32, %v7513_v38 }
0x1772   : > { %v6314_v48 = vpop.eup %6313  ;;  %v3277_v4 = vmul.f32 %v6312_v15, %v7517_v21 }
0x1773   : > { %v6316_v55 = vpop.eup %6315 }
0x17cf   : > { %v3281_v59 = vpop.permute.xlu0 %3280 }
0x17d0   : > { %v3286_v25 = vmul.f32 %v6310_v32, %v3281_v59 }
0x17d1   : > { %v3283_v20 = vpop.permute.xlu1 %3282 }
0x17d2   : > { %3290 = vrot.lane.b32.xlu0 %v3286_v25, %s6610_s16  ;;  %v3287_v39 = vmul.f32 %v6312_v15, %v3283_v20  ;;  %v3324_v25 = vmul.f32 %v6314_v48, %v7521_v26 }
0x17d3   : > { %v3329_v17 = vpop.permute.xlu0 %3328 }
0x17d4   : > { %v3334_v31 = vmul.f32 %v6314_v48, %v3329_v17  ;;  %3292 = vrot.lane.b32.xlu1 %v3287_v39, %s6610_s16  ;;  %v3325_v17 = vmul.f32 %v6316_v55, %v7525_v23 }
0x17d5   : > { %v3331_v46 = vpop.permute.xlu1 %3330 }
0x17d6   : > { %v3335_v51 = vmul.f32 %v6316_v55, %v3331_v46  ;;  %3338 = vrot.lane.b32.xlu0 %v3334_v31, %s6610_s16 }
0x17d8   : > { %3340 = vrot.lane.b32.xlu1 %v3335_v51, %s6610_s16 }
0x1844   : > { %v3291_v5 = vpop.permute.xlu0 %3290 }
0x1845   : > { %v7593_v37 = vadd.f32 %v3291_v5, %v3276_v56 }
0x1846   : > { %v3293_v58 = vpop.permute.xlu1 %3292 }
0x1847   : > { %6317 = vtanh.f32 %v7593_v37  ;;  %v7597_v59 = vadd.f32 %v3293_v58, %v3277_v4 }
0x1848   : > { %v3339_v20 = vpop.permute.xlu0 %3338 }
0x1849   : > { %6319 = vtanh.f32 %v7597_v59  ;;  %v7601_v39 = vadd.f32 %v3339_v20, %v3324_v25 }
0x184a   : > { %v3341_v38 = vpop.permute.xlu1 %3340 }
0x184b   : > { %6321 = vtanh.f32 %v7601_v39  ;;  %v7605_v31 = vadd.f32 %v3341_v38, %v3325_v17 }
0x184d   : > { %6323 = vtanh.f32 %v7605_v31 }
0x1851   : > { %v6318_v21 = vpop.eup %6317 }
0x1852   : > { %3302 = vrot.lane.b32.xlu0 %v6318_v21, %s6609_s15 }
0x1853   : > { %v6320_v46 = vpop.eup %6319 }
0x1854   : > { %3304 = vrot.lane.b32.xlu1 %v6320_v46, %s6609_s15 }
0x1855   : > { %v6322_v26 = vpop.eup %6321 }
0x1856   : > { %3350 = vrot.lane.b32.xlu0 %v6322_v26, %s6609_s15 }
0x1857   : > { %v6324_v51 = vpop.eup %6323 }
0x1858   : > { %3352 = vrot.lane.b32.xlu1 %v6324_v51, %s6609_s15 }
0x18c4   : > { %v3303_v23 = vpop.permute.xlu0 %3302 }
0x18c5   : > { %v7612_v5 = vmul.f32 %v6310_v32, %v3303_v23 }
0x18c6   : > { %v3305_v56 = vpop.permute.xlu1 %3304 }
0x18c7   : > { %v7614_v4 = vmul.f32 %v6312_v15, %v3305_v56 }
0x18c8   : > { %v3351_v58 = vpop.permute.xlu0 %3350 }
0x18c9   : > { %v3388_v25 = vpack.c.bf16 %v7614_v4, %v7612_v5  ;;  %v7618_v17 = vmul.f32 %v6314_v48, %v3351_v58 }
0x18ca   : > { %v3353_v20 = vpop.permute.xlu1 %3352 }
0x18cb   : > { %v7620_v38 = vmul.f32 %v6316_v55, %v3353_v20  ;;  %3390 = vrot.lane.b32.xlu0 %v3388_v25, %s6610_s16 }
0x18cd   : > { %v3440_v21 = vpack.c.bf16 %v7620_v38, %v7618_v17 }
0x18cf   : > { %3442 = vrot.lane.b32.xlu1 %v3440_v21, %s6610_s16 }
0x193d   : > { %v3391_v32 = vpop.permute.xlu0 %3390 }
0x193e   : > { %5821 = vmatmul.mubr.msk.bf16.vlgmr.msra.gmra.mrb[68].mxu0 %vm654_vm1, %v3391_v32 }
0x193f   : > { %5833 = vmatpush3.bf16.msra.mxu0 %v7550_v28  ;;  %5836 = vmatprep.mubr.msk.bf16.mxu0 %vm6608_vm2, %v8399_v62 }
0x1940   : > { %5834 = vmatprep.subr.bf16.mxu0 %v8399_v62 }
0x1941   : > { %v3443_v15 = vpop.permute.xlu1 %3442 }
0x1942   : > { %5829 = vmatmul.mubr.msk.bf16.vlgmr.msra.gmra.mrb[68].mxu1 %vm654_vm1, %v3443_v15 }
0x1943   : > { %5835 = vmatpush3.bf16.msra.mxu0 %v7560_v42  ;;  %5841 = vmatpush3.bf16.msra.mxu1 %v7566_v33 }
0x1944   : > { %5842 = vmatprep.subr.bf16.mxu1 %v8399_v62  ;;  %5844 = vmatprep.mubr.msk.bf16.mxu1 %vm6608_vm2, %v8399_v62 }
0x1945   : > { %5848 = vmatprep.subr.bf16.mxu0 %v8399_v62 }
0x1947   : > { %5843 = vmatpush3.bf16.msra.mxu1 %v7576_v9 }
0x1948   : > { %5856 = vmatprep.subr.bf16.mxu1 %v8399_v62 }
0x1a11   : > { %v3429_v48 = vpop.f32.mrb[68].mxu0 }
0x1a12   : > { %v3436_v55 = vadd.f32 %v3429_v48, %v6961_v63  ;;  %v5822_v46 = vpop.f32.mrb[69].mxu0 }
0x1a13   : > { %v3432_v26 = vpop.f32.mrb[70].mxu0 }
0x1a14   : > { %6325 = vtanh.f32 %v3436_v55  ;;  %v3437_v51 = vadd.f32 %v3432_v26, %v6970_v16  ;;  %v5823_v23 = vpop.f32.mrb[71].mxu0 }
0x1a15   : > { %v3481_v56 = vpop.f32.mrb[68].mxu1 }
0x1a16   : > { %v3488_v58 = vadd.f32 %v3481_v56, %v6967_v8  ;;  %v5830_v25 = vpop.f32.mrb[69].mxu1  ;;  %6327 = vtanh.f32 %v3437_v51  ;;  %v5412_v8 = vmul.f32 -1.442695, %v3436_v55  ;;  %v5413_v46 = vmul.f32 -1.442695, %v3437_v51 }
0x1a17   : > { %v3484_v20 = vpop.f32.mrb[70].mxu1 }
0x1a18   : > { %v3489_v21 = vadd.f32 %v3484_v20, %v6979_v27  ;;  %v5831_v32 = vpop.f32.mrb[71].mxu1  ;;  %6329 = vtanh.f32 %v3488_v58  ;;  %v5414_v26 = vmul.f32 -1.442695, %v3488_v58 }
0x1a1a   : > { %6331 = vtanh.f32 %v3489_v21  ;;  %v5415_v27 = vmul.f32 -1.442695, %v3489_v21 }
0x1a1b   : > { %6333 = vpow2.f32 %v5412_v8 }
0x1a1c   : > { %6335 = vpow2.f32 %v5413_v46 }
0x1a1d   : > { %6337 = vpow2.f32 %v5414_v26 }
0x1a1e   : > { %v6326_v15 = vpop.eup %6325  ;;  %6339 = vpow2.f32 %v5415_v27 }
0x1a1f   : > { %3508 = vrot.lane.b32.xlu0 %v6326_v15, %s6609_s15 }
0x1a20   : > { %v6328_v63 = vpop.eup %6327 }
0x1a21   : > { %3510 = vrot.lane.b32.xlu1 %v6328_v63, %s6609_s15 }
0x1a22   : > { %v6330_v48 = vpop.eup %6329 }
0x1a23   : > { %3556 = vrot.lane.b32.xlu0 %v6330_v48, %s6609_s15 }
0x1a24   : > { %v6332_v16 = vpop.eup %6331 }
0x1a25   : > { %3558 = vrot.lane.b32.xlu1 %v6332_v16, %s6609_s15  ;;  %v6334_v23 = vpop.eup %6333 }
0x1a26   : > { %v6336_v56 = vpop.eup %6335  ;;  %v3496_v25 = vadd.f32 1.0, %v6334_v23 }
0x1a27   : > { %v6338_v20 = vpop.eup %6337  ;;  %v3497_v32 = vadd.f32 1.0, %v6336_v56 }
0x1a28   : > { %v6340_v15 = vpop.eup %6339  ;;  %6341 = vrcp.f32 %v3496_v25  ;;  %v3544_v63 = vadd.f32 1.0, %v6338_v20 }
0x1a29   : > { %6343 = vrcp.f32 %v3497_v32  ;;  %v3545_v48 = vadd.f32 1.0, %v6340_v15 }
0x1a2a   : > { %6345 = vrcp.f32 %v3544_v63 }
0x1a2b   : > { %6347 = vrcp.f32 %v3545_v48 }
0x1a32   : > { %v6342_v55 = vpop.eup %6341 }
0x1a33   : > { %v6344_v58 = vpop.eup %6343  ;;  %v3504_v20 = vmul.f32 %v6342_v55, %v7593_v37 }
0x1a34   : > { %v6346_v46 = vpop.eup %6345  ;;  %v3505_v63 = vmul.f32 %v6344_v58, %v7597_v59 }
0x1a35   : > { %v6348_v23 = vpop.eup %6347 }
0x1a91   : > { %v3509_v51 = vpop.permute.xlu0 %3508 }
0x1a92   : > { %v3514_v16 = vmul.f32 %v6342_v55, %v3509_v51 }
0x1a93   : > { %v3511_v8 = vpop.permute.xlu1 %3510 }
0x1a94   : > { %3518 = vrot.lane.b32.xlu0 %v3514_v16, %s6610_s16  ;;  %v3515_v21 = vmul.f32 %v6344_v58, %v3511_v8  ;;  %v3552_v16 = vmul.f32 %v6346_v46, %v7601_v39 }
0x1a95   : > { %v3557_v26 = vpop.permute.xlu0 %3556 }
0x1a96   : > { %v3562_v27 = vmul.f32 %v6346_v46, %v3557_v26  ;;  %3520 = vrot.lane.b32.xlu1 %v3515_v21, %s6610_s16  ;;  %v3553_v26 = vmul.f32 %v6348_v23, %v7605_v31 }
0x1a97   : > { %v3559_v56 = vpop.permute.xlu1 %3558 }
0x1a98   : > { %v3563_v25 = vmul.f32 %v6348_v23, %v3559_v56  ;;  %3566 = vrot.lane.b32.xlu0 %v3562_v27, %s6610_s16 }
0x1a9a   : > { %3568 = vrot.lane.b32.xlu1 %v3563_v25, %s6610_s16 }
0x1b06   : > { %v3519_v32 = vpop.permute.xlu0 %3518 }
0x1b07   : > { %v7653_v15 = vadd.f32 %v3519_v32, %v3504_v20 }
0x1b08   : > { %v3521_v48 = vpop.permute.xlu1 %3520 }
0x1b09   : > { %6349 = vtanh.f32 %v7653_v15  ;;  %v7657_v51 = vadd.f32 %v3521_v48, %v3505_v63 }
0x1b0a   : > { %v3567_v8 = vpop.permute.xlu0 %3566 }
0x1b0b   : > { %6351 = vtanh.f32 %v7657_v51  ;;  %v7661_v21 = vadd.f32 %v3567_v8, %v3552_v16 }
0x1b0c   : > { %v3569_v37 = vpop.permute.xlu1 %3568 }
0x1b0d   : > { %6353 = vtanh.f32 %v7661_v21  ;;  %v7665_v27 = vadd.f32 %v3569_v37, %v3553_v26 }
0x1b0f   : > { %6355 = vtanh.f32 %v7665_v27 }
0x1b13   : > { %v6350_v59 = vpop.eup %6349 }
0x1b14   : > { %3530 = vrot.lane.b32.xlu0 %v6350_v59, %s6609_s15 }
0x1b15   : > { %v6352_v56 = vpop.eup %6351 }
0x1b16   : > { %3532 = vrot.lane.b32.xlu1 %v6352_v56, %s6609_s15 }
0x1b17   : > { %v6354_v39 = vpop.eup %6353 }
0x1b18   : > { %3578 = vrot.lane.b32.xlu0 %v6354_v39, %s6609_s15 }
0x1b19   : > { %v6356_v25 = vpop.eup %6355 }
0x1b1a   : > { %3580 = vrot.lane.b32.xlu1 %v6356_v25, %s6609_s15 }
0x1b86   : > { %v3531_v31 = vpop.permute.xlu0 %3530 }
0x1b87   : > { %v7672_v32 = vmul.f32 %v6342_v55, %v3531_v31 }
0x1b88   : > { %v3533_v20 = vpop.permute.xlu1 %3532 }
0x1b89   : > { %v7674_v63 = vmul.f32 %v6344_v58, %v3533_v20 }
0x1b8a   : > { %v3579_v48 = vpop.permute.xlu0 %3578 }
0x1b8b   : > { %v3616_v16 = vpack.c.bf16 %v7674_v63, %v7672_v32  ;;  %v7678_v26 = vmul.f32 %v6346_v46, %v3579_v48 }
0x1b8c   : > { %v3581_v8 = vpop.permute.xlu1 %3580 }
0x1b8d   : > { %v7680_v37 = vmul.f32 %v6348_v23, %v3581_v8  ;;  %3618 = vrot.lane.b32.xlu0 %v3616_v16, %s6610_s16 }
0x1b8f   : > { %8400 = vst [vmem:[#allocation36_spill] sm:$0xff] %v7680_v37  ;;  %v3668_v59 = vpack.c.bf16 %v7680_v37, %v7678_v26 }
0x1b91   : > { %3670 = vrot.lane.b32.xlu1 %v3668_v59, %s6610_s16  ;;  %v8401_v59 = vld [vmem:[#allocation18_spill] sm:$0xff] }
0x1bff   : > { %v3619_v55 = vpop.permute.xlu0 %3618 }
0x1c00   : > { %5837 = vmatmul.mubr.msk.bf16.vlgmr.msra.gmra.mrb[72].mxu0 %vm654_vm1, %v3619_v55 }
0x1c01   : > { %5849 = vmatpush3.bf16.msra.mxu0 %v7550_v28  ;;  %5852 = vmatprep.mubr.msk.bf16.mxu0 %vm6608_vm2, %v8399_v62 }
0x1c02   : > { %5850 = vmatprep.subr.bf16.mxu0 %v8399_v62 }
0x1c03   : > { %v3671_v58 = vpop.permute.xlu1 %3670 }
0x1c04   : > { %5845 = vmatmul.mubr.msk.bf16.vlgmr.msra.gmra.mrb[72].mxu1 %vm654_vm1, %v3671_v58 }
0x1c05   : > { %5851 = vmatpush3.bf16.msra.mxu0 %v7560_v42  ;;  %5857 = vmatpush3.bf16.msra.mxu1 %v7566_v33 }
0x1c06   : > { %5858 = vmatprep.subr.bf16.mxu1 %v8399_v62  ;;  %5860 = vmatprep.mubr.msk.bf16.mxu1 %vm6608_vm2, %v8399_v62 }
0x1c07   : > { %5864 = vmatprep.subr.bf16.mxu0 %v8399_v62 }
0x1c09   : > { %5859 = vmatpush3.bf16.msra.mxu1 %v7576_v9 }
0x1c0a   : > { %5872 = vmatprep.subr.bf16.mxu1 %v8399_v62 }
0x1cd3   : > { %v3657_v46 = vpop.f32.mrb[72].mxu0 }
0x1cd4   : > { %v3664_v23 = vadd.f32 %v3657_v46, %v6988_v41  ;;  %v5838_v56 = vpop.f32.mrb[73].mxu0 }
0x1cd5   : > { %v3660_v39 = vpop.f32.mrb[74].mxu0 }
0x1cd6   : > { %6357 = vtanh.f32 %v3664_v23  ;;  %v3665_v25 = vadd.f32 %v3660_v39, %v7000_v6  ;;  %v5839_v31 = vpop.f32.mrb[75].mxu0 }
0x1cd7   : > { %v3709_v20 = vpop.f32.mrb[72].mxu1 }
0x1cd8   : > { %v3716_v48 = vadd.f32 %v3709_v20, %v6997_v1  ;;  %v5846_v16 = vpop.f32.mrb[73].mxu1  ;;  %6359 = vtanh.f32 %v3665_v25  ;;  %v5418_v1 = vmul.f32 -1.442695, %v3664_v23  ;;  %v5419_v56 = vmul.f32 -1.442695, %v3665_v25 }
0x1cd9   : > { %v3712_v8 = vpop.f32.mrb[74].mxu1 }
0x1cda   : > { %v3717_v55 = vadd.f32 %v3712_v8, %v8401_v59  ;;  %v5847_v58 = vpop.f32.mrb[75].mxu1  ;;  %6361 = vtanh.f32 %v3716_v48  ;;  %v5420_v39 = vmul.f32 -1.442695, %v3716_v48 }
0x1cdc   : > { %6363 = vtanh.f32 %v3717_v55  ;;  %v5421_v31 = vmul.f32 -1.442695, %v3717_v55 }
0x1cdd   : > { %6365 = vpow2.f32 %v5418_v1 }
0x1cde   : > { %6367 = vpow2.f32 %v5419_v56 }
0x1cdf   : > { %6369 = vpow2.f32 %v5420_v39 }
0x1ce0   : > { %v6358_v37 = vpop.eup %6357  ;;  %6371 = vpow2.f32 %v5421_v31 }
0x1ce1   : > { %3736 = vrot.lane.b32.xlu0 %v6358_v37, %s6609_s15 }
0x1ce2   : > { %v6360_v41 = vpop.eup %6359 }
0x1ce3   : > { %3738 = vrot.lane.b32.xlu1 %v6360_v41, %s6609_s15 }
0x1ce4   : > { %v6362_v46 = vpop.eup %6361 }
0x1ce5   : > { %3784 = vrot.lane.b32.xlu0 %v6362_v46, %s6609_s15 }
0x1ce6   : > { %v6364_v6 = vpop.eup %6363 }
0x1ce7   : > { %3786 = vrot.lane.b32.xlu1 %v6364_v6, %s6609_s15  ;;  %v6366_v20 = vpop.eup %6365 }
0x1ce8   : > { %v6368_v16 = vpop.eup %6367  ;;  %v3724_v37 = vadd.f32 1.0, %v6366_v20 }
0x1ce9   : > { %v6370_v8 = vpop.eup %6369  ;;  %v3725_v59 = vadd.f32 1.0, %v6368_v16 }
0x1cea   : > { %v6372_v58 = vpop.eup %6371  ;;  %6373 = vrcp.f32 %v3724_v37  ;;  %v3772_v41 = vadd.f32 1.0, %v6370_v8 }
0x1ceb   : > { %6375 = vrcp.f32 %v3725_v59  ;;  %v3773_v46 = vadd.f32 1.0, %v6372_v58 }
0x1cec   : > { %6377 = vrcp.f32 %v3772_v41 }
0x1ced   : > { %6379 = vrcp.f32 %v3773_v46 }
0x1cf4   : > { %v6374_v23 = vpop.eup %6373 }
0x1cf5   : > { %v6376_v48 = vpop.eup %6375  ;;  %v3732_v8 = vmul.f32 %v6374_v23, %v7653_v15 }
0x1cf6   : > { %v6378_v56 = vpop.eup %6377  ;;  %v3733_v41 = vmul.f32 %v6376_v48, %v7657_v51 }
0x1cf7   : > { %v6380_v20 = vpop.eup %6379 }
0x1d53   : > { %v3737_v25 = vpop.permute.xlu0 %3736 }
0x1d54   : > { %v3742_v6 = vmul.f32 %v6374_v23, %v3737_v25 }
0x1d55   : > { %v3739_v1 = vpop.permute.xlu1 %3738 }
0x1d56   : > { %3746 = vrot.lane.b32.xlu0 %v3742_v6, %s6610_s16  ;;  %v3743_v55 = vmul.f32 %v6376_v48, %v3739_v1  ;;  %v3780_v6 = vmul.f32 %v6378_v56, %v7661_v21 }
0x1d57   : > { %v3785_v39 = vpop.permute.xlu0 %3784 }
0x1d58   : > { %v3790_v31 = vmul.f32 %v6378_v56, %v3785_v39  ;;  %3748 = vrot.lane.b32.xlu1 %v3743_v55, %s6610_s16  ;;  %v3781_v39 = vmul.f32 %v6380_v20, %v7665_v27 }
0x1d59   : > { %v3787_v16 = vpop.permute.xlu1 %3786 }
0x1d5a   : > { %v3791_v37 = vmul.f32 %v6380_v20, %v3787_v16  ;;  %3794 = vrot.lane.b32.xlu0 %v3790_v31, %s6610_s16 }
0x1d5c   : > { %3796 = vrot.lane.b32.xlu1 %v3791_v37, %s6610_s16 }
0x1dc8   : > { %v3747_v59 = vpop.permute.xlu0 %3746 }
0x1dc9   : > { %v7713_v58 = vadd.f32 %v3747_v59, %v3732_v8 }
0x1dca   : > { %v3749_v46 = vpop.permute.xlu1 %3748 }
0x1dcb   : > { %6381 = vtanh.f32 %v7713_v58  ;;  %v7717_v25 = vadd.f32 %v3749_v46, %v3733_v41 }
0x1dcc   : > { %v3795_v1 = vpop.permute.xlu0 %3794 }
0x1dcd   : > { %6383 = vtanh.f32 %v7717_v25  ;;  %v7721_v55 = vadd.f32 %v3795_v1, %v3780_v6 }
0x1dce   : > { %v3797_v15 = vpop.permute.xlu1 %3796 }
0x1dcf   : > { %6385 = vtanh.f32 %v7721_v55  ;;  %v7725_v31 = vadd.f32 %v3797_v15, %v3781_v39 }
0x1dd1   : > { %6387 = vtanh.f32 %v7725_v31 }
0x1dd5   : > { %v6382_v51 = vpop.eup %6381 }
0x1dd6   : > { %3758 = vrot.lane.b32.xlu0 %v6382_v51, %s6609_s15 }
0x1dd7   : > { %v6384_v16 = vpop.eup %6383 }
0x1dd8   : > { %3760 = vrot.lane.b32.xlu1 %v6384_v16, %s6609_s15 }
0x1dd9   : > { %v6386_v21 = vpop.eup %6385 }
0x1dda   : > { %3806 = vrot.lane.b32.xlu0 %v6386_v21, %s6609_s15 }
0x1ddb   : > { %v6388_v37 = vpop.eup %6387 }
0x1ddc   : > { %3808 = vrot.lane.b32.xlu1 %v6388_v37, %s6609_s15 }
0x1e48   : > { %v3759_v27 = vpop.permute.xlu0 %3758 }
0x1e49   : > { %v7732_v59 = vmul.f32 %v6374_v23, %v3759_v27  ;;  %v8407_v27 = vld [vmem:[#allocation16_spill] sm:$0xff] }
0x1e4a   : > { %v3761_v8 = vpop.permute.xlu1 %3760 }
0x1e4b   : > { %8402 = vst [vmem:[#allocation18_spill] sm:$0xff] %v7732_v59  ;;  %v7734_v41 = vmul.f32 %v6376_v48, %v3761_v8 }
0x1e4c   : > { %v3807_v46 = vpop.permute.xlu0 %3806 }
0x1e4d   : > { %8403 = vst [vmem:[#allocation37_spill] sm:$0xff] %v7734_v41  ;;  %v3844_v6 = vpack.c.bf16 %v7734_v41, %v7732_v59  ;;  %v7738_v39 = vmul.f32 %v6378_v56, %v3807_v46 }
0x1e4e   : > { %v3809_v1 = vpop.permute.xlu1 %3808 }
0x1e4f   : > { %8404 = vst [vmem:[#allocation38_spill] sm:$0xff] %v7738_v39  ;;  %v7740_v15 = vmul.f32 %v6380_v20, %v3809_v1  ;;  %3846 = vrot.lane.b32.xlu0 %v3844_v6, %s6610_s16  ;;  %v8406_v20 = vld [vmem:[#allocation14_spill] sm:$0xff]  ;;  %v8408_v1 = vld [vmem:[#allocation15_spill] sm:$0xff] }
0x1e51   : > { %8405 = vst [vmem:[#allocation39_spill] sm:$0xff] %v7740_v15  ;;  %v3896_v51 = vpack.c.bf16 %v7740_v15, %v7738_v39  ;;  %v8409_v15 = vld [vmem:[#allocation17_spill] sm:$0xff] }
0x1e53   : > { %3898 = vrot.lane.b32.xlu1 %v3896_v51, %s6610_s16 }
0x1ec1   : > { %v3847_v23 = vpop.permute.xlu0 %3846 }
0x1ec2   : > { %5853 = vmatmul.mubr.msk.bf16.vlgmr.msra.gmra.mrb[76].mxu0 %vm654_vm1, %v3847_v23 }
0x1ec3   : > { %5865 = vmatpush3.bf16.msra.mxu0 %v7550_v28  ;;  %5868 = vmatprep.mubr.msk.bf16.mxu0 %vm6608_vm2, %v8399_v62 }
0x1ec4   : > { %5866 = vmatprep.subr.bf16.mxu0 %v8399_v62 }
0x1ec5   : > { %v3899_v48 = vpop.permute.xlu1 %3898 }
0x1ec6   : > { %5861 = vmatmul.mubr.msk.bf16.vlgmr.msra.gmra.mrb[76].mxu1 %vm654_vm1, %v3899_v48 }
0x1ec7   : > { %5867 = vmatpush3.bf16.msra.mxu0 %v7560_v42  ;;  %5873 = vmatpush3.bf16.msra.mxu1 %v7566_v33 }
0x1ec8   : > { %5874 = vmatprep.subr.bf16.mxu1 %v8399_v62  ;;  %5876 = vmatprep.mubr.msk.bf16.mxu1 %vm6608_vm2, %v8399_v62 }
0x1ec9   : > { %5880 = vmatprep.subr.bf16.mxu0 %v8399_v62 }
0x1ecb   : > { %5875 = vmatpush3.bf16.msra.mxu1 %v7576_v9 }
0x1ecc   : > { %5888 = vmatprep.subr.bf16.mxu1 %v8399_v62 }
0x1f95   : > { %v3885_v56 = vpop.f32.mrb[76].mxu0 }
0x1f96   : > { %v3892_v16 = vadd.f32 %v3885_v56, %v8406_v20  ;;  %v5854_v21 = vpop.f32.mrb[77].mxu0 }
0x1f97   : > { %v3888_v37 = vpop.f32.mrb[78].mxu0 }
0x1f98   : > { %6389 = vtanh.f32 %v3892_v16  ;;  %v3893_v8 = vadd.f32 %v3888_v37, %v8407_v27  ;;  %v5855_v46 = vpop.f32.mrb[79].mxu0  ;;  %v5424_v37 = vmul.f32 -1.442695, %v3892_v16 }
0x1f99   : > { %v3937_v6 = vpop.f32.mrb[76].mxu1 }
0x1f9a   : > { %v3944_v51 = vadd.f32 %v3937_v6, %v8408_v1  ;;  %v5862_v23 = vpop.f32.mrb[77].mxu1  ;;  %6391 = vtanh.f32 %v3893_v8  ;;  %v5425_v27 = vmul.f32 -1.442695, %v3893_v8 }
0x1f9b   : > { %v3940_v48 = vpop.f32.mrb[78].mxu1 }
0x1f9c   : > { %v3945_v39 = vadd.f32 %v3940_v48, %v8409_v15  ;;  %v5863_v41 = vpop.f32.mrb[79].mxu1  ;;  %6393 = vtanh.f32 %v3944_v51  ;;  %v5426_v46 = vmul.f32 -1.442695, %v3944_v51 }
0x1f9e   : > { %6395 = vtanh.f32 %v3945_v39  ;;  %v5427_v41 = vmul.f32 -1.442695, %v3945_v39 }
0x1f9f   : > { %6397 = vpow2.f32 %v5424_v37 }
0x1fa0   : > { %6399 = vpow2.f32 %v5425_v27 }
0x1fa1   : > { %6401 = vpow2.f32 %v5426_v46 }
0x1fa2   : > { %v6390_v59 = vpop.eup %6389  ;;  %6403 = vpow2.f32 %v5427_v41 }
0x1fa3   : > { %3964 = vrot.lane.b32.xlu0 %v6390_v59, %s6609_s15 }
0x1fa4   : > { %v6392_v56 = vpop.eup %6391 }
0x1fa5   : > { %3966 = vrot.lane.b32.xlu1 %v6392_v56, %s6609_s15 }
0x1fa6   : > { %v6394_v20 = vpop.eup %6393 }
0x1fa7   : > { %4012 = vrot.lane.b32.xlu0 %v6394_v20, %s6609_s15 }
0x1fa8   : > { %v6396_v21 = vpop.eup %6395 }
0x1fa9   : > { %4014 = vrot.lane.b32.xlu1 %v6396_v21, %s6609_s15  ;;  %v6398_v15 = vpop.eup %6397 }
0x1faa   : > { %v6400_v6 = vpop.eup %6399  ;;  %v3952_v59 = vadd.f32 1.0, %v6398_v15 }
0x1fab   : > { %v6402_v1 = vpop.eup %6401  ;;  %v3953_v23 = vadd.f32 1.0, %v6400_v6 }
0x1fac   : > { %v6404_v48 = vpop.eup %6403  ;;  %6405 = vrcp.f32 %v3952_v59  ;;  %v4000_v56 = vadd.f32 1.0, %v6402_v1 }
0x1fad   : > { %6407 = vrcp.f32 %v3953_v23  ;;  %v4001_v20 = vadd.f32 1.0, %v6404_v48 }
0x1fae   : > { %6409 = vrcp.f32 %v4000_v56 }
0x1faf   : > { %6411 = vrcp.f32 %v4001_v20 }
0x1fb6   : > { %v6406_v16 = vpop.eup %6405 }
0x1fb7   : > { %v6408_v51 = vpop.eup %6407  ;;  %v3960_v1 = vmul.f32 %v6406_v16, %v7713_v58 }
0x1fb8   : > { %v6410_v27 = vpop.eup %6409  ;;  %v3961_v56 = vmul.f32 %v6408_v51, %v7717_v25 }
0x1fb9   : > { %v6412_v15 = vpop.eup %6411 }
0x2015   : > { %v3965_v8 = vpop.permute.xlu0 %3964 }
0x2016   : > { %v3970_v21 = vmul.f32 %v6406_v16, %v3965_v8 }
0x2017   : > { %v3967_v37 = vpop.permute.xlu1 %3966 }
0x2018   : > { %3974 = vrot.lane.b32.xlu0 %v3970_v21, %s6610_s16  ;;  %v3971_v39 = vmul.f32 %v6408_v51, %v3967_v37  ;;  %v4008_v21 = vmul.f32 %v6410_v27, %v7721_v55 }
0x2019   : > { %v4013_v46 = vpop.permute.xlu0 %4012 }
0x201a   : > { %v4018_v41 = vmul.f32 %v6410_v27, %v4013_v46  ;;  %3976 = vrot.lane.b32.xlu1 %v3971_v39, %s6610_s16  ;;  %v4009_v46 = vmul.f32 %v6412_v15, %v7725_v31 }
0x201b   : > { %v4015_v6 = vpop.permute.xlu1 %4014 }
0x201c   : > { %v4019_v59 = vmul.f32 %v6412_v15, %v4015_v6  ;;  %4022 = vrot.lane.b32.xlu0 %v4018_v41, %s6610_s16 }
0x201e   : > { %4024 = vrot.lane.b32.xlu1 %v4019_v59, %s6610_s16 }
0x208a   : > { %v3975_v23 = vpop.permute.xlu0 %3974 }
0x208b   : > { %v7773_v48 = vadd.f32 %v3975_v23, %v3960_v1 }
0x208c   : > { %v3977_v20 = vpop.permute.xlu1 %3976 }
0x208d   : > { %6413 = vtanh.f32 %v7773_v48  ;;  %v7777_v8 = vadd.f32 %v3977_v20, %v3961_v56 }
0x208e   : > { %v4023_v37 = vpop.permute.xlu0 %4022 }
0x208f   : > { %6415 = vtanh.f32 %v7777_v8  ;;  %v7781_v39 = vadd.f32 %v4023_v37, %v4008_v21 }
0x2090   : > { %v4025_v58 = vpop.permute.xlu1 %4024 }
0x2091   : > { %6417 = vtanh.f32 %v7781_v39  ;;  %v7785_v41 = vadd.f32 %v4025_v58, %v4009_v46 }
0x2093   : > { %6419 = vtanh.f32 %v7785_v41 }
0x2097   : > { %v6414_v25 = vpop.eup %6413 }
0x2098   : > { %3986 = vrot.lane.b32.xlu0 %v6414_v25, %s6609_s15 }
0x2099   : > { %v6416_v6 = vpop.eup %6415 }
0x209a   : > { %3988 = vrot.lane.b32.xlu1 %v6416_v6, %s6609_s15 }
0x209b   : > { %v6418_v55 = vpop.eup %6417 }
0x209c   : > { %4034 = vrot.lane.b32.xlu0 %v6418_v55, %s6609_s15 }
0x209d   : > { %v6420_v59 = vpop.eup %6419 }
0x209e   : > { %4036 = vrot.lane.b32.xlu1 %v6420_v59, %s6609_s15 }
0x210a   : > { %v3987_v31 = vpop.permute.xlu0 %3986 }
0x210b   : > { %v7792_v23 = vmul.f32 %v6406_v16, %v3987_v31 }
0x210c   : > { %v3989_v1 = vpop.permute.xlu1 %3988 }
0x210d   : > { %8410 = vst [vmem:[#allocation14_spill] sm:$0xff] %v7792_v23  ;;  %v7794_v56 = vmul.f32 %v6408_v51, %v3989_v1  ;;  %v8416_v1 = vld [vmem:[#allocation23_spill] sm:$0xff] }
0x210e   : > { %v4035_v20 = vpop.permute.xlu0 %4034 }
0x210f   : > { %8411 = vst [vmem:[#allocation16_spill] sm:$0xff] %v7794_v56  ;;  %v4072_v21 = vpack.c.bf16 %v7794_v56, %v7792_v23  ;;  %v7798_v46 = vmul.f32 %v6410_v27, %v4035_v20  ;;  %v8414_v27 = vld [vmem:[#allocation20_spill] sm:$0xff] }
0x2110   : > { %v4037_v37 = vpop.permute.xlu1 %4036 }
0x2111   : > { %8412 = vst [vmem:[#allocation15_spill] sm:$0xff] %v7798_v46  ;;  %v7800_v58 = vmul.f32 %v6412_v15, %v4037_v37  ;;  %4074 = vrot.lane.b32.xlu0 %v4072_v21, %s6610_s16 }
0x2113   : > { %8413 = vst [vmem:[#allocation17_spill] sm:$0xff] %v7800_v58  ;;  %v4124_v25 = vpack.c.bf16 %v7800_v58, %v7798_v46  ;;  %v8425_v58 = vld [vmem:[#allocation25_spill] sm:$0xff] }
0x2115   : > { %4126 = vrot.lane.b32.xlu1 %v4124_v25, %s6610_s16  ;;  %v8417_v25 = vld [vmem:[#allocation26_spill] sm:$0xff] }
0x2183   : > { %v4075_v16 = vpop.permute.xlu0 %4074 }
0x2184   : > { %5869 = vmatmul.mubr.msk.bf16.vlgmr.msra.gmra.mrb[80].mxu0 %vm654_vm1, %v4075_v16 }
0x2185   : > { %5881 = vmatpush3.bf16.msra.mxu0 %v7550_v28  ;;  %5884 = vmatprep.mubr.msk.bf16.mxu0 %vm6608_vm2, %v8399_v62 }
0x2186   : > { %5882 = vmatprep.subr.bf16.mxu0 %v8399_v62 }
0x2187   : > { %v4127_v51 = vpop.permute.xlu1 %4126 }
0x2188   : > { %5877 = vmatmul.mubr.msk.bf16.vlgmr.msra.gmra.mrb[80].mxu1 %vm654_vm1, %v4127_v51 }
0x2189   : > { %5883 = vmatpush3.bf16.msra.mxu0 %v7560_v42  ;;  %5889 = vmatpush3.bf16.msra.mxu1 %v7566_v33  ;;  %v8415_v42 = vld [vmem:[#allocation24_spill] sm:$0xff] }
0x218a   : > { %5890 = vmatprep.subr.bf16.mxu1 %v8399_v62  ;;  %5892 = vmatprep.mubr.msk.bf16.mxu1 %vm6608_vm2, %v8399_v62 }
0x218b   : > { %5896 = vmatprep.subr.bf16.mxu0 %v8399_v62 }
0x218d   : > { %5891 = vmatpush3.bf16.msra.mxu1 %v7576_v9 }
0x218e   : > { %5904 = vmatprep.subr.bf16.mxu1 %v8399_v62 }
0x2257   : > { %v4113_v28 = vpop.f32.mrb[80].mxu0 }
0x2258   : > { %v4120_v15 = vadd.f32 %v4113_v28, %v8414_v27  ;;  %v5870_v6 = vpop.f32.mrb[81].mxu0 }
0x2259   : > { %v4116_v55 = vpop.f32.mrb[82].mxu0 }
0x225a   : > { %6421 = vtanh.f32 %v4120_v15  ;;  %v4121_v59 = vadd.f32 %v4116_v55, %v8415_v42  ;;  %v5871_v33 = vpop.f32.mrb[83].mxu0  ;;  %v5430_v55 = vmul.f32 -1.442695, %v4120_v15 }
0x225b   : > { %v4165_v31 = vpop.f32.mrb[80].mxu1 }
0x225c   : > { %v4172_v20 = vadd.f32 %v4165_v31, %v8416_v1  ;;  %v5878_v21 = vpop.f32.mrb[81].mxu1  ;;  %6423 = vtanh.f32 %v4121_v59  ;;  %v5431_v42 = vmul.f32 -1.442695, %v4121_v59 }
0x225d   : > { %v4168_v37 = vpop.f32.mrb[82].mxu1 }
0x225e   : > { %v4173_v16 = vadd.f32 %v4168_v37, %v8417_v25  ;;  %v5879_v9 = vpop.f32.mrb[83].mxu1  ;;  %6425 = vtanh.f32 %v4172_v20  ;;  %v5432_v33 = vmul.f32 -1.442695, %v4172_v20 }
0x2260   : > { %6427 = vtanh.f32 %v4173_v16  ;;  %v5433_v31 = vmul.f32 -1.442695, %v4173_v16 }
0x2261   : > { %6429 = vpow2.f32 %v5430_v55 }
0x2262   : > { %6431 = vpow2.f32 %v5431_v42 }
0x2263   : > { %6433 = vpow2.f32 %v5432_v33 }
0x2264   : > { %v6422_v51 = vpop.eup %6421  ;;  %6435 = vpow2.f32 %v5433_v31 }
0x2265   : > { %4192 = vrot.lane.b32.xlu0 %v6422_v51, %s6609_s15 }
0x2266   : > { %v6424_v28 = vpop.eup %6423 }
0x2267   : > { %4194 = vrot.lane.b32.xlu1 %v6424_v28, %s6609_s15 }
0x2268   : > { %v6426_v27 = vpop.eup %6425 }
0x2269   : > { %4240 = vrot.lane.b32.xlu0 %v6426_v27, %s6609_s15 }
0x226a   : > { %v6428_v6 = vpop.eup %6427 }
0x226b   : > { %4242 = vrot.lane.b32.xlu1 %v6428_v6, %s6609_s15  ;;  %v6430_v1 = vpop.eup %6429 }
0x226c   : > { %v6432_v21 = vpop.eup %6431  ;;  %v4180_v37 = vadd.f32 1.0, %v6430_v1 }
0x226d   : > { %v6434_v25 = vpop.eup %6433  ;;  %v4181_v9 = vadd.f32 1.0, %v6432_v21 }
0x226e   : > { %v6436_v51 = vpop.eup %6435  ;;  %6437 = vrcp.f32 %v4180_v37  ;;  %v4228_v28 = vadd.f32 1.0, %v6434_v25 }
0x226f   : > { %6439 = vrcp.f32 %v4181_v9  ;;  %v4229_v27 = vadd.f32 1.0, %v6436_v51 }
0x2270   : > { %6441 = vrcp.f32 %v4228_v28 }
0x2271   : > { %6443 = vrcp.f32 %v4229_v27 }
0x2278   : > { %v6438_v15 = vpop.eup %6437 }
0x2279   : > { %v6440_v20 = vpop.eup %6439  ;;  %v4188_v25 = vmul.f32 %v6438_v15, %v7773_v48 }
0x227a   : > { %v6442_v42 = vpop.eup %6441  ;;  %v4189_v28 = vmul.f32 %v6440_v20, %v7777_v8 }
0x227b   : > { %v6444_v1 = vpop.eup %6443 }
0x22d7   : > { %v4193_v59 = vpop.permute.xlu0 %4192 }
0x22d8   : > { %v4198_v6 = vmul.f32 %v6438_v15, %v4193_v59 }
0x22d9   : > { %v4195_v55 = vpop.permute.xlu1 %4194 }
0x22da   : > { %4202 = vrot.lane.b32.xlu0 %v4198_v6, %s6610_s16  ;;  %v4199_v16 = vmul.f32 %v6440_v20, %v4195_v55  ;;  %v4236_v6 = vmul.f32 %v6442_v42, %v7781_v39 }
0x22db   : > { %v4241_v33 = vpop.permute.xlu0 %4240 }
0x22dc   : > { %v4246_v31 = vmul.f32 %v6442_v42, %v4241_v33  ;;  %4204 = vrot.lane.b32.xlu1 %v4199_v16, %s6610_s16  ;;  %v4237_v33 = vmul.f32 %v6444_v1, %v7785_v41 }
0x22dd   : > { %v4243_v21 = vpop.permute.xlu1 %4242 }
0x22de   : > { %v4247_v37 = vmul.f32 %v6444_v1, %v4243_v21  ;;  %4250 = vrot.lane.b32.xlu0 %v4246_v31, %s6610_s16 }
0x22e0   : > { %4252 = vrot.lane.b32.xlu1 %v4247_v37, %s6610_s16 }
0x234c   : > { %v4203_v9 = vpop.permute.xlu0 %4202 }
0x234d   : > { %v7833_v51 = vadd.f32 %v4203_v9, %v4188_v25 }
0x234e   : > { %v4205_v27 = vpop.permute.xlu1 %4204 }
0x234f   : > { %6445 = vtanh.f32 %v7833_v51  ;;  %v7837_v59 = vadd.f32 %v4205_v27, %v4189_v28 }
0x2350   : > { %v4251_v55 = vpop.permute.xlu0 %4250 }
0x2351   : > { %6447 = vtanh.f32 %v7837_v59  ;;  %v7841_v16 = vadd.f32 %v4251_v55, %v4236_v6 }
0x2352   : > { %v4253_v48 = vpop.permute.xlu1 %4252 }
0x2353   : > { %6449 = vtanh.f32 %v7841_v16  ;;  %v7845_v31 = vadd.f32 %v4253_v48, %v4237_v33 }
0x2355   : > { %6451 = vtanh.f32 %v7845_v31 }
0x2359   : > { %v6446_v8 = vpop.eup %6445 }
0x235a   : > { %4214 = vrot.lane.b32.xlu0 %v6446_v8, %s6609_s15 }
0x235b   : > { %v6448_v21 = vpop.eup %6447 }
0x235c   : > { %4216 = vrot.lane.b32.xlu1 %v6448_v21, %s6609_s15  ;;  %v7886_v21 = vld [vmem:[%s8345_s7] sm:$0xff]  }
0x235d   : > { %v6450_v39 = vpop.eup %6449 }
0x235e   : > { %4262 = vrot.lane.b32.xlu0 %v6450_v39, %s6609_s15  ;;  %v7896_v39 = vld [vmem:[%s8345_s7 + $0x8] sm:$0xff]  }
0x235f   : > { %v6452_v37 = vpop.eup %6451 }
0x2360   : > { %4264 = vrot.lane.b32.xlu1 %v6452_v37, %s6609_s15 }
0x23cc   : > { %v4215_v41 = vpop.permute.xlu0 %4214 }
0x23cd   : > { %v7852_v9 = vmul.f32 %v6438_v15, %v4215_v41  ;;  %v8422_v41 = vld [vmem:[#allocation19_spill] sm:$0xff] }
0x23ce   : > { %v4217_v25 = vpop.permute.xlu1 %4216 }
0x23cf   : > { %8418 = vst [vmem:[#allocation20_spill] sm:$0xff] %v7852_v9  ;;  %v7854_v28 = vmul.f32 %v6440_v20, %v4217_v25  ;;  %v7870_v20 = vld [vmem:[%s8342_s4] sm:$0xff]  }
0x23d0   : > { %v4263_v27 = vpop.permute.xlu0 %4262 }
0x23d1   : > { %8419 = vst [vmem:[#allocation24_spill] sm:$0xff] %v7854_v28  ;;  %v4300_v6 = vpack.c.bf16 %v7854_v28, %v7852_v9  ;;  %v7858_v33 = vmul.f32 %v6442_v42, %v4263_v27 }
0x23d2   : > { %v4265_v55 = vpop.permute.xlu1 %4264 }
0x23d3   : > { %8420 = vst [vmem:[#allocation23_spill] sm:$0xff] %v7858_v33  ;;  %v7860_v48 = vmul.f32 %v6444_v1, %v4265_v55  ;;  %4302 = vrot.lane.b32.xlu0 %v4300_v6, %s6610_s16  ;;  %v7880_v1 = vld [vmem:[%s8342_s4 + $0x8] sm:$0xff]   ;;  %v8423_v55 = vld [vmem:[#allocation22_spill] sm:$0xff] }
0x23d5   : > { %8421 = vst [vmem:[#allocation26_spill] sm:$0xff] %v7860_v48  ;;  %v4352_v8 = vpack.c.bf16 %v7860_v48, %v7858_v33  ;;  %v8424_v48 = vld [vmem:[#allocation21_spill] sm:$0xff] }
0x23d7   : > { %4354 = vrot.lane.b32.xlu1 %v4352_v8, %s6610_s16 }
0x2445   : > { %v4303_v15 = vpop.permute.xlu0 %4302 }
0x2446   : > { %5885 = vmatmul.mubr.msk.bf16.vlgmr.msra.gmra.mrb[84].mxu0 %vm654_vm1, %v4303_v15 }
0x2447   : > { %5897 = vmatpush3.bf16.msra.mxu0 %v7870_v20  ;;  %5900 = vmatprep.mubr.msk.bf16.mxu0 %vm6608_vm2, %v8399_v62 }
0x2448   : > { %5898 = vmatprep.subr.bf16.mxu0 %v8399_v62 }
0x2449   : > { %v4355_v42 = vpop.permute.xlu1 %4354 }
0x244a   : > { %5893 = vmatmul.mubr.msk.bf16.vlgmr.msra.gmra.mrb[84].mxu1 %vm654_vm1, %v4355_v42 }
0x244b   : > { %5899 = vmatpush3.bf16.msra.mxu0 %v7880_v1  ;;  %5905 = vmatpush3.bf16.msra.mxu1 %v7886_v21 }
0x244c   : > { %5906 = vmatprep.subr.bf16.mxu1 %v8399_v62  ;;  %5908 = vmatprep.mubr.msk.bf16.mxu1 %vm6608_vm2, %v8399_v62 }
0x244d   : > { %5912 = vmatprep.subr.bf16.mxu0 %v8399_v62 }
0x244f   : > { %5907 = vmatpush3.bf16.msra.mxu1 %v7896_v39 }
0x2450   : > { %5920 = vmatprep.subr.bf16.mxu1 %v8399_v62 }
0x2519   : > { %v4341_v37 = vpop.f32.mrb[84].mxu0 }
0x251a   : > { %v4348_v25 = vadd.f32 %v4341_v37, %v8422_v41  ;;  %v5886_v27 = vpop.f32.mrb[85].mxu0 }
0x251b   : > { %v4344_v6 = vpop.f32.mrb[86].mxu0 }
0x251c   : > { %6453 = vtanh.f32 %v4348_v25  ;;  %v4349_v8 = vadd.f32 %v4344_v6, %v8423_v55  ;;  %v5887_v15 = vpop.f32.mrb[87].mxu0 }
0x251d   : > { %v4393_v42 = vpop.f32.mrb[84].mxu1 }
0x251e   : > { %v4400_v33 = vadd.f32 %v4393_v42, %v8424_v48  ;;  %v5894_v28 = vpop.f32.mrb[85].mxu1  ;;  %6455 = vtanh.f32 %v4349_v8  ;;  %v5437_v48 = vmul.f32 -1.442695, %v4349_v8 }
0x251f   : > { %v4396_v9 = vpop.f32.mrb[86].mxu1  ;;  %v5436_v28 = vmul.f32 -1.442695, %v4348_v25 }
0x2520   : > { %v4401_v46 = vadd.f32 %v4396_v9, %v8425_v58  ;;  %v5895_v56 = vpop.f32.mrb[87].mxu1  ;;  %6457 = vtanh.f32 %v4400_v33  ;;  %v5438_v6 = vmul.f32 -1.442695, %v4400_v33 }
0x2522   : > { %6459 = vtanh.f32 %v4401_v46  ;;  %v5439_v56 = vmul.f32 -1.442695, %v4401_v46 }
0x2523   : > { %6461 = vpow2.f32 %v5436_v28 }
0x2524   : > { %6463 = vpow2.f32 %v5437_v48 }
0x2525   : > { %6465 = vpow2.f32 %v5438_v6 }
0x2526   : > { %v6454_v23 = vpop.eup %6453  ;;  %6467 = vpow2.f32 %v5439_v56 }
0x2527   : > { %4420 = vrot.lane.b32.xlu0 %v6454_v23, %s6609_s15 }
0x2528   : > { %v6456_v37 = vpop.eup %6455 }
0x2529   : > { %4422 = vrot.lane.b32.xlu1 %v6456_v37, %s6609_s15 }
0x252a   : > { %v6458_v41 = vpop.eup %6457 }
0x252b   : > { %4468 = vrot.lane.b32.xlu0 %v6458_v41, %s6609_s15 }
0x252c   : > { %v6460_v27 = vpop.eup %6459 }
0x252d   : > { %4470 = vrot.lane.b32.xlu1 %v6460_v27, %s6609_s15  ;;  %v6462_v58 = vpop.eup %6461 }
0x252e   : > { %v6464_v9 = vpop.eup %6463  ;;  %v4408_v23 = vadd.f32 1.0, %v6462_v58 }
0x252f   : > { %v6466_v55 = vpop.eup %6465  ;;  %v4409_v15 = vadd.f32 1.0, %v6464_v9 }
0x2530   : > { %v6468_v42 = vpop.eup %6467  ;;  %6469 = vrcp.f32 %v4408_v23  ;;  %v4456_v37 = vadd.f32 1.0, %v6466_v55 }
0x2531   : > { %6471 = vrcp.f32 %v4409_v15  ;;  %v4457_v41 = vadd.f32 1.0, %v6468_v42 }
0x2532   : > { %6473 = vrcp.f32 %v4456_v37 }
0x2533   : > { %6475 = vrcp.f32 %v4457_v41 }
0x253a   : > { %v6470_v25 = vpop.eup %6469 }
0x253b   : > { %v6472_v33 = vpop.eup %6471  ;;  %v4416_v55 = vmul.f32 %v6470_v25, %v7833_v51 }
0x253c   : > { %v6474_v48 = vpop.eup %6473  ;;  %v4417_v37 = vmul.f32 %v6472_v33, %v7837_v59 }
0x253d   : > { %v6476_v58 = vpop.eup %6475 }
0x2599   : > { %v4421_v8 = vpop.permute.xlu0 %4420 }
0x259a   : > { %v4426_v27 = vmul.f32 %v6470_v25, %v4421_v8 }
0x259b   : > { %v4423_v28 = vpop.permute.xlu1 %4422 }
0x259c   : > { %4430 = vrot.lane.b32.xlu0 %v4426_v27, %s6610_s16  ;;  %v4427_v46 = vmul.f32 %v6472_v33, %v4423_v28  ;;  %v4464_v27 = vmul.f32 %v6474_v48, %v7841_v16 }
0x259d   : > { %v4469_v6 = vpop.permute.xlu0 %4468 }
0x259e   : > { %v4474_v56 = vmul.f32 %v6474_v48, %v4469_v6  ;;  %4432 = vrot.lane.b32.xlu1 %v4427_v46, %s6610_s16  ;;  %v4465_v6 = vmul.f32 %v6476_v58, %v7845_v31 }
0x259f   : > { %v4471_v9 = vpop.permute.xlu1 %4470 }
0x25a0   : > { %v4475_v23 = vmul.f32 %v6476_v58, %v4471_v9  ;;  %4478 = vrot.lane.b32.xlu0 %v4474_v56, %s6610_s16 }
0x25a2   : > { %4480 = vrot.lane.b32.xlu1 %v4475_v23, %s6610_s16 }
0x260e   : > { %v4431_v15 = vpop.permute.xlu0 %4430 }
0x260f   : > { %v7913_v42 = vadd.f32 %v4431_v15, %v4416_v55 }
0x2610   : > { %v4433_v41 = vpop.permute.xlu1 %4432 }
0x2611   : > { %6477 = vtanh.f32 %v7913_v42  ;;  %v7917_v8 = vadd.f32 %v4433_v41, %v4417_v37 }
0x2612   : > { %v4479_v28 = vpop.permute.xlu0 %4478 }
0x2613   : > { %6479 = vtanh.f32 %v7917_v8  ;;  %v7921_v46 = vadd.f32 %v4479_v28, %v4464_v27 }
0x2614   : > { %v4481_v51 = vpop.permute.xlu1 %4480 }
0x2615   : > { %6481 = vtanh.f32 %v7921_v46  ;;  %v7925_v56 = vadd.f32 %v4481_v51, %v4465_v6 }
0x2617   : > { %6483 = vtanh.f32 %v7925_v56 }
0x261b   : > { %v6478_v59 = vpop.eup %6477 }
0x261c   : > { %4442 = vrot.lane.b32.xlu0 %v6478_v59, %s6609_s15 }
0x261d   : > { %v6480_v9 = vpop.eup %6479 }
0x261e   : > { %4444 = vrot.lane.b32.xlu1 %v6480_v9, %s6609_s15 }
0x261f   : > { %v6482_v16 = vpop.eup %6481 }
0x2620   : > { %4490 = vrot.lane.b32.xlu0 %v6482_v16, %s6609_s15 }
0x2621   : > { %v6484_v23 = vpop.eup %6483 }
0x2622   : > { %4492 = vrot.lane.b32.xlu1 %v6484_v23, %s6609_s15  ;;  %v8427_v23 = vld [vmem:[#allocation32_spill] sm:$0xff] }
0x268e   : > { %v4443_v31 = vpop.permute.xlu0 %4442 }
0x268f   : > { %v7932_v15 = vmul.f32 %v6470_v25, %v4443_v31 }
0x2690   : > { %v4445_v55 = vpop.permute.xlu1 %4444 }
0x2691   : > { %v7934_v37 = vmul.f32 %v6472_v33, %v4445_v55 }
0x2692   : > { %v4491_v41 = vpop.permute.xlu0 %4490 }
0x2693   : > { %v4528_v27 = vpack.c.bf16 %v7934_v37, %v7932_v15  ;;  %v7938_v6 = vmul.f32 %v6474_v48, %v4491_v41  ;;  %v8426_v48 = vld [vmem:[#allocation28_spill] sm:$0xff] }
0x2694   : > { %v4493_v28 = vpop.permute.xlu1 %4492 }
0x2695   : > { %v7940_v51 = vmul.f32 %v6476_v58, %v4493_v28  ;;  %4530 = vrot.lane.b32.xlu0 %v4528_v27, %s6610_s16 }
0x2697   : > { %v4580_v59 = vpack.c.bf16 %v7940_v51, %v7938_v6 }
0x2699   : > { %4582 = vrot.lane.b32.xlu1 %v4580_v59, %s6610_s16  ;;  %v8429_v59 = vld [vmem:[#allocation34_spill] sm:$0xff] }
0x2707   : > { %v4531_v25 = vpop.permute.xlu0 %4530 }
0x2708   : > { %5901 = vmatmul.mubr.msk.bf16.vlgmr.msra.gmra.mrb[88].mxu0 %vm654_vm1, %v4531_v25 }
0x2709   : > { %5913 = vmatpush3.bf16.msra.mxu0 %v7870_v20  ;;  %5916 = vmatprep.mubr.msk.bf16.mxu0 %vm6608_vm2, %v8399_v62 }
0x270a   : > { %5914 = vmatprep.subr.bf16.mxu0 %v8399_v62 }
0x270b   : > { %v4583_v33 = vpop.permute.xlu1 %4582 }
0x270c   : > { %5909 = vmatmul.mubr.msk.bf16.vlgmr.msra.gmra.mrb[88].mxu1 %vm654_vm1, %v4583_v33 }
0x270d   : > { %5915 = vmatpush3.bf16.msra.mxu0 %v7880_v1  ;;  %5921 = vmatpush3.bf16.msra.mxu1 %v7886_v21  ;;  %v8428_v1 = vld [vmem:[#allocation31_spill] sm:$0xff] }
0x270e   : > { %5922 = vmatprep.subr.bf16.mxu1 %v8399_v62  ;;  %5924 = vmatprep.mubr.msk.bf16.mxu1 %vm6608_vm2, %v8399_v62 }
0x2711   : > { %5923 = vmatpush3.bf16.msra.mxu1 %v7896_v39 }
0x27db   : > { %v4569_v20 = vpop.f32.mrb[88].mxu0 }
0x27dc   : > { %v4576_v58 = vadd.f32 %v4569_v20, %v8426_v48  ;;  %v5902_v9 = vpop.f32.mrb[89].mxu0 }
0x27dd   : > { %v4572_v16 = vpop.f32.mrb[90].mxu0 }
0x27de   : > { %6485 = vtanh.f32 %v4576_v58  ;;  %v4577_v31 = vadd.f32 %v4572_v16, %v8427_v23  ;;  %v5903_v55 = vpop.f32.mrb[91].mxu0  ;;  %v5442_v9 = vmul.f32 -1.442695, %v4576_v58 }
0x27df   : > { %v4621_v41 = vpop.f32.mrb[88].mxu1 }
0x27e0   : > { %v4628_v27 = vadd.f32 %v4621_v41, %v8428_v1  ;;  %v5910_v21 = vpop.f32.mrb[89].mxu1  ;;  %6487 = vtanh.f32 %v4577_v31  ;;  %v5443_v16 = vmul.f32 -1.442695, %v4577_v31 }
0x27e1   : > { %v4624_v28 = vpop.f32.mrb[90].mxu1 }
0x27e2   : > { %v4629_v25 = vadd.f32 %v4624_v28, %v8429_v59  ;;  %v5911_v62 = vpop.f32.mrb[91].mxu1  ;;  %6489 = vtanh.f32 %v4628_v27  ;;  %v5444_v23 = vmul.f32 -1.442695, %v4628_v27 }
0x27e4   : > { %6491 = vtanh.f32 %v4629_v25  ;;  %v5445_v55 = vmul.f32 -1.442695, %v4629_v25 }
0x27e5   : > { %6493 = vpow2.f32 %v5442_v9 }
0x27e6   : > { %6495 = vpow2.f32 %v5443_v16 }
0x27e7   : > { %6497 = vpow2.f32 %v5444_v23 }
0x27e8   : > { %v6486_v39 = vpop.eup %6485  ;;  %6499 = vpow2.f32 %v5445_v55 }
0x27e9   : > { %4648 = vrot.lane.b32.xlu0 %v6486_v39, %s6609_s15 }
0x27ea   : > { %v6488_v33 = vpop.eup %6487 }
0x27eb   : > { %4650 = vrot.lane.b32.xlu1 %v6488_v33, %s6609_s15 }
0x27ec   : > { %v6490_v20 = vpop.eup %6489 }
0x27ed   : > { %4696 = vrot.lane.b32.xlu0 %v6490_v20, %s6609_s15 }
0x27ee   : > { %v6492_v48 = vpop.eup %6491 }
0x27ef   : > { %4698 = vrot.lane.b32.xlu1 %v6492_v48, %s6609_s15  ;;  %v6494_v41 = vpop.eup %6493 }
0x27f0   : > { %v6496_v1 = vpop.eup %6495  ;;  %v4636_v21 = vadd.f32 1.0, %v6494_v41 }
0x27f1   : > { %v6498_v28 = vpop.eup %6497  ;;  %v4637_v59 = vadd.f32 1.0, %v6496_v1 }
0x27f2   : > { %v6500_v62 = vpop.eup %6499  ;;  %6501 = vrcp.f32 %v4636_v21  ;;  %v4684_v39 = vadd.f32 1.0, %v6498_v28 }
0x27f3   : > { %6503 = vrcp.f32 %v4637_v59  ;;  %v4685_v33 = vadd.f32 1.0, %v6500_v62 }
0x27f4   : > { %6505 = vrcp.f32 %v4684_v39 }
0x27f5   : > { %6507 = vrcp.f32 %v4685_v33 }
0x27fc   : > { %v6502_v58 = vpop.eup %6501 }
0x27fd   : > { %v6504_v27 = vpop.eup %6503  ;;  %v4644_v21 = vmul.f32 %v6502_v58, %v7913_v42 }
0x27fe   : > { %v6506_v9 = vpop.eup %6505  ;;  %v4645_v62 = vmul.f32 %v6504_v27, %v7917_v8 }
0x27ff   : > { %v6508_v55 = vpop.eup %6507 }
0x285b   : > { %v4649_v31 = vpop.permute.xlu0 %4648 }
0x285c   : > { %v4654_v20 = vmul.f32 %v6502_v58, %v4649_v31  ;;  %v4692_v31 = vmul.f32 %v6506_v9, %v7921_v46 }
0x285d   : > { %v4651_v48 = vpop.permute.xlu1 %4650 }
0x285e   : > { %4658 = vrot.lane.b32.xlu0 %v4654_v20, %s6610_s16  ;;  %v4655_v25 = vmul.f32 %v6504_v27, %v4651_v48 }
0x285f   : > { %v4697_v16 = vpop.permute.xlu0 %4696 }
0x2860   : > { %v4702_v23 = vmul.f32 %v6506_v9, %v4697_v16  ;;  %4660 = vrot.lane.b32.xlu1 %v4655_v25, %s6610_s16  ;;  %v4693_v25 = vmul.f32 %v6508_v55, %v7925_v56 }
0x2861   : > { %v4699_v41 = vpop.permute.xlu1 %4698 }
0x2862   : > { %v4703_v1 = vmul.f32 %v6508_v55, %v4699_v41  ;;  %4706 = vrot.lane.b32.xlu0 %v4702_v23, %s6610_s16 }
0x2864   : > { %4708 = vrot.lane.b32.xlu1 %v4703_v1, %s6610_s16 }
0x28d0   : > { %v4659_v28 = vpop.permute.xlu0 %4658 }
0x28d1   : > { %v7971_v59 = vadd.f32 %v4659_v28, %v4644_v21 }
0x28d2   : > { %v4661_v39 = vpop.permute.xlu1 %4660 }
0x28d3   : > { %6509 = vtanh.f32 %v7971_v59  ;;  %v7975_v33 = vadd.f32 %v4661_v39, %v4645_v62 }
0x28d4   : > { %v4707_v20 = vpop.permute.xlu0 %4706 }
0x28d5   : > { %6511 = vtanh.f32 %v7975_v33  ;;  %v7979_v48 = vadd.f32 %v4707_v20, %v4692_v31 }
0x28d6   : > { %v4709_v42 = vpop.permute.xlu1 %4708 }
0x28d7   : > { %6513 = vtanh.f32 %v7979_v48  ;;  %v7983_v16 = vadd.f32 %v4709_v42, %v4693_v25 }
0x28d9   : > { %6515 = vtanh.f32 %v7983_v16 }
0x28dd   : > { %v6510_v8 = vpop.eup %6509 }
0x28de   : > { %4670 = vrot.lane.b32.xlu0 %v6510_v8, %s6609_s15  ;;  %v6611_v8 = vmov 0  }
0x28df   : > { %v6512_v23 = vpop.eup %6511  ;;  %5995 = vset.pattern.permute.xlu0 %v6611_v8  ;;  %5996 = vset.pattern.permute.xlu1 %v6611_v8 }
0x28e0   : > { %4672 = vrot.lane.b32.xlu1 %v6512_v23, %s6609_s15  ;;  %v8434_v23 = vld [vmem:[#allocation27_spill] sm:$0xff] }
0x28e1   : > { %v6514_v46 = vpop.eup %6513 }
0x28e2   : > { %4718 = vrot.lane.b32.xlu0 %v6514_v46, %s6609_s15 }
0x28e3   : > { %v6516_v41 = vpop.eup %6515 }
0x28e4   : > { %4720 = vrot.lane.b32.xlu1 %v6516_v41, %s6609_s15 }
0x2950   : > { %v4671_v56 = vpop.permute.xlu0 %4670 }
0x2951   : > { %v7990_v21 = vmul.f32 %v6502_v58, %v4671_v56  ;;  %v8435_v56 = vld [vmem:[#allocation30_spill] sm:$0xff] }
0x2952   : > { %v4673_v1 = vpop.permute.xlu1 %4672 }
0x2953   : > { %8430 = vst [vmem:[#allocation19_spill] sm:$0xff] %v7990_v21  ;;  %v7992_v28 = vmul.f32 %v6504_v27, %v4673_v1 }
0x2954   : > { %v4719_v62 = vpop.permute.xlu0 %4718 }
0x2955   : > { %8431 = vst [vmem:[#allocation22_spill] sm:$0xff] %v7992_v28  ;;  %v4756_v39 = vpack.c.bf16 %v7992_v28, %v7990_v21  ;;  %v7996_v20 = vmul.f32 %v6506_v9, %v4719_v62 }
0x2956   : > { %v4721_v31 = vpop.permute.xlu1 %4720 }
0x2957   : > { %8432 = vst [vmem:[#allocation21_spill] sm:$0xff] %v7996_v20  ;;  %v7998_v25 = vmul.f32 %v6508_v55, %v4721_v31  ;;  %4758 = vrot.lane.b32.xlu0 %v4756_v39, %s6610_s16  ;;  %v8436_v31 = vld [vmem:[#allocation29_spill] sm:$0xff] }
0x2959   : > { %8433 = vst [vmem:[#allocation25_spill] sm:$0xff] %v7998_v25  ;;  %v4808_v42 = vpack.c.bf16 %v7998_v25, %v7996_v20  ;;  %v8437_v25 = vld [vmem:[#allocation33_spill] sm:$0xff] }
0x295b   : > { %4810 = vrot.lane.b32.xlu1 %v4808_v42, %s6610_s16 }
0x29c9   : > { %v4759_v58 = vpop.permute.xlu0 %4758 }
0x29ca   : > { %5917 = vmatmul.mubr.msk.bf16.vlgmr.msra.gmra.mrb[92].mxu0 %vm654_vm1, %v4759_v58 }
0x29cd   : > { %v4811_v27 = vpop.permute.xlu1 %4810 }
0x29ce   : > { %5925 = vmatmul.mubr.msk.bf16.vlgmr.msra.gmra.mrb[92].mxu1 %vm654_vm1, %v4811_v27 }
0x2a9d   : > { %v4797_v9 = vpop.f32.mrb[92].mxu0 }
0x2a9e   : > { %v4804_v55 = vadd.f32 %v4797_v9, %v8434_v23  ;;  %v5918_v46 = vpop.f32.mrb[93].mxu0 }
0x2a9f   : > { %v4800_v41 = vpop.f32.mrb[94].mxu0 }
0x2aa0   : > { %6517 = vtanh.f32 %v4804_v55  ;;  %v4805_v1 = vadd.f32 %v4800_v41, %v8435_v56  ;;  %v5919_v62 = vpop.f32.mrb[95].mxu0  ;;  %v1280_v56 = vld [vmem:[%s6726_s23] sm:$0xff] }
0x2aa1   : > { %v4849_v39 = vpop.f32.mrb[92].mxu1  ;;  %v1281_v62 = vld [vmem:[%s6726_s23 + $0x8] sm:$0xff]  ;;  %s1762_s23 = sadd.s32 1, %s8017_s18 }
0x2aa2   : > { %v4856_v42 = vadd.f32 %v4849_v39, %v8436_v31  ;;  %v5926_v58 = vpop.f32.mrb[93].mxu1  ;;  %6519 = vtanh.f32 %v4805_v1  ;;  %v5448_v39 = vmul.f32 -1.442695, %v4804_v55 }
0x2aa3   : > { %v4852_v27 = vpop.f32.mrb[94].mxu1 }
0x2aa4   : > { %v4857_v20 = vadd.f32 %v4852_v27, %v8437_v25  ;;  %v5927_v8 = vpop.f32.mrb[95].mxu1  ;;  %6521 = vtanh.f32 %v4856_v42  ;;  %v5449_v25 = vmul.f32 -1.442695, %v4805_v1  ;;  %v5450_v27 = vmul.f32 -1.442695, %v4856_v42 }
0x2aa6   : > { %6523 = vtanh.f32 %v4857_v20  ;;  %v5451_v31 = vmul.f32 -1.442695, %v4857_v20 }
0x2aa7   : > { %6525 = vpow2.f32 %v5449_v25 }
0x2aa8   : > { %6527 = vpow2.f32 %v5448_v39 }
0x2aa9   : > { %6529 = vpow2.f32 %v5451_v31 }
0x2aaa   : > { %v6518_v9 = vpop.eup %6517  ;;  %6531 = vpow2.f32 %v5450_v27  ;;  %v1763_v27 = vstv %s1762_s23  ;;  %s4726_s23 = sadd.s32 14, %s8017_s18 }
0x2aab   : > { %4876 = vrot.lane.b32.xlu0 %v6518_v9, %s6609_s15 }
0x2aac   : > { %v6520_v23 = vpop.eup %6519 }
0x2aad   : > { %4878 = vrot.lane.b32.xlu1 %v6520_v23, %s6609_s15 }
0x2aae   : > { %v6522_v46 = vpop.eup %6521 }
0x2aaf   : > { %4924 = vrot.lane.b32.xlu0 %v6522_v46, %s6609_s15  ;;  %v1535_v46 = vstv %s8017_s18 }
0x2ab0   : > { %v6524_v41 = vpop.eup %6523 }
0x2ab1   : > { %4926 = vrot.lane.b32.xlu1 %v6524_v41, %s6609_s15  ;;  %v6526_v41 = vpop.eup %6525 }
0x2ab2   : > { %v6528_v1 = vpop.eup %6527  ;;  %v4865_v55 = vadd.f32 1.0, %v6526_v41 }
0x2ab3   : > { %1283 = vperm.xlu0 %5995, %v1280_v56   ;;  %v6530_v25 = vpop.eup %6529  ;;  %v4864_v39 = vadd.f32 1.0, %v6528_v1 }
0x2ab4   : > { %v6532_v28 = vpop.eup %6531  ;;  %6533 = vrcp.f32 %v4865_v55  ;;  %v4913_v41 = vadd.f32 1.0, %v6530_v25 }
0x2ab5   : > { %1286 = vperm.xlu1 %5996, %v1281_v62   ;;  %6535 = vrcp.f32 %v4864_v39  ;;  %v2219_v39 = vstv %s2218_s22  ;;  %s4954_s22 = sadd.s32 15, %s8017_s18 }
0x2ab6   : > { %6537 = vrcp.f32 %v4913_v41  ;;  %v2675_v41 = vstv %s2674_s24 }
0x2b1d   : > { %v4877_v58 = vpop.permute.xlu0 %4876 }
0x2b1f   : > { %v4879_v8 = vpop.permute.xlu1 %4878 }
0x2b21   : > { %v4925_v9 = vpop.permute.xlu0 %4924 }
0x2b23   : > { %v4927_v23 = vpop.permute.xlu1 %4926 }
0x2b32   : > { %v8020_v56 = vpop.permute.xlu0 %1283 }
0x2b33   : > { %vm8023_vm3 = vcmp.lt.s32.totalorder %v1535_v46, %v8020_v56  ;;  %vm1764_vm5 = vcmp.lt.s32.totalorder %v1763_v27, %v8020_v56  ;;  %vm2220_vm9 = vcmp.lt.s32.totalorder %v2219_v39, %v8020_v56  ;;  %vm2676_vm13 = vcmp.lt.s32.totalorder %v2675_v41, %v8020_v56 }
0x2b34   : > { %v8028_v42 = vpop.permute.xlu1 %1286  ;;  %v1538_v62 = vsel %vm8023_vm3, %v7092_v53, -10000.0  ;;  %v1550_v21 = vsel %vm8023_vm3, %v7098_v54, -10000.0  ;;  %v4912_v53 = vadd.f32 1.0, %v6532_v28  ;;  %v8051_v28 = vpop.eup %6533 }
0x2b35   : > { %1542 = vrot.lane.b32.xlu1 %v1538_v62, %s6610_s16  ;;  %vm1537_vm4 = vcmp.lt.s32.totalorder %v1535_v46, %v8028_v42  ;;  %v8440_v46 = vld [vmem:[#allocation35_spill] sm:$0xff]  ;;  %vm1765_vm6 = vcmp.lt.s32.totalorder %v1763_v27, %v8028_v42  ;;  %v4883_v55 = vmul.f32 %v8051_v28, %v4879_v8  ;;  %vm2221_vm10 = vcmp.lt.s32.totalorder %v2219_v39, %v8028_v42  ;;  %v1300_v39 = vld [vmem:[#allocation9 + $0x8] sm:$0xff] }
0x2b36   : > { %v1539_v31 = vsel %vm1537_vm4, %v7094_v49, -10000.0  ;;  %v1551_v1 = vsel %vm1537_vm4, %v8440_v46, -10000.0  ;;  %v1766_v49 = vsel %vm1764_vm5, %v7152_v2, -10000.0  ;;  %6539 = vrcp.f32 %v4912_v53  ;;  %v8057_v2 = vpop.eup %6535 }
0x2b37   : > { %1544 = vrot.lane.b32.xlu0 %v1539_v31, %s6610_s16  ;;  %v1767_v54 = vsel %vm1765_vm6, %v7154_v52, -10000.0  ;;  %v1779_v20 = vsel %vm1765_vm6, %v7160_v57, -10000.0  ;;  %v4882_v52 = vmul.f32 %v8057_v2, %v4877_v58  ;;  %v8061_v62 = vpop.eup %6537  ;;  %v2447_v27 = vstv %s2446_s28 }
0x2b38   : > { %v4931_v25 = vmul.f32 %v8061_v62, %v4927_v23  ;;  %vm2448_vm11 = vcmp.lt.s32.totalorder %v2447_v27, %v8020_v56  ;;  %vm2449_vm12 = vcmp.lt.s32.totalorder %v2447_v27, %v8028_v42  ;;  %vm2677_vm14 = vcmp.lt.s32.totalorder %v2675_v41, %v8028_v42 }
0x2b39   : > { %1554 = vrot.lane.b32.xlu1 %v1550_v21, %s6610_s16  ;;  %v1778_v21 = vsel %vm1764_vm5, %v7158_v34, -10000.0  ;;  %v1991_v34 = vstv %s1990_s19  ;;  %v2903_v53 = vstv %s2902_s26  ;;  %v3131_v46 = vstv %s3130_s27  ;;  %s6612_s19 = smov 96  }
0x2b3a   : > { %vm1992_vm7 = vcmp.lt.s32.totalorder %v1991_v34, %v8020_v56  ;;  %vm1993_vm8 = vcmp.lt.s32.totalorder %v1991_v34, %v8028_v42  ;;  %vm2904_vm15 = vcmp.lt.s32.totalorder %v2903_v53, %v8020_v56  ;;  %vm2905_vm0 = vcmp.lt.s32.totalorder %v2903_v53, %v8028_v42  ;;  %v1298_v34 = vld [vmem:[#allocation8 + $0x8] sm:$0xff] }
0x2b3b   : > { %1556 = vrot.lane.b32.xlu0 %v1551_v1, %s6610_s16  ;;  %v1994_v58 = vsel %vm1992_vm7, %v7212_v14, -10000.0  ;;  %v1995_v23 = vsel %vm1993_vm8, %v7214_v13, -10000.0  ;;  %v2007_v31 = vsel %vm1993_vm8, %v7220_v50, -10000.0  ;;  %v2222_v14 = vsel %vm2220_vm9, %v7292_v29, -10000.0 }
0x2b3c   : > { %v2223_v13 = vsel %vm2221_vm10, %v7294_v0, -10000.0  ;;  %v2235_v50 = vsel %vm2221_vm10, %v7300_v11, -10000.0  ;;  %v2450_v29 = vsel %vm2448_vm11, %v7352_v43, -10000.0  ;;  %v2451_v0 = vsel %vm2449_vm12, %v7354_v22, -10000.0 }
0x2b3d   : > { %1770 = vrot.lane.b32.xlu1 %v1766_v49, %s6610_s16  ;;  %v2463_v11 = vsel %vm2449_vm12, %v7360_v3, -10000.0  ;;  %v2678_v43 = vsel %vm2676_vm13, %v7412_v61, -10000.0  ;;  %v2679_v22 = vsel %vm2677_vm14, %v7414_v19, -10000.0  ;;  %v2691_v3 = vsel %vm2677_vm14, %v7420_v18, -10000.0 }
0x2b3e   : > { %v2906_v61 = vsel %vm2904_vm15, %v7472_v24, -10000.0  ;;  %v2907_v19 = vsel %vm2905_vm0, %v7474_v40, -10000.0  ;;  %vm3132_vm2 = vcmp.lt.s32.totalorder %v3131_v46, %v8020_v56  ;;  %v2919_v18 = vsel %vm2905_vm0, %v7480_v36, -10000.0 }
0x2b3f   : > { %1772 = vrot.lane.b32.xlu0 %v1767_v54, %s6610_s16  ;;  %vm3133_vm3 = vcmp.lt.s32.totalorder %v3131_v46, %v8028_v42  ;;  %v3134_v24 = vsel %vm3132_vm2, %v7532_v44, -10000.0  ;;  %v3359_v1 = vstv %s3358_s29  ;;  %v3587_v49 = vstv %s3586_s17  ;;  %v8441_v54 = vld [vmem:[#allocation36_spill] sm:$0xff] }
0x2b40   : > { %v8065_v57 = vpop.eup %6539  ;;  %v3135_v40 = vsel %vm3133_vm3, %v7534_v7, -10000.0  ;;  %vm3360_vm4 = vcmp.lt.s32.totalorder %v3359_v1, %v8020_v56  ;;  %v3147_v36 = vsel %vm3133_vm3, %v7540_v30, -10000.0  ;;  %vm3361_vm5 = vcmp.lt.s32.totalorder %v3359_v1, %v8028_v42 }
0x2b41   : > { %1782 = vrot.lane.b32.xlu1 %v1778_v21, %s6610_s16  ;;  %v4930_v8 = vmul.f32 %v8065_v57, %v4925_v9  ;;  %v2006_v9 = vsel %vm1992_vm7, %v7218_v47, -10000.0  ;;  %v2234_v47 = vsel %vm2220_vm9, %v7298_v45, -10000.0  ;;  %v2462_v45 = vsel %vm2448_vm11, %v7358_v60, -10000.0 }
0x2b42   : > { %v2690_v60 = vsel %vm2676_vm13, %v7418_v10, -10000.0  ;;  %v2918_v10 = vsel %vm2904_vm15, %v7478_v12, -10000.0  ;;  %v3146_v12 = vsel %vm3132_vm2, %v7538_v35, -10000.0  ;;  %v3362_v44 = vsel %vm3360_vm4, %v7612_v5, -10000.0 }
0x2b43   : > { %1784 = vrot.lane.b32.xlu0 %v1779_v20, %s6610_s16  ;;  %v3363_v7 = vsel %vm3361_vm5, %v7614_v4, -10000.0  ;;  %v3374_v35 = vsel %vm3360_vm4, %v7618_v17, -10000.0  ;;  %vm3588_vm6 = vcmp.lt.s32.totalorder %v3587_v49, %v8020_v56  ;;  %v3375_v30 = vsel %vm3361_vm5, %v7620_v38, -10000.0 }
0x2b44   : > { %vm3589_vm7 = vcmp.lt.s32.totalorder %v3587_v49, %v8028_v42  ;;  %v3590_v5 = vsel %vm3588_vm6, %v7672_v32, -10000.0  ;;  %v3602_v17 = vsel %vm3588_vm6, %v7678_v26, -10000.0  ;;  %vm6614_vm5 = vmmov (!%p5452_p9), 0  }
0x2b45   : > { %4888 = vrot.lane.b32.xlu1 %v4883_v55, %s6610_s16  ;;  %v3591_v4 = vsel %vm3589_vm7, %v7674_v63, -10000.0  ;;  %v3603_v21 = vsel %vm3589_vm7, %v8441_v54, -10000.0  ;;  %v1297_v55 = vld [vmem:[#allocation8] sm:$0xff] }
0x2b47   : > { %4886 = vrot.lane.b32.xlu0 %v4882_v52, %s6610_s16 }
0x2b49   : > { %4936 = vrot.lane.b32.xlu1 %v4931_v25, %s6610_s16 }
0x2b4b   : > { %4934 = vrot.lane.b32.xlu0 %v4930_v8, %s6610_s16  ;;  %v1299_v8 = vld [vmem:[#allocation9] sm:$0xff] }
0x2b4d   : > { %1998 = vrot.lane.b32.xlu1 %v1994_v58, %s6610_s16 }
0x2b4f   : > { %2000 = vrot.lane.b32.xlu0 %v1995_v23, %s6610_s16 }
0x2b51   : > { %2010 = vrot.lane.b32.xlu1 %v2006_v9, %s6610_s16 }
0x2b53   : > { %2012 = vrot.lane.b32.xlu0 %v2007_v31, %s6610_s16 }
0x2b55   : > { %2226 = vrot.lane.b32.xlu1 %v2222_v14, %s6610_s16 }
0x2b57   : > { %2228 = vrot.lane.b32.xlu0 %v2223_v13, %s6610_s16 }
0x2b59   : > { %2238 = vrot.lane.b32.xlu1 %v2234_v47, %s6610_s16 }
0x2b5b   : > { %2240 = vrot.lane.b32.xlu0 %v2235_v50, %s6610_s16 }
0x2b5d   : > { %2454 = vrot.lane.b32.xlu1 %v2450_v29, %s6610_s16  ;;  %v4873_v29 = vmul.f32 %v8051_v28, %v7975_v33  ;;  %v4920_v33 = vmul.f32 %v8065_v57, %v7979_v48 }
0x2b5f   : > { %2456 = vrot.lane.b32.xlu0 %v2451_v0, %s6610_s16 }
0x2b61   : > { %2466 = vrot.lane.b32.xlu1 %v2462_v45, %s6610_s16  ;;  %v4872_v45 = vmul.f32 %v8057_v2, %v7971_v59 }
0x2b63   : > { %2468 = vrot.lane.b32.xlu0 %v2463_v11, %s6610_s16 }
0x2b65   : > { %2682 = vrot.lane.b32.xlu1 %v2678_v43, %s6610_s16 }
0x2b67   : > { %2684 = vrot.lane.b32.xlu0 %v2679_v22, %s6610_s16  ;;  %v4921_v22 = vmul.f32 %v8061_v62, %v7983_v16 }
0x2b69   : > { %2694 = vrot.lane.b32.xlu1 %v2690_v60, %s6610_s16 }
0x2b6b   : > { %2696 = vrot.lane.b32.xlu0 %v2691_v3, %s6610_s16 }
0x2b6d   : > { %2910 = vrot.lane.b32.xlu1 %v2906_v61, %s6610_s16 }
0x2b6f   : > { %2912 = vrot.lane.b32.xlu0 %v2907_v19, %s6610_s16 }
0x2b71   : > { %2922 = vrot.lane.b32.xlu1 %v2918_v10, %s6610_s16 }
0x2b73   : > { %2924 = vrot.lane.b32.xlu0 %v2919_v18, %s6610_s16 }
0x2b75   : > { %3138 = vrot.lane.b32.xlu1 %v3134_v24, %s6610_s16 }
0x2b77   : > { %3140 = vrot.lane.b32.xlu0 %v3135_v40, %s6610_s16 }
0x2b79   : > { %3150 = vrot.lane.b32.xlu1 %v3146_v12, %s6610_s16  ;;  %v3815_v12 = vstv %s3814_s20 }
0x2b7a   : > { %vm3816_vm8 = vcmp.lt.s32.totalorder %v3815_v12, %v8020_v56  ;;  %vm3817_vm9 = vcmp.lt.s32.totalorder %v3815_v12, %v8028_v42 }
0x2b7b   : > { %3152 = vrot.lane.b32.xlu0 %v3147_v36, %s6610_s16 }
0x2b7d   : > { %3366 = vrot.lane.b32.xlu1 %v3362_v44, %s6610_s16 }
0x2b7f   : > { %3368 = vrot.lane.b32.xlu0 %v3363_v7, %s6610_s16 }
0x2b81   : > { %3378 = vrot.lane.b32.xlu1 %v3374_v35, %s6610_s16 }
0x2b83   : > { %3380 = vrot.lane.b32.xlu0 %v3375_v30, %s6610_s16 }
0x2b85   : > { %3594 = vrot.lane.b32.xlu1 %v3590_v5, %s6610_s16 }
0x2b87   : > { %3596 = vrot.lane.b32.xlu0 %v3591_v4, %s6610_s16 }
0x2b89   : > { %3606 = vrot.lane.b32.xlu1 %v3602_v17, %s6610_s16  ;;  %v8442_v17 = vld [vmem:[#allocation18_spill] sm:$0xff] }
0x2b8a   : > { %v3818_v54 = vsel %vm3816_vm8, %v8442_v17, -10000.0 }
0x2b8b   : > { %3608 = vrot.lane.b32.xlu0 %v3603_v21, %s6610_s16 }
0x2ba7   : > { %v1543_v38 = vpop.permute.xlu1 %1542 }
0x2ba8   : > { %v1548_v25 = vmax.f32 %v1297_v55, %v1543_v38 }
0x2ba9   : > { %v1545_v20 = vpop.permute.xlu0 %1544 }
0x2baa   : > { %v1549_v63 = vmax.f32 %v1298_v34, %v1545_v20  ;;  %v8443_v20 = vld [vmem:[#allocation37_spill] sm:$0xff] }
0x2bab   : > { %v1555_v52 = vpop.permute.xlu1 %1554  ;;  %v3819_v55 = vsel %vm3817_vm9, %v8443_v20, -10000.0 }
0x2bac   : > { %v1560_v26 = vmax.f32 %v1299_v8, %v1555_v52  ;;  %v4043_v52 = vstv %s4042_s13 }
0x2bad   : > { %v1557_v32 = vpop.permute.xlu0 %1556  ;;  %vm4044_vm10 = vcmp.lt.s32.totalorder %v4043_v52, %v8020_v56  ;;  %vm4045_vm11 = vcmp.lt.s32.totalorder %v4043_v52, %v8028_v42 }
0x2bae   : > { %v1561_v13 = vmax.f32 %v1300_v39, %v1557_v32 }
0x2baf   : > { %v1771_v58 = vpop.permute.xlu1 %1770 }
0x2bb0   : > { %v1776_v23 = vmax.f32 %v1548_v25, %v1771_v58  ;;  %v8444_v25 = vld [vmem:[#allocation38_spill] sm:$0xff] }
0x2bb1   : > { %v1773_v9 = vpop.permute.xlu0 %1772  ;;  %v3830_v8 = vsel %vm3816_vm8, %v8444_v25, -10000.0 }
0x2bb2   : > { %v1777_v31 = vmax.f32 %v1549_v63, %v1773_v9 }
0x2bb3   : > { %v1783_v14 = vpop.permute.xlu1 %1782 }
0x2bb4   : > { %v1788_v27 = vmax.f32 %v1560_v26, %v1783_v14 }
0x2bb5   : > { %v1785_v47 = vpop.permute.xlu0 %1784 }
0x2bb6   : > { %v1789_v50 = vmax.f32 %v1561_v13, %v1785_v47  ;;  %v8447_v47 = vld [vmem:[#allocation16_spill] sm:$0xff] }
0x2bb7   : > { %v4889_v0 = vpop.permute.xlu1 %4888 }
0x2bb8   : > { %v8159_v41 = vadd.f32 %v4889_v0, %v4873_v29 }
0x2bb9   : > { %v4887_v11 = vpop.permute.xlu0 %4886 }
0x2bba   : > { %6541 = vtanh.f32 %v8159_v41  ;;  %v8164_v43 = vadd.f32 %v4887_v11, %v4872_v45  ;;  %v8448_v11 = vld [vmem:[#allocation15_spill] sm:$0xff] }
0x2bbb   : > { %v4937_v53 = vpop.permute.xlu1 %4936 }
0x2bbc   : > { %6543 = vtanh.f32 %v8164_v43  ;;  %v8169_v60 = vadd.f32 %v4937_v53, %v4921_v22  ;;  %v4058_v22 = vsel %vm4044_vm10, %v8448_v11, -10000.0 }
0x2bbd   : > { %v4935_v3 = vpop.permute.xlu0 %4934 }
0x2bbe   : > { %6545 = vtanh.f32 %v8169_v60  ;;  %v8174_v59 = vadd.f32 %v4935_v3, %v4920_v33  ;;  %v8449_v3 = vld [vmem:[#allocation17_spill] sm:$0xff] }
0x2bbf   : > { %v1999_v61 = vpop.permute.xlu1 %1998 }
0x2bc0   : > { %6547 = vtanh.f32 %v8174_v59  ;;  %v2004_v19 = vmax.f32 %v1776_v23, %v1999_v61  ;;  %v8445_v23 = vld [vmem:[#allocation39_spill] sm:$0xff]  ;;  %v4059_v61 = vsel %vm4045_vm11, %v8449_v3, -10000.0 }
0x2bc1   : > { %v2001_v46 = vpop.permute.xlu0 %2000  ;;  %v3831_v39 = vsel %vm3817_vm9, %v8445_v23, -10000.0 }
0x2bc2   : > { %v2005_v10 = vmax.f32 %v1777_v31, %v2001_v46  ;;  %v8446_v31 = vld [vmem:[#allocation14_spill] sm:$0xff] }
0x2bc3   : > { %v2011_v16 = vpop.permute.xlu1 %2010  ;;  %v4046_v14 = vsel %vm4044_vm10, %v8446_v31, -10000.0 }
0x2bc4   : > { %v6542_v18 = vpop.eup %6541  ;;  %v2016_v24 = vmax.f32 %v1788_v27, %v2011_v16 }
0x2bc5   : > { %v2013_v40 = vpop.permute.xlu0 %2012  ;;  %4900 = vrot.lane.b32.xlu1 %v6542_v18, %s6609_s15 }
0x2bc6   : > { %v6544_v48 = vpop.eup %6543  ;;  %v2017_v1 = vmax.f32 %v1789_v50, %v2013_v40  ;;  %v4047_v50 = vsel %vm4045_vm11, %v8447_v47, -10000.0  ;;  %v8451_v40 = vld [vmem:[#allocation24_spill] sm:$0xff] }
0x2bc7   : > { %4898 = vrot.lane.b32.xlu0 %v6544_v48, %s6609_s15  ;;  %v2227_v36 = vpop.permute.xlu1 %2226 }
0x2bc8   : > { %v6546_v44 = vpop.eup %6545  ;;  %v2232_v7 = vmax.f32 %v2004_v19, %v2227_v36 }
0x2bc9   : > { %v2229_v49 = vpop.permute.xlu0 %2228  ;;  %4948 = vrot.lane.b32.xlu1 %v6546_v44, %s6609_s15  ;;  %v8452_v44 = vld [vmem:[#allocation23_spill] sm:$0xff] }
0x2bca   : > { %v6548_v35 = vpop.eup %6547  ;;  %v2233_v30 = vmax.f32 %v2005_v10, %v2229_v49  ;;  %v8450_v10 = vld [vmem:[#allocation20_spill] sm:$0xff] }
0x2bcb   : > { %4946 = vrot.lane.b32.xlu0 %v6548_v35, %s6609_s15  ;;  %v2239_v5 = vpop.permute.xlu1 %2238  ;;  %s4270_s15 = sadd.s32 12, %s8017_s18 }
0x2bcc   : > { %v2244_v4 = vmax.f32 %v2016_v24, %v2239_v5  ;;  %v4271_v29 = vstv %s4270_s15 }
0x2bcd   : > { %v2241_v21 = vpop.permute.xlu0 %2240  ;;  %3822 = vrot.lane.b32.xlu1 %v3818_v54, %s6610_s16  ;;  %vm4272_vm12 = vcmp.lt.s32.totalorder %v4271_v29, %v8020_v56  ;;  %vm4273_vm13 = vcmp.lt.s32.totalorder %v4271_v29, %v8028_v42 }
0x2bce   : > { %v2245_v38 = vmax.f32 %v2017_v1, %v2241_v21  ;;  %v4274_v16 = vsel %vm4272_vm12, %v8450_v10, -10000.0  ;;  %v4275_v48 = vsel %vm4273_vm13, %v8451_v40, -10000.0  ;;  %v4499_v1 = vstv %s4498_s14 }
0x2bcf   : > { %3824 = vrot.lane.b32.xlu0 %v3819_v55, %s6610_s16  ;;  %v2455_v34 = vpop.permute.xlu1 %2454  ;;  %vm4500_vm14 = vcmp.lt.s32.totalorder %v4499_v1, %v8020_v56  ;;  %vm4501_vm15 = vcmp.lt.s32.totalorder %v4499_v1, %v8028_v42  ;;  %v4727_v55 = vstv %s4726_s23 }
0x2bd0   : > { %v2460_v32 = vmax.f32 %v2232_v7, %v2455_v34  ;;  %v4286_v7 = vsel %vm4272_vm12, %v8452_v44, -10000.0  ;;  %v4502_v54 = vsel %vm4500_vm14, %v7932_v15, -10000.0  ;;  %v4503_v20 = vsel %vm4501_vm15, %v7934_v37, -10000.0 }
0x2bd1   : > { %v2457_v58 = vpop.permute.xlu0 %2456  ;;  %3834 = vrot.lane.b32.xlu1 %v3830_v8, %s6610_s16  ;;  %vm4728_vm0 = vcmp.lt.s32.totalorder %v4727_v55, %v8020_v56  ;;  %v4515_v8 = vsel %vm4501_vm15, %v7940_v51, -10000.0  ;;  %vm4729_vm2 = vcmp.lt.s32.totalorder %v4727_v55, %v8028_v42 }
0x2bd2   : > { %v2461_v63 = vmax.f32 %v2233_v30, %v2457_v58  ;;  %v8453_v30 = vld [vmem:[#allocation26_spill] sm:$0xff] }
0x2bd3   : > { %3836 = vrot.lane.b32.xlu0 %v3831_v39, %s6610_s16  ;;  %v2467_v9 = vpop.permute.xlu1 %2466  ;;  %v4287_v5 = vsel %vm4273_vm13, %v8453_v30, -10000.0 }
0x2bd4   : > { %v2472_v26 = vmax.f32 %v2244_v4, %v2467_v9  ;;  %v8455_v9 = vld [vmem:[#allocation22_spill] sm:$0xff] }
0x2bd5   : > { %v2469_v13 = vpop.permute.xlu0 %2468  ;;  %4050 = vrot.lane.b32.xlu1 %v4046_v14, %s6610_s16 }
0x2bd6   : > { %v2473_v27 = vmax.f32 %v2245_v38, %v2469_v13  ;;  %v8456_v13 = vld [vmem:[#allocation21_spill] sm:$0xff] }
0x2bd7   : > { %4052 = vrot.lane.b32.xlu0 %v4047_v50, %s6610_s16  ;;  %v2683_v0 = vpop.permute.xlu1 %2682  ;;  %v4742_v51 = vsel %vm4728_vm0, %v8456_v13, -10000.0  ;;  %v8457_v50 = vld [vmem:[#allocation25_spill] sm:$0xff] }
0x2bd8   : > { %v2688_v45 = vmax.f32 %v2460_v32, %v2683_v0  ;;  %v4514_v32 = vsel %vm4500_vm14, %v7938_v6, -10000.0  ;;  %v4743_v29 = vsel %vm4729_vm2, %v8457_v50, -10000.0 }
0x2bd9   : > { %v2685_v53 = vpop.permute.xlu0 %2684  ;;  %4062 = vrot.lane.b32.xlu1 %v4058_v22, %s6610_s16 }
0x2bda   : > { %v2689_v33 = vmax.f32 %v2461_v63, %v2685_v53  ;;  %v8454_v63 = vld [vmem:[#allocation19_spill] sm:$0xff] }
0x2bdb   : > { %4064 = vrot.lane.b32.xlu0 %v4059_v61, %s6610_s16  ;;  %v2695_v19 = vpop.permute.xlu1 %2694  ;;  %v4730_v23 = vsel %vm4728_vm0, %v8454_v63, -10000.0 }
0x2bdc   : > { %v2700_v46 = vmax.f32 %v2472_v26, %v2695_v19  ;;  %v4731_v26 = vsel %vm4729_vm2, %v8455_v9, -10000.0 }
0x2bdd   : > { %v2697_v18 = vpop.permute.xlu0 %2696  ;;  %4278 = vrot.lane.b32.xlu1 %v4274_v16, %s6610_s16 }
0x2bde   : > { %v2701_v24 = vmax.f32 %v2473_v27, %v2697_v18 }
0x2bdf   : > { %4280 = vrot.lane.b32.xlu0 %v4275_v48, %s6610_s16  ;;  %v2911_v12 = vpop.permute.xlu1 %2910 }
0x2be0   : > { %v2916_v36 = vmax.f32 %v2688_v45, %v2911_v12 }
0x2be1   : > { %v2913_v49 = vpop.permute.xlu0 %2912  ;;  %4290 = vrot.lane.b32.xlu1 %v4286_v7, %s6610_s16 }
0x2be2   : > { %v2917_v35 = vmax.f32 %v2689_v33, %v2913_v49 }
0x2be3   : > { %4292 = vrot.lane.b32.xlu0 %v4287_v5, %s6610_s16  ;;  %v2923_v4 = vpop.permute.xlu1 %2922 }
0x2be4   : > { %v2928_v17 = vmax.f32 %v2700_v46, %v2923_v4 }
0x2be5   : > { %v2925_v21 = vpop.permute.xlu0 %2924  ;;  %4506 = vrot.lane.b32.xlu1 %v4502_v54, %s6610_s16 }
0x2be6   : > { %v2929_v38 = vmax.f32 %v2701_v24, %v2925_v21 }
0x2be7   : > { %4508 = vrot.lane.b32.xlu0 %v4503_v20, %s6610_s16  ;;  %v3139_v52 = vpop.permute.xlu1 %3138 }
0x2be8   : > { %v3144_v34 = vmax.f32 %v2916_v36, %v3139_v52 }
0x2be9   : > { %v3141_v25 = vpop.permute.xlu0 %3140  ;;  %4518 = vrot.lane.b32.xlu1 %v4514_v32, %s6610_s16 }
0x2bea   : > { %v3145_v15 = vmax.f32 %v2917_v35, %v3141_v25 }
0x2beb   : > { %4520 = vrot.lane.b32.xlu0 %v4515_v8, %s6610_s16  ;;  %v3151_v37 = vpop.permute.xlu1 %3150 }
0x2bec   : > { %v3156_v58 = vmax.f32 %v2928_v17, %v3151_v37 }
0x2bed   : > { %v3153_v39 = vpop.permute.xlu0 %3152  ;;  %4734 = vrot.lane.b32.xlu1 %v4730_v23, %s6610_s16 }
0x2bee   : > { %v3157_v6 = vmax.f32 %v2929_v38, %v3153_v39 }
0x2bef   : > { %4736 = vrot.lane.b32.xlu0 %v4731_v26, %s6610_s16  ;;  %v3367_v31 = vpop.permute.xlu1 %3366 }
0x2bf0   : > { %v3372_v14 = vmax.f32 %v3144_v34, %v3367_v31 }
0x2bf1   : > { %v3369_v27 = vpop.permute.xlu0 %3368  ;;  %4746 = vrot.lane.b32.xlu1 %v4742_v51, %s6610_s16 }
0x2bf2   : > { %v3373_v47 = vmax.f32 %v3145_v15, %v3369_v27 }
0x2bf3   : > { %4748 = vrot.lane.b32.xlu0 %v4743_v29, %s6610_s16  ;;  %v3379_v0 = vpop.permute.xlu1 %3378 }
0x2bf4   : > { %v3384_v45 = vmax.f32 %v3156_v58, %v3379_v0 }
0x2bf5   : > { %v3381_v11 = vpop.permute.xlu0 %3380  ;;  %4994 = vrot.lane.b32.xlu1 %v8164_v43, %s6612_s19 }
0x2bf6   : > { %v3385_v22 = vmax.f32 %v3157_v6, %v3381_v11 }
0x2bf7   : > { %v3595_v53 = vpop.permute.xlu1 %3594  ;;  %4996 = vrot.lane.b32.xlu0 %v8159_v41, %s6612_s19  ;;  %v4955_v41 = vstv %s4954_s22 }
0x2bf8   : > { %v3600_v33 = vmax.f32 %v3372_v14, %v3595_v53  ;;  %vm4957_vm3 = vcmp.lt.s32.totalorder %v4955_v41, %v8028_v42  ;;  %vm4956_vm4 = vcmp.lt.s32.totalorder %v4955_v41, %v8020_v56  ;;  %v6613_v41 = vmov (!%p5452_p9), 0.0  }
0x2bf9   : > { %v3597_v3 = vpop.permute.xlu0 %3596  ;;  %5928 = vmatprep.subr.bf16.mxu0 (!%p5452_p9), %v6613_v41  ;;  %5936 = vmatprep.subr.bf16.mxu1 (!%p5452_p9), %v6613_v41 }
0x2bfa   : > { %v3601_v61 = vmax.f32 %v3373_v47, %v3597_v3  ;;  %5932 = vmatprep.mubr.msk.bf16.mxu0 (!%p5452_p9), %vm6614_vm5, %v6613_v41  ;;  %5940 = vmatprep.mubr.msk.bf16.mxu1 (!%p5452_p9), %vm6614_vm5, %v6613_v41 }
0x2bfb   : > { %v3607_v19 = vpop.permute.xlu1 %3606 }
0x2bfc   : > { %v3612_v46 = vmax.f32 %v3384_v45, %v3607_v19 }
0x2bfd   : > { %v3609_v10 = vpop.permute.xlu0 %3608 }
0x2bfe   : > { %v3613_v16 = vmax.f32 %v3385_v22, %v3609_v10 }
0x2c37   : > { %v4901_v18 = vpop.permute.xlu1 %4900 }
0x2c38   : > { %v4905_v24 = vmul.f32 %v8051_v28, %v4901_v18 }
0x2c39   : > { %v4899_v40 = vpop.permute.xlu0 %4898 }
0x2c3a   : > { %v4904_v48 = vmul.f32 %v8057_v2, %v4899_v40  ;;  %4986 = vrot.lane.b32.xlu0 %v4905_v24, %s6610_s16  ;;  %v4959_v2 = vsel %vm4957_vm3, %v4905_v24, -10000.0 }
0x2c3b   : > { %v4949_v43 = vpop.permute.xlu1 %4948 }
0x2c3c   : > { %v4953_v1 = vmul.f32 %v8061_v62, %v4949_v43  ;;  %4984 = vrot.lane.b32.xlu1 %v4904_v48, %s6610_s16  ;;  %v4958_v62 = vsel %vm4956_vm4, %v4904_v48, -10000.0 }
0x2c3d   : > { %v4947_v12 = vpop.permute.xlu0 %4946 }
0x2c3e   : > { %v4952_v36 = vmul.f32 %v8065_v57, %v4947_v12  ;;  %5006 = vrot.lane.b32.xlu0 %v4953_v1, %s6610_s16  ;;  %v4971_v57 = vsel %vm4957_vm3, %v4953_v1, -10000.0  ;;  %v6561_v1 = vld [vmem:[%s8348_s10] sm:$0xff] (!%p5452_p9)  }
0x2c3f   : > { %v3823_v44 = vpop.permute.xlu1 %3822  ;;  %v6562_v12 = vld [vmem:[%s8347_s9] sm:$0xff] (!%p5452_p9)   ;;  %5929 = vmatpush3.bf16.msra.mxu0 (!%p5452_p9), %v6561_v1 }
0x2c40   : > { %v3828_v28 = vmax.f32 %v3600_v33, %v3823_v44  ;;  %5004 = vrot.lane.b32.xlu1 %v4952_v36, %s6610_s16  ;;  %v4970_v42 = vsel %vm4956_vm4, %v4952_v36, -10000.0  ;;  %v6563_v36 = vld [vmem:[%s8348_s10 + $0x8] sm:$0xff] (!%p5452_p9)   ;;  %5937 = vmatpush3.bf16.msra.mxu1 (!%p5452_p9), %v6562_v12 }
0x2c41   : > { %v3825_v7 = vpop.permute.xlu0 %3824  ;;  %5930 = vmatprep.subr.bf16.mxu0 (!%p5452_p9), %v6613_v41  ;;  %v6564_v44 = vld [vmem:[%s8347_s9 + $0x8] sm:$0xff] (!%p5452_p9)   ;;  %5938 = vmatprep.subr.bf16.mxu1 (!%p5452_p9), %v6613_v41 }
0x2c42   : > { %v3829_v49 = vmax.f32 %v3601_v61, %v3825_v7  ;;  %4964 = vrot.lane.b32.xlu0 %v4959_v2, %s6610_s16 }
0x2c43   : > { %v3835_v35 = vpop.permute.xlu1 %3834  ;;  %5931 = vmatpush3.bf16.msra.mxu0 (!%p5452_p9), %v6563_v36 }
0x2c44   : > { %v3840_v30 = vmax.f32 %v3612_v46, %v3835_v35  ;;  %4962 = vrot.lane.b32.xlu1 %v4958_v62, %s6610_s16  ;;  %5939 = vmatpush3.bf16.msra.mxu1 (!%p5452_p9), %v6564_v44  ;;  %v5459_v62 = vld [vmem:[%s8349_s11] ss:$0 sm:$0xff] (!%p5452_p9) }
0x2c45   : > { %v3837_v5 = vpop.permute.xlu0 %3836 }
0x2c46   : > { %v3841_v4 = vmax.f32 %v3613_v16, %v3837_v5  ;;  %4976 = vrot.lane.b32.xlu0 %v4971_v57, %s6610_s16 }
0x2c47   : > { %v4051_v17 = vpop.permute.xlu1 %4050 }
0x2c48   : > { %v4056_v54 = vmax.f32 %v3828_v28, %v4051_v17  ;;  %4974 = vrot.lane.b32.xlu1 %v4970_v42, %s6610_s16 }
0x2c49   : > { %v4053_v21 = vpop.permute.xlu0 %4052 }
0x2c4a   : > { %v4057_v56 = vmax.f32 %v3829_v49, %v4053_v21  ;;  %5016 = vrot.lane.b32.xlu0 %v8169_v60, %s6612_s19 }
0x2c4b   : > { %v4063_v38 = vpop.permute.xlu1 %4062 }
0x2c4c   : > { %v4068_v20 = vmax.f32 %v3840_v30, %v4063_v38  ;;  %5014 = vrot.lane.b32.xlu1 %v8174_v59, %s6612_s19 }
0x2c4d   : > { %v4065_v55 = vpop.permute.xlu0 %4064 }
0x2c4e   : > { %v4069_v52 = vmax.f32 %v3841_v4, %v4065_v55 }
0x2c4f   : > { %v4279_v34 = vpop.permute.xlu1 %4278 }
0x2c50   : > { %v4284_v32 = vmax.f32 %v4056_v54, %v4279_v34 }
0x2c51   : > { %v4281_v25 = vpop.permute.xlu0 %4280 }
0x2c52   : > { %v4285_v15 = vmax.f32 %v4057_v56, %v4281_v25 }
0x2c53   : > { %v4291_v8 = vpop.permute.xlu1 %4290 }
0x2c54   : > { %v4296_v37 = vmax.f32 %v4068_v20, %v4291_v8 }
0x2c55   : > { %v4293_v58 = vpop.permute.xlu0 %4292 }
0x2c56   : > { %v4297_v63 = vmax.f32 %v4069_v52, %v4293_v58 }
0x2c57   : > { %v4507_v23 = vpop.permute.xlu1 %4506 }
0x2c58   : > { %v4512_v39 = vmax.f32 %v4284_v32, %v4507_v23 }
0x2c59   : > { %v4509_v6 = vpop.permute.xlu0 %4508 }
0x2c5a   : > { %v4513_v9 = vmax.f32 %v4285_v15, %v4509_v6 }
0x2c5b   : > { %v4519_v60 = vpop.permute.xlu1 %4518 }
0x2c5c   : > { %v4524_v26 = vmax.f32 %v4296_v37, %v4519_v60 }
0x2c5d   : > { %v4521_v31 = vpop.permute.xlu0 %4520 }
0x2c5e   : > { %v4525_v14 = vmax.f32 %v4297_v63, %v4521_v31 }
0x2c5f   : > { %v4735_v13 = vpop.permute.xlu1 %4734 }
0x2c60   : > { %v4740_v59 = vmax.f32 %v4512_v39, %v4735_v13 }
0x2c61   : > { %v4737_v51 = vpop.permute.xlu0 %4736 }
0x2c62   : > { %v4741_v27 = vmax.f32 %v4513_v9, %v4737_v51 }
0x2c63   : > { %v4747_v47 = vpop.permute.xlu1 %4746 }
0x2c64   : > { %v4752_v50 = vmax.f32 %v4524_v26, %v4747_v47 }
0x2c65   : > { %v4749_v29 = vpop.permute.xlu0 %4748 }
0x2c66   : > { %v4753_v0 = vmax.f32 %v4525_v14, %v4749_v29 }
0x2c67   : > { %v4995_v45 = vpop.permute.xlu1 %4994 }
0x2c68   : > { %5000 = vst.msk [vmem:[#allocation5] sm:$0xff] %vm654_vm1, %v4995_v45 }
0x2c69   : > { %v4997_v11 = vpop.permute.xlu0 %4996 }
0x2c6a   : > { %5001 = vst.msk [vmem:[#allocation5 + $0x8] sm:$0xff] %vm654_vm1, %v4997_v11 }
0x2cac   : > { %v4987_v22 = vpop.permute.xlu0 %4986 }
0x2cad   : > { %4991 = vst.msk [vmem:[#allocation4 + $0x8] sm:$0xff] %vm654_vm1, %v4987_v22 }
0x2cae   : > { %v4985_v53 = vpop.permute.xlu1 %4984 }
0x2caf   : > { %4990 = vst.msk [vmem:[#allocation4] sm:$0xff] %vm654_vm1, %v4985_v53 }
0x2cb0   : > { %v5007_v33 = vpop.permute.xlu0 %5006 }
0x2cb1   : > { %5011 = vst.msk [vmem:[#allocation6 + $0x8] sm:$0xff] %vm654_vm1, %v5007_v33 }
0x2cb2   : > { %v5005_v3 = vpop.permute.xlu1 %5004 }
0x2cb3   : > { %5010 = vst.msk [vmem:[#allocation6] sm:$0xff] %vm654_vm1, %v5005_v3 }
0x2cb4   : > { %v4965_v61 = vpop.permute.xlu0 %4964 }
0x2cb5   : > { %v4969_v19 = vmax.f32 %v4741_v27, %v4965_v61 }
0x2cb6   : > { %v4963_v46 = vpop.permute.xlu1 %4962 }
0x2cb7   : > { %5023 = vst.msk [vmem:[#allocation8 + $0x8] sm:$0xff] %vm654_vm1, %v4969_v19  ;;  %v4968_v10 = vmax.f32 %v4740_v59, %v4963_v46 }
0x2cb8   : > { %v4977_v16 = vpop.permute.xlu0 %4976 }
0x2cb9   : > { %5022 = vst.msk [vmem:[#allocation8] sm:$0xff] %vm654_vm1, %v4968_v10  ;;  %v4981_v18 = vmax.f32 %v4753_v0, %v4977_v16  ;;  %5029 = sbr.rel (%p5452_p9) target bundleno = 11674 (0x2d9a), region = 76  ;;  %v5030_v2 = vpack.c.bf16 (!%p5452_p9), %v4969_v19, %v4968_v10 }
0x2cba   : > { %v4975_v24 = vpop.permute.xlu1 %4974 }
0x2cbb   : > { %5025 = vst.msk [vmem:[#allocation9 + $0x8] sm:$0xff] %vm654_vm1, %v4981_v18  ;;  %v4980_v40 = vmax.f32 %v4752_v50, %v4975_v24  ;;  %5941 = vmatmul.mubr.msk.bf16.vlgmr.msra.gmra.mrb[0].mxu1 (!%p5452_p9), %vm654_vm1, %v5030_v2 }
0x2cbc   : > { %v5017_v48 = vpop.permute.xlu0 %5016 }
0x2cbd   : > { %5024 = vst.msk [vmem:[#allocation9] sm:$0xff] %vm654_vm1, %v4980_v40  ;;  %5021 = vst.msk [vmem:[#allocation7 + $0x8] sm:$0xff] %vm654_vm1, %v5017_v48  ;;  %v5035_v28 = vpack.c.bf16 (!%p5452_p9), %v4981_v18, %v4980_v40 }
0x2cbe   : > { %v5015_v43 = vpop.permute.xlu1 %5014 }
0x2cbf   : > { %5020 = vst.msk [vmem:[#allocation7] sm:$0xff] %vm654_vm1, %v5015_v43  ;;  %5933 = vmatmul.mubr.msk.bf16.vlgmr.msra.gmra.mrb[0].mxu0 (!%p5452_p9), %vm654_vm1, %v5035_v28 }
0x2d8e   : > { %v5145_v49 = vpop.f32.mrb[0].mxu1 }
0x2d8f   : > { %v5942_v57 = vpop.f32.mrb[1].mxu1 }
0x2d90   : > { %v5148_v4 = vpop.f32.mrb[2].mxu1 }
0x2d91   : > { %v5943_v21 = vpop.f32.mrb[3].mxu1 }
0x2d92   : > { %v5089_v7 = vpop.f32.mrb[0].mxu0 }
0x2d93   : > { %v5934_v35 = vpop.f32.mrb[1].mxu0  ;;  %v5146_v30 = vadd.f32 %v5145_v49, %v5089_v7 }
0x2d94   : > { %v5092_v5 = vpop.f32.mrb[2].mxu0 }
0x2d95   : > { %v5935_v42 = vpop.f32.mrb[3].mxu0  ;;  %v5159_v17 = vadd.f32 %v5459_v62, %v5146_v30  ;;  %v5149_v54 = vadd.f32 %v5148_v4, %v5092_v5 }
0x2d97   : > { %5161 = vst [vmem:[%s6731_s30] sm:$0xff] %v5159_v17  ;;  %v5160_v56 = vadd.f32 %v5459_v62, %v5149_v54 }
0x2d99   : > { %5162 = vst [vmem:[%s6731_s30 + $0x8] sm:$0xff] %v5160_v56 }
0x2d9a PF: > { %s22_s25 = sadd.s32 1, %s6603_s25   ;;  %s8458_s21 = sld [smem:[#allocation10_spill]] }
0x2d9b   : > { %p19_p10 = scmp.ge.s32.totalorder %s22_s25, 8   ;;  %s8459_s22 = sld [smem:[#allocation11_spill]] }
0x2d9c   : > { %s8460_s23 = sld [smem:[#allocation12_spill]]  ;;  %s8461_s24 = sld [smem:[#allocation13_spill]] }
0x2d9d   :  { %21 = sbr.rel (!%p19_p10) target bundleno = 3 (0x3), region = 112 }

</bundles_post_ra>
